<compile_context>
chip_gen: v7x
topology: tpu7x:2x2x1
jax: 0.10.0
libtpu: 0.0.40
codegen_flags: <defaults>
</compile_context>

<pallas_src>
import jax
import jax.numpy as jnp
from jax import lax
from jax.experimental import pallas as pl
from jax.experimental.pallas import tpu as pltpu

EPS = 1e-5  # nn.InstanceNorm2d default eps (affine=False, no running stats)


def _make_fused_kernel(h, w, c):
    """Build the fused ResnetBlock kernel for static (H, W, C)."""
    hw = h * w
    npad = (h + 2) * w        # vertically reflect-padded image, flattened rows
    base = w                  # data region starts after a W-row zero guard block
    pad_rows = npad + 2 * w   # one W-row guard block above and below the data
    c3 = 3 * c

    def build_pcat(pcat_ref, src, m_first, m_last):
        """Fill pcat_ref[base:base+npad, :] = [left | center | right] taps (bf16).

        src is an (HW, C) f32 value.  Center block = vertically reflect-padded
        src; left/right blocks are its +-1 horizontal shifts with reflection at
        columns 0 / W-1.  Invariant: the W guard rows above/below the data are
        zero -- the +-1 shifted loads touch one guard row each and those values
        are always discarded by the boundary selects.
        """
        s = src.astype(jnp.bfloat16)
        # center block (kw = 1): vertical reflect padding
        pcat_ref[base:base + w, c:2 * c] = s[w:2 * w, :]                  # reflect row 1
        pcat_ref[base + w:base + w + hw, c:2 * c] = s                     # interior rows
        pcat_ref[base + (h + 1) * w:base + (h + 2) * w, c:2 * c] = (
            s[(h - 2) * w:(h - 1) * w, :])                                # reflect row H-2
        # left / right blocks (kw = 0 / kw = 2) from +-1 shifted center reads
        sm = pcat_ref[base - 1:base - 1 + npad, c:2 * c]   # value at p-1
        sp = pcat_ref[base + 1:base + 1 + npad, c:2 * c]   # value at p+1
        pcat_ref[base:base + npad, 0:c] = jnp.where(m_first, sp, sm)       # reflect at col 0
        pcat_ref[base:base + npad, 2 * c:3 * c] = jnp.where(m_last, sm, sp)  # reflect at col W-1

    def conv3x3(pcat_ref, w_ref):
        # Three row-aligned (HW, 3C) x (3C, C) MXU matmuls, f32 accumulation.
        acc = jnp.dot(pcat_ref[base:base + hw, :], w_ref[0],
                      preferred_element_type=jnp.float32)
        acc = acc + jnp.dot(pcat_ref[base + w:base + w + hw, :], w_ref[1],
                            preferred_element_type=jnp.float32)
        acc = acc + jnp.dot(pcat_ref[base + 2 * w:base + 2 * w + hw, :], w_ref[2],
                            preferred_element_type=jnp.float32)
        return acc

    def instance_norm(y):
        # Two-pass mean/var in f32 (bias dropped upstream -> no cancellation risk).
        inv_hw = jnp.float32(1.0 / hw)
        mean = jnp.sum(y, axis=0, keepdims=True) * inv_hw
        d = y - mean
        var = jnp.sum(d * d, axis=0, keepdims=True) * inv_hw
        return d * lax.rsqrt(var + EPS)

    def kernel(x_ref, w1_ref, w2_ref, o_ref, pcat_ref):
        # Zero the guard row-blocks (see invariant documented in build_pcat).
        zeros_guard = jnp.zeros((w, c3), jnp.bfloat16)
        pcat_ref[0:w, :] = zeros_guard
        pcat_ref[base + npad:base + npad + w, :] = zeros_guard

        # Per-pixel column index -> horizontal-reflection masks, kept (npad, 1).
        col = lax.broadcasted_iota(jnp.int32, (npad, 1), 0) % w
        m_first = col == 0
        m_last = col == (w - 1)

        # Stage 1: reflect-pad -> conv3x3 -> instance norm -> ReLU (stays in VMEM)
        build_pcat(pcat_ref, x_ref[0], m_first, m_last)
        y1 = jnp.maximum(instance_norm(conv3x3(pcat_ref, w1_ref)), 0.0)

        # Stage 2: reflect-pad -> conv3x3 -> instance norm -> residual add
        build_pcat(pcat_ref, y1, m_first, m_last)
        y2 = instance_norm(conv3x3(pcat_ref, w2_ref))

        o_ref[0] = (x_ref[0] + y2).astype(o_ref.dtype)

    return kernel, pad_rows


def _vmem_limit_bytes(h, w, c):
    """Generation-aware VMEM budget with headroom for compiler scratch."""
    hw = h * w
    c3 = 3 * c
    est = (
        2 * 2 * hw * c * 4            # x + out blocks, double-buffered, f32
        + 2 * 2 * 3 * c3 * c * 2      # w1cat + w2cat blocks, double-buffered, bf16
        + (h + 4) * w * c3 * 2        # Pcat tap scratch, bf16
        + 5 * hw * c * 4              # live f32 temporaries (acc / y1 / diff / out)
        + (6 << 20))                  # headroom
    try:
        cap = int(getattr(pltpu.get_tpu_info(), "vmem_capacity_bytes", 0))
    except Exception:
        cap = 0
    if cap <= 0:
        cap = 64 << 20                # conservative fallback (v7x per-TC VMEM)
    cap -= 8 << 20                    # never request the full physical VMEM
    return int(max(16 << 20, min(cap, max(32 << 20, est))))


def resnet_block_forward(x_nchw, params):
    """Pallas forward of ResnetBlock: out = x + conv_block(x).

    params = (w1, b1, w2, b2) in PyTorch Conv2d layout.  Biases are accepted
    for API parity but unused: affine-free InstanceNorm's mean subtraction
    removes a per-channel bias exactly.
    """
    n, c, h, w = x_nchw.shape
    hw = h * w
    x_flat = (jnp.transpose(x_nchw, (0, 2, 3, 1))
              .reshape(n, hw, c).astype(jnp.float32))

    w1, _b1, w2, _b2 = params
    # PyTorch Conv2d weight (Cout, Cin, 3, 3) -> (3, 3*Cin, Cout) stacked per kh;
    # row index kw*Cin + cin matches the [left | center | right] tap buffer.
    w1cat = jnp.transpose(w1, (2, 3, 1, 0)).reshape(3, 3 * c, c).astype(jnp.bfloat16)
    w2cat = jnp.transpose(w2, (2, 3, 1, 0)).reshape(3, 3 * c, c).astype(jnp.bfloat16)

    kernel, pad_rows = _make_fused_kernel(h, w, c)

    # TODO(synk): for very large H*W*C (v7x: 64 MiB VMEM/TC) add an HW grid axis
    # with a 1-row halo and cross-tile instance-norm stat accumulation.
    # TODO(synk): mark the resident weight specs pipeline_mode=pl.Buffered(1)
    # once verified against the installed Pallas version (drops one buffer).
    # TODO(synk): optional bf16 HBM I/O for x/out (keep residual add in f32).

    out_flat = pl.pallas_call(
        kernel,
        out_shape=jax.ShapeDtypeStruct((n, hw, c), jnp.float32),
        grid=(n,),
        in_specs=[
            pl.BlockSpec((1, hw, c), lambda i: (i, 0, 0)),      # x (per-image block)
            pl.BlockSpec((3, 3 * c, c), lambda i: (0, 0, 0)),   # w1 (VMEM-resident)
            pl.BlockSpec((3, 3 * c, c), lambda i: (0, 0, 0)),   # w2 (VMEM-resident)
        ],
        out_specs=pl.BlockSpec((1, hw, c), lambda i: (i, 0, 0)),
        scratch_shapes=[pltpu.VMEM((pad_rows, 3 * c), jnp.bfloat16)],
        compiler_params=pltpu.CompilerParams(
            dimension_semantics=("parallel",),
            vmem_limit_bytes=_vmem_limit_bytes(h, w, c)),
    )(x_flat, w1cat, w2cat)

    return jnp.transpose(out_flat.reshape(n, h, w, c), (0, 3, 1, 2))  # back to NCHW


def _reference_forward(x, params):
    """Pure-JAX f32 reference mirroring the PyTorch module exactly (with bias)."""
    w1, b1, w2, b2 = params

    def stage(inp, wgt, b, relu):
        xp = jnp.pad(inp, ((0, 0), (0, 0), (1, 1), (1, 1)), mode="reflect")
        y = lax.conv_general_dilated(
            xp, wgt, (1, 1), "VALID",
            dimension_numbers=("NCHW", "OIHW", "NCHW")) + b.reshape(1, -1, 1, 1)
        mean = jnp.mean(y, axis=(2, 3), keepdims=True)
        var = jnp.mean((y - mean) ** 2, axis=(2, 3), keepdims=True)
        y = (y - mean) / jnp.sqrt(var + EPS)
        return jnp.maximum(y, 0.0) if relu else y

    return x + stage(stage(x, w1, b1, True), w2, b2, False)


def init_params(key, dim):
    """Deterministic synthetic Conv2d weights (Cout, Cin, 3, 3) + biases."""
    k1, k2, k3, k4 = jax.random.split(key, 4)
    scale = 0.1
    w1 = scale * jax.random.normal(k1, (dim, dim, 3, 3), jnp.float32)
    b1 = scale * jax.random.normal(k2, (dim,), jnp.float32)
    w2 = scale * jax.random.normal(k3, (dim, dim, 3, 3), jnp.float32)
    b2 = scale * jax.random.normal(k4, (dim,), jnp.float32)
    return w1, b1, w2, b2


if __name__ == "__main__":
    # TODO(synk): use_dropout branch (nn.Dropout(0.5)) not implemented; module
    # is instantiated with use_dropout=False (inference-equivalent anyway).
    key = jax.random.PRNGKey(0)

    def check(n, c, h, w, tol):
        kx, kp = jax.random.split(jax.random.fold_in(key, c))
        x = jax.random.normal(kx, (n, c, h, w), jnp.float32)
        params = init_params(kp, c)
        out = jax.block_until_ready(resnet_block_forward(x, params))
        ref = jax.block_until_ready(_reference_forward(x, params))
        assert out.shape == (n, c, h, w), out.shape
        err = float(jnp.max(jnp.abs(out - ref)))
        assert err < tol, (n, c, h, w, err)

    check(2, 4, 16, 16, 5e-2)      # small smoke shape (lane-sparse C)
    check(1, 128, 16, 16, 1e-1)    # lane-aligned C: exercises the bf16 MXU path
    print("KERNEL_OK")
</pallas_src>

<mosaic_0001>
module attributes {stable_mosaic.version = 11 : i64} {
  func.func @kernel(%arg0: i32, %arg1: memref<1x256x4xf32, #tpu.memory_space<vmem>>, %arg2: memref<3x12x4xbf16, #tpu.memory_space<vmem>>, %arg3: memref<3x12x4xbf16, #tpu.memory_space<vmem>>, %arg4: memref<1x256x4xf32, #tpu.memory_space<vmem>>, %arg5: memref<320x12xbf16, #tpu.memory_space<vmem>>) attributes {dimension_semantics = [#tpu.dimension_semantics<parallel>], iteration_bounds = array<i64: 2>, scalar_prefetch = 0 : i64, scratch_operands = 1 : i64, tpu.core_type = #tpu.core_type<tc>, window_params = [{transform_indices = @transform_0, window_bounds = array<i64: 1, 256, 4>}, {pipeline_mode = #tpu.pipeline_mode<synchronous>, transform_indices = @transform_1, window_bounds = array<i64: 3, 12, 4>}, {pipeline_mode = #tpu.pipeline_mode<synchronous>, transform_indices = @transform_2, window_bounds = array<i64: 3, 12, 4>}, {transform_indices = @transform_3, window_bounds = array<i64: 1, 256, 4>}]} {
    %cst = arith.constant 0.000000e+00 : bf16
    %0 = vector.broadcast %cst : bf16 to vector<16x12xbf16>
    %c0 = arith.constant 0 : index
    %c0_0 = arith.constant 0 : index
    %1 = vector.load %arg5[%c0, %c0_0] : memref<320x12xbf16, #tpu.memory_space<vmem>>, vector<16x12xbf16>
    tpu.vector_store %arg5[%c0, %c0_0], %0 {strides = array<i32>} : memref<320x12xbf16, #tpu.memory_space<vmem>>, vector<16x12xbf16>,
    %c304 = arith.constant 304 : index
    %c0_1 = arith.constant 0 : index
    %2 = vector.load %arg5[%c304, %c0_1] : memref<320x12xbf16, #tpu.memory_space<vmem>>, vector<16x12xbf16>
    tpu.vector_store %arg5[%c304, %c0_1], %0 {strides = array<i32>} : memref<320x12xbf16, #tpu.memory_space<vmem>>, vector<16x12xbf16>,
    %3 = tpu.iota {dimensions = array<i32: 0>} : vector<288x1xi32>
    %c16_i32 = arith.constant 16 : i32
    %c0_i32 = arith.constant 0 : i32
    %4 = arith.cmpi eq, %c16_i32, %c0_i32 : i32
    %c1_i32 = arith.constant 1 : i32
    %5 = arith.select %4, %c1_i32, %c16_i32 : i32
    %6 = vector.broadcast %5 : i32 to vector<288x1xi32>
    %7 = arith.remsi %3, %6 : vector<288x1xi32>
    %c0_i32_2 = arith.constant 0 : i32
    %8 = vector.broadcast %c0_i32_2 : i32 to vector<288x1xi32>
    %9 = arith.cmpi ne, %7, %8 : vector<288x1xi32>
    %c0_i32_3 = arith.constant 0 : i32
    %10 = vector.broadcast %c0_i32_3 : i32 to vector<288x1xi32>
    %11 = arith.cmpi slt, %7, %10 : vector<288x1xi32>
    %c0_i32_4 = arith.constant 0 : i32
    %12 = arith.cmpi slt, %5, %c0_i32_4 : i32
    %13 = vector.broadcast %12 : i1 to vector<288x1xi1>
    %14 = vector.broadcast %13 : vector<288x1xi1> to vector<288x1xi1>
    %15 = arith.xori %11, %14 : vector<288x1xi1>
    %16 = arith.andi %15, %9 : vector<288x1xi1>
    %17 = vector.broadcast %5 : i32 to vector<288x1xi32>
    %18 = arith.addi %7, %17 : vector<288x1xi32>
    %19 = arith.select %16, %18, %7 : vector<288x1xi1>, vector<288x1xi32>
    %c0_i32_5 = arith.constant 0 : i32
    %20 = vector.broadcast %c0_i32_5 : i32 to vector<288x1xi32>
    %21 = arith.cmpi eq, %19, %20 : vector<288x1xi32>
    %c15_i32 = arith.constant 15 : i32
    %22 = vector.broadcast %c15_i32 : i32 to vector<288x1xi32>
    %23 = arith.cmpi eq, %19, %22 : vector<288x1xi32>
    %c0_6 = arith.constant 0 : index
    %c0_7 = arith.constant 0 : index
    %c0_8 = arith.constant 0 : index
    %24 = vector.load %arg1[%c0_6, %c0_7, %c0_8] : memref<1x256x4xf32, #tpu.memory_space<vmem>>, vector<1x256x4xf32>
    %25 = vector.shape_cast %24 : vector<1x256x4xf32> to vector<256x4xf32>
    %26 = arith.truncf %25 : vector<256x4xf32> to vector<256x4xbf16>
    %27 = vector.extract_strided_slice %26 {offsets = [16, 0], sizes = [16, 4], strides = [1, 1]} : vector<256x4xbf16> to vector<16x4xbf16>
    %c16 = arith.constant 16 : index
    %c4 = arith.constant 4 : index
    %28 = vector.load %arg5[%c16, %c4] : memref<320x12xbf16, #tpu.memory_space<vmem>>, vector<16x4xbf16>
    tpu.vector_store %arg5[%c16, %c4], %27 {strides = array<i32>} : memref<320x12xbf16, #tpu.memory_space<vmem>>, vector<16x4xbf16>,
    %c32 = arith.constant 32 : index
    %c4_9 = arith.constant 4 : index
    %29 = vector.load %arg5[%c32, %c4_9] : memref<320x12xbf16, #tpu.memory_space<vmem>>, vector<256x4xbf16>
    tpu.vector_store %arg5[%c32, %c4_9], %26 {strides = array<i32>} : memref<320x12xbf16, #tpu.memory_space<vmem>>, vector<256x4xbf16>,
    %30 = vector.extract_strided_slice %26 {offsets = [224, 0], sizes = [16, 4], strides = [1, 1]} : vector<256x4xbf16> to vector<16x4xbf16>
    %c288 = arith.constant 288 : index
    %c4_10 = arith.constant 4 : index
    %31 = vector.load %arg5[%c288, %c4_10] : memref<320x12xbf16, #tpu.memory_space<vmem>>, vector<16x4xbf16>
    tpu.vector_store %arg5[%c288, %c4_10], %30 {strides = array<i32>} : memref<320x12xbf16, #tpu.memory_space<vmem>>, vector<16x4xbf16>,
    %c15 = arith.constant 15 : index
    %c4_11 = arith.constant 4 : index
    %32 = vector.load %arg5[%c15, %c4_11] : memref<320x12xbf16, #tpu.memory_space<vmem>>, vector<288x4xbf16>
    %c17 = arith.constant 17 : index
    %c4_12 = arith.constant 4 : index
    %33 = vector.load %arg5[%c17, %c4_12] : memref<320x12xbf16, #tpu.memory_space<vmem>>, vector<288x4xbf16>
    %34 = vector.shape_cast %21 : vector<288x1xi1> to vector<288x1xi1>
    %35 = vector.broadcast %34 : vector<288x1xi1> to vector<288x4xi1>
    %36 = arith.select %35, %33, %32 : vector<288x4xi1>, vector<288x4xbf16>
    %c16_13 = arith.constant 16 : index
    %c0_14 = arith.constant 0 : index
    %37 = vector.load %arg5[%c16_13, %c0_14] : memref<320x12xbf16, #tpu.memory_space<vmem>>, vector<288x4xbf16>
    tpu.vector_store %arg5[%c16_13, %c0_14], %36 {strides = array<i32>} : memref<320x12xbf16, #tpu.memory_space<vmem>>, vector<288x4xbf16>,
    %38 = vector.shape_cast %23 : vector<288x1xi1> to vector<288x1xi1>
    %39 = vector.broadcast %38 : vector<288x1xi1> to vector<288x4xi1>
    %40 = arith.select %39, %32, %33 : vector<288x4xi1>, vector<288x4xbf16>
    %c16_15 = arith.constant 16 : index
    %c8 = arith.constant 8 : index
    %41 = vector.load %arg5[%c16_15, %c8] : memref<320x12xbf16, #tpu.memory_space<vmem>>, vector<288x4xbf16>
    tpu.vector_store %arg5[%c16_15, %c8], %40 {strides = array<i32>} : memref<320x12xbf16, #tpu.memory_space<vmem>>, vector<288x4xbf16>,
    %c16_16 = arith.constant 16 : index
    %c0_17 = arith.constant 0 : index
    %42 = vector.load %arg5[%c16_16, %c0_17] : memref<320x12xbf16, #tpu.memory_space<vmem>>, vector<256x12xbf16>
    %c0_18 = arith.constant 0 : index
    %c0_19 = arith.constant 0 : index
    %c0_20 = arith.constant 0 : index
    %43 = vector.load %arg2[%c0_18, %c0_19, %c0_20] : memref<3x12x4xbf16, #tpu.memory_space<vmem>>, vector<1x12x4xbf16>
    %44 = vector.shape_cast %43 : vector<1x12x4xbf16> to vector<12x4xbf16>
    %cst_21 = arith.constant dense<0.000000e+00> : vector<256x4xf32>
    %45 = tpu.matmul %42, %44, %cst_21 {dimension_numbers = #tpu.dot_dimension_numbers<[1], [0], [0], [1], [0, 0, 1, 1], [], []>} : vector<256x12xbf16>, vector<12x4xbf16>, vector<256x4xf32> -> vector<256x4xf32>
    %c32_22 = arith.constant 32 : index
    %c0_23 = arith.constant 0 : index
    %46 = vector.load %arg5[%c32_22, %c0_23] : memref<320x12xbf16, #tpu.memory_space<vmem>>, vector<256x12xbf16>
    %c1 = arith.constant 1 : index
    %c0_24 = arith.constant 0 : index
    %c0_25 = arith.constant 0 : index
    %47 = vector.load %arg2[%c1, %c0_24, %c0_25] : memref<3x12x4xbf16, #tpu.memory_space<vmem>>, vector<1x12x4xbf16>
    %48 = vector.shape_cast %47 : vector<1x12x4xbf16> to vector<12x4xbf16>
    %cst_26 = arith.constant dense<0.000000e+00> : vector<256x4xf32>
    %49 = tpu.matmul %46, %48, %cst_26 {dimension_numbers = #tpu.dot_dimension_numbers<[1], [0], [0], [1], [0, 0, 1, 1], [], []>} : vector<256x12xbf16>, vector<12x4xbf16>, vector<256x4xf32> -> vector<256x4xf32>
    %50 = arith.addf %45, %49 : vector<256x4xf32>
    %c48 = arith.constant 48 : index
    %c0_27 = arith.constant 0 : index
    %51 = vector.load %arg5[%c48, %c0_27] : memref<320x12xbf16, #tpu.memory_space<vmem>>, vector<256x12xbf16>
    %c2 = arith.constant 2 : index
    %c0_28 = arith.constant 0 : index
    %c0_29 = arith.constant 0 : index
    %52 = vector.load %arg2[%c2, %c0_28, %c0_29] : memref<3x12x4xbf16, #tpu.memory_space<vmem>>, vector<1x12x4xbf16>
    %53 = vector.shape_cast %52 : vector<1x12x4xbf16> to vector<12x4xbf16>
    %cst_30 = arith.constant dense<0.000000e+00> : vector<256x4xf32>
    %54 = tpu.matmul %51, %53, %cst_30 {dimension_numbers = #tpu.dot_dimension_numbers<[1], [0], [0], [1], [0, 0, 1, 1], [], []>} : vector<256x12xbf16>, vector<12x4xbf16>, vector<256x4xf32> -> vector<256x4xf32>
    %55 = arith.addf %50, %54 : vector<256x4xf32>
    %cst_31 = arith.constant dense<0.000000e+00> : vector<4xf32>
    %56 = vector.multi_reduction <add>, %55, %cst_31 [0] : vector<256x4xf32> to vector<4xf32>
    %57 = vector.shape_cast %56 : vector<4xf32> to vector<1x4xf32>
    %cst_32 = arith.constant 3.906250e-03 : f32
    %58 = vector.broadcast %cst_32 : f32 to vector<1x4xf32>
    %59 = arith.mulf %57, %58 : vector<1x4xf32>
    %60 = vector.broadcast %59 : vector<1x4xf32> to vector<256x4xf32>
    %61 = arith.subf %55, %60 : vector<256x4xf32>
    %62 = arith.mulf %61, %61 : vector<256x4xf32>
    %cst_33 = arith.constant dense<0.000000e+00> : vector<4xf32>
    %63 = vector.multi_reduction <add>, %62, %cst_33 [0] : vector<256x4xf32> to vector<4xf32>
    %64 = vector.shape_cast %63 : vector<4xf32> to vector<1x4xf32>
    %cst_34 = arith.constant 3.906250e-03 : f32
    %65 = vector.broadcast %cst_34 : f32 to vector<1x4xf32>
    %66 = arith.mulf %64, %65 : vector<1x4xf32>
    %cst_35 = arith.constant 9.99999974E-6 : f32
    %67 = vector.broadcast %cst_35 : f32 to vector<1x4xf32>
    %68 = arith.addf %66, %67 : vector<1x4xf32>
    %69 = math.rsqrt %68 : vector<1x4xf32>
    %70 = vector.broadcast %69 : vector<1x4xf32> to vector<256x4xf32>
    %71 = arith.mulf %61, %70 : vector<256x4xf32>
    %cst_36 = arith.constant 0.000000e+00 : f32
    %72 = vector.broadcast %cst_36 : f32 to vector<256x4xf32>
    %73 = arith.maximumf %71, %72 : vector<256x4xf32>
    %74 = arith.truncf %73 : vector<256x4xf32> to vector<256x4xbf16>
    %75 = vector.extract_strided_slice %74 {offsets = [16, 0], sizes = [16, 4], strides = [1, 1]} : vector<256x4xbf16> to vector<16x4xbf16>
    %c16_37 = arith.constant 16 : index
    %c4_38 = arith.constant 4 : index
    %76 = vector.load %arg5[%c16_37, %c4_38] : memref<320x12xbf16, #tpu.memory_space<vmem>>, vector<16x4xbf16>
    tpu.vector_store %arg5[%c16_37, %c4_38], %75 {strides = array<i32>} : memref<320x12xbf16, #tpu.memory_space<vmem>>, vector<16x4xbf16>,
    %c32_39 = arith.constant 32 : index
    %c4_40 = arith.constant 4 : index
    %77 = vector.load %arg5[%c32_39, %c4_40] : memref<320x12xbf16, #tpu.memory_space<vmem>>, vector<256x4xbf16>
    tpu.vector_store %arg5[%c32_39, %c4_40], %74 {strides = array<i32>} : memref<320x12xbf16, #tpu.memory_space<vmem>>, vector<256x4xbf16>,
    %78 = vector.extract_strided_slice %74 {offsets = [224, 0], sizes = [16, 4], strides = [1, 1]} : vector<256x4xbf16> to vector<16x4xbf16>
    %c288_41 = arith.constant 288 : index
    %c4_42 = arith.constant 4 : index
    %79 = vector.load %arg5[%c288_41, %c4_42] : memref<320x12xbf16, #tpu.memory_space<vmem>>, vector<16x4xbf16>
    tpu.vector_store %arg5[%c288_41, %c4_42], %78 {strides = array<i32>} : memref<320x12xbf16, #tpu.memory_space<vmem>>, vector<16x4xbf16>,
    %c15_43 = arith.constant 15 : index
    %c4_44 = arith.constant 4 : index
    %80 = vector.load %arg5[%c15_43, %c4_44] : memref<320x12xbf16, #tpu.memory_space<vmem>>, vector<288x4xbf16>
    %c17_45 = arith.constant 17 : index
    %c4_46 = arith.constant 4 : index
    %81 = vector.load %arg5[%c17_45, %c4_46] : memref<320x12xbf16, #tpu.memory_space<vmem>>, vector<288x4xbf16>
    %82 = vector.shape_cast %21 : vector<288x1xi1> to vector<288x1xi1>
    %83 = vector.broadcast %82 : vector<288x1xi1> to vector<288x4xi1>
    %84 = arith.select %83, %81, %80 : vector<288x4xi1>, vector<288x4xbf16>
    %c16_47 = arith.constant 16 : index
    %c0_48 = arith.constant 0 : index
    %85 = vector.load %arg5[%c16_47, %c0_48] : memref<320x12xbf16, #tpu.memory_space<vmem>>, vector<288x4xbf16>
    tpu.vector_store %arg5[%c16_47, %c0_48], %84 {strides = array<i32>} : memref<320x12xbf16, #tpu.memory_space<vmem>>, vector<288x4xbf16>,
    %86 = vector.shape_cast %23 : vector<288x1xi1> to vector<288x1xi1>
    %87 = vector.broadcast %86 : vector<288x1xi1> to vector<288x4xi1>
    %88 = arith.select %87, %80, %81 : vector<288x4xi1>, vector<288x4xbf16>
    %c16_49 = arith.constant 16 : index
    %c8_50 = arith.constant 8 : index
    %89 = vector.load %arg5[%c16_49, %c8_50] : memref<320x12xbf16, #tpu.memory_space<vmem>>, vector<288x4xbf16>
    tpu.vector_store %arg5[%c16_49, %c8_50], %88 {strides = array<i32>} : memref<320x12xbf16, #tpu.memory_space<vmem>>, vector<288x4xbf16>,
    %c16_51 = arith.constant 16 : index
    %c0_52 = arith.constant 0 : index
    %90 = vector.load %arg5[%c16_51, %c0_52] : memref<320x12xbf16, #tpu.memory_space<vmem>>, vector<256x12xbf16>
    %c0_53 = arith.constant 0 : index
    %c0_54 = arith.constant 0 : index
    %c0_55 = arith.constant 0 : index
    %91 = vector.load %arg3[%c0_53, %c0_54, %c0_55] : memref<3x12x4xbf16, #tpu.memory_space<vmem>>, vector<1x12x4xbf16>
    %92 = vector.shape_cast %91 : vector<1x12x4xbf16> to vector<12x4xbf16>
    %cst_56 = arith.constant dense<0.000000e+00> : vector<256x4xf32>
    %93 = tpu.matmul %90, %92, %cst_56 {dimension_numbers = #tpu.dot_dimension_numbers<[1], [0], [0], [1], [0, 0, 1, 1], [], []>} : vector<256x12xbf16>, vector<12x4xbf16>, vector<256x4xf32> -> vector<256x4xf32>
    %c32_57 = arith.constant 32 : index
    %c0_58 = arith.constant 0 : index
    %94 = vector.load %arg5[%c32_57, %c0_58] : memref<320x12xbf16, #tpu.memory_space<vmem>>, vector<256x12xbf16>
    %c1_59 = arith.constant 1 : index
    %c0_60 = arith.constant 0 : index
    %c0_61 = arith.constant 0 : index
    %95 = vector.load %arg3[%c1_59, %c0_60, %c0_61] : memref<3x12x4xbf16, #tpu.memory_space<vmem>>, vector<1x12x4xbf16>
    %96 = vector.shape_cast %95 : vector<1x12x4xbf16> to vector<12x4xbf16>
    %cst_62 = arith.constant dense<0.000000e+00> : vector<256x4xf32>
    %97 = tpu.matmul %94, %96, %cst_62 {dimension_numbers = #tpu.dot_dimension_numbers<[1], [0], [0], [1], [0, 0, 1, 1], [], []>} : vector<256x12xbf16>, vector<12x4xbf16>, vector<256x4xf32> -> vector<256x4xf32>
    %98 = arith.addf %93, %97 : vector<256x4xf32>
    %c48_63 = arith.constant 48 : index
    %c0_64 = arith.constant 0 : index
    %99 = vector.load %arg5[%c48_63, %c0_64] : memref<320x12xbf16, #tpu.memory_space<vmem>>, vector<256x12xbf16>
    %c2_65 = arith.constant 2 : index
    %c0_66 = arith.constant 0 : index
    %c0_67 = arith.constant 0 : index
    %100 = vector.load %arg3[%c2_65, %c0_66, %c0_67] : memref<3x12x4xbf16, #tpu.memory_space<vmem>>, vector<1x12x4xbf16>
    %101 = vector.shape_cast %100 : vector<1x12x4xbf16> to vector<12x4xbf16>
    %cst_68 = arith.constant dense<0.000000e+00> : vector<256x4xf32>
    %102 = tpu.matmul %99, %101, %cst_68 {dimension_numbers = #tpu.dot_dimension_numbers<[1], [0], [0], [1], [0, 0, 1, 1], [], []>} : vector<256x12xbf16>, vector<12x4xbf16>, vector<256x4xf32> -> vector<256x4xf32>
    %103 = arith.addf %98, %102 : vector<256x4xf32>
    %cst_69 = arith.constant dense<0.000000e+00> : vector<4xf32>
    %104 = vector.multi_reduction <add>, %103, %cst_69 [0] : vector<256x4xf32> to vector<4xf32>
    %105 = vector.shape_cast %104 : vector<4xf32> to vector<1x4xf32>
    %cst_70 = arith.constant 3.906250e-03 : f32
    %106 = vector.broadcast %cst_70 : f32 to vector<1x4xf32>
    %107 = arith.mulf %105, %106 : vector<1x4xf32>
    %108 = vector.broadcast %107 : vector<1x4xf32> to vector<256x4xf32>
    %109 = arith.subf %103, %108 : vector<256x4xf32>
    %110 = arith.mulf %109, %109 : vector<256x4xf32>
    %cst_71 = arith.constant dense<0.000000e+00> : vector<4xf32>
    %111 = vector.multi_reduction <add>, %110, %cst_71 [0] : vector<256x4xf32> to vector<4xf32>
    %112 = vector.shape_cast %111 : vector<4xf32> to vector<1x4xf32>
    %cst_72 = arith.constant 3.906250e-03 : f32
    %113 = vector.broadcast %cst_72 : f32 to vector<1x4xf32>
    %114 = arith.mulf %112, %113 : vector<1x4xf32>
    %cst_73 = arith.constant 9.99999974E-6 : f32
    %115 = vector.broadcast %cst_73 : f32 to vector<1x4xf32>
    %116 = arith.addf %114, %115 : vector<1x4xf32>
    %117 = math.rsqrt %116 : vector<1x4xf32>
    %118 = vector.broadcast %117 : vector<1x4xf32> to vector<256x4xf32>
    %119 = arith.mulf %109, %118 : vector<256x4xf32>
    %c0_74 = arith.constant 0 : index
    %c0_75 = arith.constant 0 : index
    %c0_76 = arith.constant 0 : index
    %120 = vector.load %arg1[%c0_74, %c0_75, %c0_76] : memref<1x256x4xf32, #tpu.memory_space<vmem>>, vector<1x256x4xf32>
    %121 = vector.shape_cast %120 : vector<1x256x4xf32> to vector<256x4xf32>
    %122 = arith.addf %121, %119 : vector<256x4xf32>
    %c0_77 = arith.constant 0 : index
    %c0_78 = arith.constant 0 : index
    %c0_79 = arith.constant 0 : index
    %123 = vector.load %arg4[%c0_77, %c0_78, %c0_79] : memref<1x256x4xf32, #tpu.memory_space<vmem>>, vector<1x256x4xf32>
    %124 = vector.shape_cast %123 : vector<1x256x4xf32> to vector<256x4xf32>
    %125 = vector.shape_cast %122 : vector<256x4xf32> to vector<1x256x4xf32>
    tpu.vector_store %arg4[%c0_77, %c0_78, %c0_79], %125 {strides = array<i32>} : memref<1x256x4xf32, #tpu.memory_space<vmem>>, vector<1x256x4xf32>,
    return
  }
  func.func @transform_0(%arg0: i32) -> (i32, i32, i32) {
    %c0_i32 = arith.constant 0 : i32
    %c0_i32_0 = arith.constant 0 : i32
    %c0_i32_1 = arith.constant 0 : i32
    return %arg0, %c0_i32, %c0_i32_0 : i32, i32, i32
  }
  func.func @transform_1(%arg0: i32) -> (i32, i32, i32) {
    %c0_i32 = arith.constant 0 : i32
    %c0_i32_0 = arith.constant 0 : i32
    %c0_i32_1 = arith.constant 0 : i32
    %c0_i32_2 = arith.constant 0 : i32
    return %c0_i32, %c0_i32_0, %c0_i32_1 : i32, i32, i32
  }
  func.func @transform_2(%arg0: i32) -> (i32, i32, i32) {
    %c0_i32 = arith.constant 0 : i32
    %c0_i32_0 = arith.constant 0 : i32
    %c0_i32_1 = arith.constant 0 : i32
    %c0_i32_2 = arith.constant 0 : i32
    return %c0_i32, %c0_i32_0, %c0_i32_1 : i32, i32, i32
  }
  func.func @transform_3(%arg0: i32) -> (i32, i32, i32) {
    %c0_i32 = arith.constant 0 : i32
    %c0_i32_0 = arith.constant 0 : i32
    %c0_i32_1 = arith.constant 0 : i32
    return %arg0, %c0_i32, %c0_i32_0 : i32, i32, i32
  }
}

</mosaic_0001>

<bundles_post_ra>
// kernel: tpu_custom_call.1
= control target key start
LH: loop header
LB: loop body
LE: loop exit
PB: predicated region body
PF: predicated region fallthrough
CT: control target
= control target key end

     0   :  { %s5604_s12 = smov 0   ;;  %s8139_s0 = inlined_call_operand.vmem [shape: f32[2,256,4], index: 0, kind: input, shape index: {}]   ;;  %s8140_s1 = inlined_call_operand.vmem [shape: bf16[3,12,4], index: 1, kind: input, shape index: {}]   ;;  %s8141_s2 = inlined_call_operand.vmem [shape: bf16[3,12,4], index: 2, kind: input, shape index: {}]   ;;  %s8142_s3 = inlined_call_operand.vmem [shape: f32[2,256,4], index: 3, kind: output, shape index: {}]  }
   0x1 LB: > { %s4951_s13 = sadd.s32 4294967295, %s5578_s12   ;;  %p4955_p0 = scmp.ge.s32.totalorder %s5578_s12, 1  ;;  %s5578_s12 = sphi %s5604_s12, %s13_s12  }
   0x2   : > { %p137_p1 = scmp.lt.s32.totalorder %s5578_s12, 3 }
   0x4   : > { %p138_p2 = pnand %p4955_p0, %p137_p1 }
   0x6   : > { %141 = sbr.rel (%p138_p2) target bundleno = 1644 (0x66c), region = 32 }
   0xd   : > { %p161_p3 = scmp.lt.s32.totalorder %s4951_s13, 1  ;;  %s5580_s18 = smov 4   ;;  %v177_v38 = vlaneseq  ;;  %vm5581_vm3 = vmmov 0  }
   0xe   : > { %vm942_vm4 = vmpackc.low %vm5581_vm3, %vm5581_vm3  ;;  %vm8197_vm3 = vsmask.f32 256  ;;  %s5583_s19 = smov 124  }
   0xf   : > { %s8555_s13 = smov (!%p161_p3, %s4951_s13), 1  ;;  %v5664_v45 = vshrl.u32 %v177_v38, 7 }
  0x10   : > { %s5108_s14 = sshll.u32 %s8555_s13, 8 }
  0x11   : > { %s5620_s17 = scalar_lea.vmem %s8139_s0, %s5108_s14  ;;  %v180_v48 = vadd.s32 16, %v5664_v45  ;;  %v182_v50 = vadd.s32 32, %v5664_v45  ;;  %v184_v52 = vadd.s32 48, %v5664_v45  ;;  %v181_v53 = vadd.s32 24, %v5664_v45  ;;  %s8020_s7 = scalar_lea.vmem %s8142_s3, %s5108_s14 }
  0x12   : > { %v722_v0 = vld [vmem:[%s5620_s17 + $0x20] sm:$0xff]  ;;  %v723_v1 = vld [vmem:[%s5620_s17 + $0x28] sm:$0xff]  ;;  %v720_v2 = vld [vmem:[%s5620_s17 + $0x10] sm:$0xff]  ;;  %v183_v55 = vadd.s32 40, %v5664_v45  ;;  %v185_v60 = vadd.s32 56, %v5664_v45  ;;  %v192_v38 = vadd.s32 112, %v5664_v45 }
  0x13   : > { %v752_v3 = vpack.c.bf16 %v723_v1, %v722_v0  ;;  %v721_v4 = vld [vmem:[%s5620_s17 + $0x18] sm:$0xff]  ;;  %v724_v5 = vld [vmem:[%s5620_s17 + $0x30] sm:$0xff]  ;;  %v718_v8 = vld [vmem:[%s5620_s17] sm:$0xff]  ;;  %v232_v54 = vand.u32 15, %v180_v48  ;;  %v246_v56 = vand.u32 15, %v182_v50  ;;  %v260_v57 = vand.u32 15, %v184_v52 }
  0x14   : > { %v725_v6 = vld [vmem:[%s5620_s17 + $0x38] sm:$0xff]  ;;  %v751_v7 = vpack.c.bf16 %v721_v4, %v720_v2  ;;  %v719_v9 = vld [vmem:[%s5620_s17 + $0x8] sm:$0xff]  ;;  %v728_v12 = vld [vmem:[%s5620_s17 + $0x50] sm:$0xff]  ;;  %v239_v58 = vand.u32 15, %v181_v53  ;;  %v253_v61 = vand.u32 15, %v183_v55  ;;  %v218_v0 = vand.u32 15, %v5664_v45 }
  0x15   : > { %789 = vrot.lane.b32.xlu1 %v752_v3, %s5580_s18  ;;  %v753_v10 = vpack.c.bf16 %v725_v6, %v724_v5  ;;  %v750_v11 = vpack.c.bf16 %v719_v9, %v718_v8  ;;  %v729_v13 = vld [vmem:[%s5620_s17 + $0x58] sm:$0xff]  ;;  %v726_v14 = vld [vmem:[%s5620_s17 + $0x40] sm:$0xff]  ;;  %v727_v15 = vld [vmem:[%s5620_s17 + $0x48] sm:$0xff]  ;;  %vm5677_vm0 = vcmp.eq.s32.totalorder %v232_v54, 0  ;;  %vm5682_vm1 = vcmp.eq.s32.totalorder %v246_v56, 0 }
  0x16   : > { %767 = vrot.lane.b32.xlu0 %v751_v7, %s5580_s18  ;;  %v755_v16 = vpack.c.bf16 %v729_v13, %v728_v12  ;;  %v754_v17 = vpack.c.bf16 %v727_v15, %v726_v14  ;;  %v732_v18 = vld [vmem:[%s5620_s17 + $0x70] sm:$0xff]  ;;  %v733_v19 = vld [vmem:[%s5620_s17 + $0x78] sm:$0xff]  ;;  %v730_v20 = vld [vmem:[%s5620_s17 + $0x60] sm:$0xff]  ;;  %vm5686_vm2 = vcmp.eq.s32.totalorder %v260_v57, 0  ;;  %vm5694_vm6 = vcmp.eq.s32.totalorder %v239_v58, 15 }
  0x17   : > { %v731_v21 = vld [vmem:[%s5620_s17 + $0x68] sm:$0xff]  ;;  %v757_v22 = vpack.c.bf16 %v733_v19, %v732_v18  ;;  %v736_v24 = vld [vmem:[%s5620_s17 + $0x90] sm:$0xff]  ;;  %v737_v25 = vld [vmem:[%s5620_s17 + $0x98] sm:$0xff]  ;;  %v267_v2 = vand.u32 15, %v185_v60  ;;  %vm5701_vm8 = vcmp.eq.s32.totalorder %v253_v61, 15  ;;  %v179_v4 = vadd.s32 8, %v5664_v45 }
  0x18   : > { %v756_v23 = vpack.c.bf16 %v731_v21, %v730_v20  ;;  %v734_v26 = vld [vmem:[%s5620_s17 + $0x80] sm:$0xff]  ;;  %v735_v27 = vld [vmem:[%s5620_s17 + $0x88] sm:$0xff]  ;;  %v759_v28 = vpack.c.bf16 %v737_v25, %v736_v24  ;;  %v740_v30 = vld [vmem:[%s5620_s17 + $0xb0] sm:$0xff]  ;;  %v5582_v5 = vmov 0   ;;  %vm5716_vm11 = vcmp.eq.s32.totalorder %v218_v0, 0 }
  0x19   : > { %791 = vrot.lane.b32.xlu1 %v753_v10, %s5580_s18  ;;  %v758_v29 = vpack.c.bf16 %v735_v27, %v734_v26  ;;  %v741_v31 = vld [vmem:[%s5620_s17 + $0xb8] sm:$0xff]  ;;  %v738_v32 = vld [vmem:[%s5620_s17 + $0xa0] sm:$0xff]  ;;  %v739_v33 = vld [vmem:[%s5620_s17 + $0xa8] sm:$0xff]  ;;  %v5713_v6 = vsel %vm942_vm4, 65537, %v5582_v5  ;;  %v186_v9 = vadd.s32 64, %v5664_v45  ;;  %vm5726_vm13 = vcmp.eq.s32.totalorder %v267_v2, 15 }
  0x1a   : > { %787 = vrot.lane.b32.xlu0 %v750_v11, %s5580_s18  ;;  %v761_v34 = vpack.c.bf16 %v741_v31, %v740_v30  ;;  %v760_v35 = vpack.c.bf16 %v739_v33, %v738_v32  ;;  %v744_v36 = vld [vmem:[%s5620_s17 + $0xd0] sm:$0xff]  ;;  %v745_v37 = vld [vmem:[%s5620_s17 + $0xd8] sm:$0xff]  ;;  %v742_v39 = vld [vmem:[%s5620_s17 + $0xc0] sm:$0xff]  ;;  %v188_v13 = vadd.s32 80, %v5664_v45  ;;  %v187_v15 = vadd.s32 72, %v5664_v45 }
  0x1b   : > { %v743_v40 = vld [vmem:[%s5620_s17 + $0xc8] sm:$0xff]  ;;  %v763_v41 = vpack.c.bf16 %v745_v37, %v744_v36  ;;  %v748_v43 = vld [vmem:[%s5620_s17 + $0xf0] sm:$0xff]  ;;  %v749_v44 = vld [vmem:[%s5620_s17 + $0xf8] sm:$0xff]  ;;  %v225_v18 = vand.u32 15, %v179_v4  ;;  %v274_v21 = vand.u32 15, %v186_v9  ;;  %v189_v24 = vadd.s32 88, %v5664_v45 }
  0x1c   : > { %v762_v42 = vpack.c.bf16 %v743_v40, %v742_v39  ;;  %v746_v46 = vld [vmem:[%s5620_s17 + $0xe0] sm:$0xff]  ;;  %v747_v47 = vld [vmem:[%s5620_s17 + $0xe8] sm:$0xff]  ;;  %v765_v49 = vpack.c.bf16 %v749_v44, %v748_v43  ;;  %vm943_vm5 = vmpackc.low %vm5677_vm0, %vm5677_vm0  ;;  %v281_v26 = vand.u32 15, %v187_v15  ;;  %v316_v55 = vand.u32 15, %v192_v38 }
  0x1d   : > { %795 = vrot.lane.b32.xlu1 %v755_v16, %s5580_s18  ;;  %v764_v51 = vpack.c.bf16 %v747_v47, %v746_v46  ;;  %vm945_vm7 = vmpackc.low %vm5682_vm1, %vm5682_vm1  ;;  %v979_v7 = vsel %vm943_vm5, 65537, %v5582_v5  ;;  %vm5748_vm0 = vcmp.eq.s32.totalorder %v225_v18, 15  ;;  %vm5752_vm1 = vcmp.eq.s32.totalorder %v274_v21, 0 }
  0x1e   : > { %793 = vrot.lane.b32.xlu0 %v754_v17, %s5580_s18  ;;  %vm947_vm9 = vmpackc.low %vm5686_vm2, %vm5686_vm2  ;;  %v981_v10 = vsel %vm945_vm7, 65537, %v5582_v5  ;;  %v4961_v16 = vcombine.low %v979_v7, %v5713_v6  ;;  %v295_v37 = vand.u32 15, %v189_v24  ;;  %vm5771_vm5 = vcmp.eq.s32.totalorder %v281_v26, 15 }
  0x1f   : > { %vm1622_vm10 = vmpackc.low %vm5694_vm6, %vm5694_vm6  ;;  %v983_v11 = vsel %vm947_vm9, 65537, %v5582_v5  ;;  %v4962_v19 = vcombine.low %v981_v10, %v5713_v6  ;;  %vm8144_vm6 = vsmask.f32 7424  ;;  %v191_v47 = vadd.s32 104, %v5664_v45 }
  0x20   : > { %vm1624_vm12 = vmpackc.low %vm5701_vm8, %vm5701_vm8  ;;  %v1658_v14 = vsel %vm1622_vm10, 65537, %v5582_v5  ;;  %v4963_v20 = vcombine.low %v983_v11, %v5713_v6  ;;  %v1076_v27 = vshrl.u32 %v4961_v16, 16  ;;  %v1079_v46 = vshll.u32 %v4961_v16, 16 }
  0x21   : > { %799 = vrot.lane.b32.xlu1 %v757_v22, %s5580_s18  ;;  %vm941_vm14 = vmpackc.low %vm5716_vm11, %vm5716_vm11  ;;  %v1660_v17 = vsel %vm1624_vm12, 65537, %v5582_v5  ;;  %v4979_v22 = vcombine.low %v5713_v6, %v1658_v14  ;;  %v1084_v31 = vshrl.u32 %v4962_v19, 16  ;;  %v1087_v44 = vshll.u32 %v4962_v19, 16 }
  0x22   : > { %797 = vrot.lane.b32.xlu0 %v756_v23, %s5580_s18  ;;  %vm1626_vm15 = vmpackc.low %vm5726_vm13, %vm5726_vm13  ;;  %v288_v23 = vand.u32 15, %v188_v13  ;;  %v4980_v25 = vcombine.low %v5713_v6, %v1660_v17  ;;  %v1092_v32 = vshrl.u32 %v4963_v20, 16  ;;  %v1078_v43 = vrot.slane %v1076_v27, 7 }
  0x23   : > { %vm1620_vm4 = vmpackc.low %vm5748_vm0, %vm5748_vm0  ;;  %v1086_v48 = vrot.slane %v1084_v31, 7  ;;  %v1095_v50 = vshll.u32 %v4963_v20, 16  ;;  %v1757_v53 = vshrl.u32 %v4979_v22, 16  ;;  %vm5789_vm9 = vcmp.eq.s32.totalorder %v295_v37, 15 }
  0x24   : > { %vm5757_vm2 = vcmp.eq.s32.totalorder %v288_v23, 0  ;;  %v1656_v54 = vsel %vm1620_vm4, 65537, %v5582_v5  ;;  %vm949_vm7 = vmpackc.low %vm5752_vm1, %vm5752_vm1  ;;  %v1765_v58 = vshrl.u32 %v4980_v25, 16  ;;  %v1081_v61 = vor.u32 %v1079_v46, %v1078_v43 }
  0x25   : > { %803 = vrot.lane.b32.xlu1 %v759_v28, %s5580_s18  ;;  %v977_v28 = vsel %vm941_vm14, 65537, %v5582_v5  ;;  %vm951_vm8 = vmpackc.low %vm5757_vm2, %vm5757_vm2  ;;  %v1089_v60 = vor.u32 %v1087_v44, %v1086_v48  ;;  %v194_v63 = vadd.s32 128, %v5664_v45  ;;  %v4978_v1 = vcombine.low %v5713_v6, %v1656_v54 }
  0x26   : > { %801 = vrot.lane.b32.xlu0 %v758_v29, %s5580_s18  ;;  %v1662_v29 = vsel %vm1626_vm15, 65537, %v5582_v5  ;;  %v5763_v39 = vcombine.low %v977_v28, %v5713_v6  ;;  %v985_v2 = vsel %vm949_vm7, 65537, %v5582_v5  ;;  %vm1628_vm10 = vmpackc.low %vm5771_vm5, %vm5771_vm5  ;;  %v987_v7 = vsel %vm951_vm8, 65537, %v5582_v5 }
  0x27   : > { %v5766_v40 = vcombine.low %v5713_v6, %v1662_v29  ;;  %vm5806_vm12 = vcmp.eq.s32.totalorder %v316_v55, 0  ;;  %v193_v9 = vadd.s32 120, %v5664_v45  ;;  %v309_v13 = vand.u32 15, %v191_v47  ;;  %vm1630_vm15 = vmpackc.low %vm5789_vm9, %vm5789_vm9 }
  0x28   : > { %v1069_v56 = vshrl.u32 %v5763_v39, 16  ;;  %v4964_v14 = vcombine.low %v985_v2, %v5713_v6  ;;  %v1664_v15 = vsel %vm1628_vm10, 65537, %v5582_v5  ;;  %v330_v16 = vand.u32 15, %v194_v63  ;;  %vm955_vm14 = vmpackc.low %vm5806_vm12, %vm5806_vm12 }
  0x29   : > { %807 = vrot.lane.b32.xlu1 %v761_v34, %s5580_s18  ;;  %v190_v34 = vadd.s32 96, %v5664_v45  ;;  %v1769_v59 = vshll.u32 %v5766_v40, 16  ;;  %v196_v17 = vadd.s32 144, %v5664_v45  ;;  %v5820_v18 = vsel %vm8197_vm3, %v1078_v43, %v1089_v60 }
  0x2a   : > { %805 = vrot.lane.b32.xlu0 %v760_v35, %s5580_s18  ;;  %v1753_v35 = vshll.u32 %v4979_v22, 16  ;;  %v5811_v10 = vrot.slane %v1069_v56, 7  ;;  %v1746_v20 = vshll.u32 %v4978_v1, 16  ;;  %v4965_v21 = vcombine.low %v987_v7, %v5713_v6 }
  0x2b   : > { %v1771_v12 = vrot.slane %v1769_v59, 1  ;;  %v1749_v24 = vshrl.u32 %v4978_v1, 16  ;;  %v4982_v27 = vcombine.low %v5713_v6, %v1664_v15  ;;  %vm5844_vm0 = vcmp.eq.s32.totalorder %v309_v13, 15 }
  0x2c   : > { %v5778_v52 = vrot.slane %v1753_v35, 1  ;;  %v5824_v19 = vsel %vm8197_vm3, %v5811_v10, %v1081_v61  ;;  %v1100_v30 = vshrl.u32 %v4964_v14, 16  ;;  %v991_v31 = vsel %vm955_vm14, 65537, %v5582_v5  ;;  %vm1632_vm2 = vmpackc.low %vm5844_vm0, %vm5844_vm0 }
  0x2d   : > { %811 = vrot.lane.b32.xlu1 %v763_v41, %s5580_s18  ;;  %v1761_v41 = vshll.u32 %v4980_v25, 16  ;;  %v323_v25 = vand.u32 15, %v193_v9  ;;  %vm5849_vm1 = vcmp.eq.s32.totalorder %v330_v16, 0  ;;  %v344_v33 = vand.u32 15, %v196_v17 }
  0x2e   : > { %809 = vrot.lane.b32.xlu0 %v762_v42, %s5580_s18  ;;  %v1759_v4 = vor.u32 %v1757_v53, %v5778_v52  ;;  %v1108_v35 = vshrl.u32 %v4965_v21, 16  ;;  %v1666_v36 = vsel %vm1630_vm15, 65537, %v5582_v5  ;;  %v195_v37 = vadd.s32 136, %v5664_v45  ;;  %vm957_vm5 = vmpackc.low %vm5849_vm1, %vm5849_vm1 }
  0x2f   : > { %v1763_v57 = vrot.slane %v1761_v41, 1  ;;  %v1103_v38 = vshll.u32 %v4964_v14, 16  ;;  %vm5861_vm4 = vcmp.eq.s32.totalorder %v323_v25, 15  ;;  %v197_v43 = vadd.s32 152, %v5664_v45 }
  0x30   : > { %v1773_v46 = vshrl.u32 %v5766_v40, 16  ;;  %v1777_v47 = vshll.u32 %v4982_v27, 16  ;;  %v4983_v53 = vcombine.low %v5713_v6, %v1666_v36  ;;  %vm5873_vm7 = vcmp.eq.s32.totalorder %v344_v33, 0  ;;  %vm1634_vm8 = vmpackc.low %vm5861_vm4, %vm5861_vm4 }
  0x31   : > { %815 = vrot.lane.b32.xlu1 %v765_v49, %s5580_s18  ;;  %v5776_v49 = vrot.slane %v1092_v32, 7  ;;  %v1767_v11 = vor.u32 %v1765_v58, %v1763_v57  ;;  %v5834_v23 = vsel %vm8144_vm6, %v1759_v4, %v1763_v57  ;;  %v1110_v55 = vrot.slane %v1108_v35, 7  ;;  %vm959_vm9 = vmpackc.low %vm5873_vm7, %vm5873_vm7 }
  0x32   : > { %813 = vrot.lane.b32.xlu0 %v764_v51, %s5580_s18  ;;  %v302_v51 = vand.u32 15, %v190_v34  ;;  %8243 = vst [vmem:[#allocation4_spill] sm:$0xff] %v5834_v23  ;;  %v5853_v34 = vrot.slane %v1746_v20, 1  ;;  %v1781_v56 = vshrl.u32 %v4982_v27, 16  ;;  %v1668_v57 = vsel %vm1632_vm2, 65537, %v5582_v5 }
  0x33   : > { %v1097_v0 = vor.u32 %v1095_v50, %v5776_v49  ;;  %v5840_v26 = vsel %vm8144_vm6, %v1767_v11, %v1771_v12  ;;  %v1102_v50 = vrot.slane %v1100_v30, 7  ;;  %v337_v40 = vand.u32 15, %v195_v37 }
  0x34   : > { %vm5800_vm11 = vcmp.eq.s32.totalorder %v302_v51, 0  ;;  %8244 = vst [vmem:[#allocation5_spill] sm:$0xff] %v5840_v26  ;;  %8249 = vst [vmem:[#allocation6_spill] sm:$0xff] %v5853_v34  ;;  %v1751_v44 = vor.u32 %v1749_v24, %v5853_v34  ;;  %v1111_v51 = vshll.u32 %v4965_v21, 16  ;;  %v993_v59 = vsel %vm957_vm5, 65537, %v5582_v5 }
  0x35   : > { %vm953_vm13 = vmpackc.low %vm5800_vm11, %vm5800_vm11  ;;  %v5831_v22 = vsel %vm8197_vm3, %v1086_v48, %v1097_v0  ;;  %v4967_v48 = vcombine.low %v991_v31, %v5713_v6  ;;  %v351_v60 = vand.u32 15, %v197_v43  ;;  %v198_v61 = vadd.s32 160, %v5664_v45 }
  0x36   : > { %8242 = vst [vmem:[#allocation3_spill] sm:$0xff] %v5831_v22  ;;  %v989_v28 = vsel %vm953_vm13, 65537, %v5582_v5  ;;  %v5885_v62 = vsel %vm8144_vm6, %v1751_v44, %v5778_v52  ;;  %v1775_v63 = vor.u32 %v1773_v46, %v1771_v12  ;;  %v1779_v0 = vrot.slane %v1777_v47, 1 }
  0x37   : > { %v4966_v41 = vcombine.low %v989_v28, %v5713_v6  ;;  %8254 = vst [vmem:[#allocation7_spill] sm:$0xff] %v5885_v62  ;;  %v1124_v1 = vshrl.u32 %v4967_v48, 16  ;;  %v1785_v2 = vshll.u32 %v4983_v53, 16  ;;  %v4984_v3 = vcombine.low %v5713_v6, %v1668_v57 }
  0x38   : > { %v1670_v4 = vsel %vm1634_vm8, 65537, %v5582_v5  ;;  %v200_v7 = vadd.s32 176, %v5664_v45  ;;  %v1105_v8 = vor.u32 %v1103_v38, %v1102_v50  ;;  %v4968_v11 = vcombine.low %v993_v59, %v5713_v6 }
  0x39   : > { %v1116_v58 = vshrl.u32 %v4966_v41, 16  ;;  %v1119_v9 = vshll.u32 %v4966_v41, 16  ;;  %vm5894_vm10 = vcmp.eq.s32.totalorder %v337_v40, 15  ;;  %v995_v13 = vsel %vm959_vm9, 65537, %v5582_v5 }
  0x3a   : > { %vm5899_vm11 = vcmp.eq.s32.totalorder %v351_v60, 15  ;;  %v358_v15 = vand.u32 15, %v198_v61  ;;  %v1113_v16 = vor.u32 %v1111_v51, %v1110_v55  ;;  %v1126_v17 = vrot.slane %v1124_v1, 7  ;;  %vm1636_vm12 = vmpackc.low %vm5894_vm10, %vm5894_vm10 }
  0x3b   : > { %v1118_v12 = vrot.slane %v1116_v58, 7  ;;  %v1127_v20 = vshll.u32 %v4967_v48, 16  ;;  %v4985_v21 = vcombine.low %v5713_v6, %v1670_v4  ;;  %v1787_v24 = vrot.slane %v1785_v2, 1  ;;  %vm1638_vm13 = vmpackc.low %vm5899_vm11, %vm5899_vm11 }
  0x3c   : > { %v1789_v25 = vshrl.u32 %v4983_v53, 16  ;;  %v1793_v27 = vshll.u32 %v4984_v3, 16  ;;  %v372_v28 = vand.u32 15, %v200_v7  ;;  %v5908_v29 = vsel %vm8144_vm6, %v1775_v63, %v1779_v0 }
  0x3d   : > { %8259 = vst [vmem:[#allocation8_spill] sm:$0xff] %v5908_v29  ;;  %v1783_v30 = vor.u32 %v1781_v56, %v1779_v0  ;;  %v1132_v31 = vshrl.u32 %v4968_v11, 16  ;;  %v4969_v32 = vcombine.low %v995_v13, %v5713_v6  ;;  %v5916_v33 = vsel %vm8197_vm3, %v5776_v49, %v1105_v8 }
  0x3e   : > { %8260 = vst [vmem:[#allocation9_spill] sm:$0xff] %v5916_v33  ;;  %v1121_v35 = vor.u32 %v1119_v9, %v1118_v12  ;;  %vm5918_vm14 = vcmp.eq.s32.totalorder %v358_v15, 0  ;;  %v199_v37 = vadd.s32 168, %v5664_v45  ;;  %v1129_v38 = vor.u32 %v1127_v20, %v1126_v17 }
  0x3f   : > { %v1797_v41 = vshrl.u32 %v4984_v3, 16  ;;  %v1801_v42 = vshll.u32 %v4985_v21, 16  ;;  %v1672_v43 = vsel %vm1636_vm12, 65537, %v5582_v5  ;;  %v1791_v44 = vor.u32 %v1789_v25, %v1787_v24  ;;  %vm961_vm0 = vmpackc.low %vm5918_vm14, %vm5918_vm14 }
  0x40   : > { %v1795_v46 = vrot.slane %v1793_v27, 1  ;;  %v1674_v47 = vsel %vm1638_vm13, 65537, %v5582_v5  ;;  %vm5925_vm15 = vcmp.eq.s32.totalorder %v372_v28, 0  ;;  %v5930_v49 = vsel %vm8197_vm3, %v1102_v50, %v1113_v16 }
  0x41   : > { %8265 = vst [vmem:[#allocation10_spill] sm:$0xff] %v5930_v49  ;;  %v5932_v51 = vrot.slane %v1132_v31, 7  ;;  %v1135_v53 = vshll.u32 %v4968_v11, 16  ;;  %v1140_v54 = vshrl.u32 %v4969_v32, 16  ;;  %v5938_v56 = vsel %vm8144_vm6, %v1783_v30, %v1787_v24  ;;  %vm963_vm1 = vmpackc.low %vm5925_vm15, %vm5925_vm15 }
  0x42   : > { %v5941_v57 = vsel %vm8197_vm3, %v1110_v55, %v1121_v35  ;;  %v5944_v40 = vcombine.low %v5713_v6, %v1672_v43  ;;  %v365_v58 = vand.u32 15, %v199_v37  ;;  %v5947_v50 = vsel %vm8197_vm3, %v1118_v12, %v1129_v38 }
  0x43   : > { %v1799_v59 = vor.u32 %v1797_v41, %v1795_v46  ;;  %v1803_v60 = vrot.slane %v1801_v42, 1  ;;  %v5950_v61 = vcombine.low %v5713_v6, %v1674_v47  ;;  %v5956_v63 = vsel %vm8144_vm6, %v1791_v44, %v1795_v46 }
  0x44   : > { %8266 = vst [vmem:[#allocation11_spill] sm:$0xff] %v5956_v63  ;;  %v1805_v55 = vshrl.u32 %v4985_v21, 16  ;;  %v997_v0 = vsel %vm961_vm0, 65537, %v5582_v5  ;;  %v201_v1 = vadd.s32 184, %v5664_v45  ;;  %v1137_v2 = vor.u32 %v1135_v53, %v5932_v51 }
  0x45   : > { %v5961_v3 = vrot.slane %v1140_v54, 7  ;;  %v1143_v4 = vshll.u32 %v4969_v32, 16  ;;  %v202_v7 = vadd.s32 192, %v5664_v45  ;;  %v1809_v8 = vshll.u32 %v5944_v40, 16 }
  0x46   : > { %v999_v9 = vsel %vm963_vm1, 65537, %v5582_v5  ;;  %vm5966_vm2 = vcmp.eq.s32.totalorder %v365_v58, 15  ;;  %v204_v52 = vadd.s32 208, %v5664_v45  ;;  %v5972_v12 = vsel %vm8144_vm6, %v1799_v59, %v1803_v60 }
  0x47   : > { %v1817_v13 = vshll.u32 %v5950_v61, 16  ;;  %v4970_v14 = vcombine.low %v997_v0, %v5713_v6  ;;  %v203_v15 = vadd.s32 200, %v5664_v45  ;;  %v5977_v16 = vor.u32 %v1805_v55, %v1803_v60  ;;  %vm1640_vm4 = vmpackc.low %vm5966_vm2, %vm5966_vm2 }
  0x48   : > { %v1813_v20 = vshrl.u32 %v5944_v40, 16  ;;  %v379_v21 = vand.u32 15, %v201_v1  ;;  %v205_v24 = vadd.s32 216, %v5664_v45  ;;  %v5982_v25 = vsel %vm8197_vm3, %v1126_v17, %v1137_v2 }
  0x49   : > { %v4971_v27 = vcombine.low %v999_v9, %v5713_v6  ;;  %v386_v28 = vand.u32 15, %v202_v7  ;;  %v206_v30 = vadd.s32 224, %v5664_v45  ;;  %v1145_v31 = vor.u32 %v1143_v4, %v5961_v3 }
  0x4a   : > { %v1811_v32 = vrot.slane %v1809_v8, 1  ;;  %v400_v35 = vand.u32 15, %v204_v52  ;;  %v208_v36 = vadd.s32 240, %v5664_v45  ;;  %v1819_v37 = vrot.slane %v1817_v13, 1 }
  0x4b   : > { %v1148_v38 = vshrl.u32 %v4970_v14, 16  ;;  %v393_v41 = vand.u32 15, %v203_v15  ;;  %v207_v17 = vadd.s32 232, %v5664_v45  ;;  %v1676_v42 = vsel %vm1640_vm4, 65537, %v5582_v5 }
  0x4c   : > { %vm5993_vm5 = vcmp.eq.s32.totalorder %v379_v21, 15  ;;  %v407_v44 = vand.u32 15, %v205_v24  ;;  %v210_v46 = vadd.s32 256, %v5664_v45  ;;  %v1156_v47 = vshrl.u32 %v4971_v27, 16 }
  0x4d   : > { %vm5998_vm7 = vcmp.eq.s32.totalorder %v386_v28, 0  ;;  %v414_v53 = vand.u32 15, %v206_v30  ;;  %v212_v54 = vadd.s32 272, %v5664_v45  ;;  %v1151_v40 = vshll.u32 %v4970_v14, 16  ;;  %vm1642_vm10 = vmpackc.low %vm5993_vm5, %vm5993_vm5 }
  0x4e   : > { %vm6003_vm8 = vcmp.eq.s32.totalorder %v400_v35, 0  ;;  %v428_v59 = vand.u32 15, %v208_v36  ;;  %vm8143_vm9 = vcmask 97280   ;;  %v1150_v60 = vrot.slane %v1148_v38, 7  ;;  %vm965_vm12 = vmpackc.low %vm5998_vm7, %vm5998_vm7 }
  0x4f   : > { %vm6010_vm11 = vcmp.eq.s32.totalorder %v393_v41, 15  ;;  %v421_v0 = vand.u32 15, %v207_v17  ;;  %v211_v1 = vadd.s32 264, %v5664_v45  ;;  %175 = vst.msk [vmem:[#allocation2] sm:$0xff] %vm8143_vm9, %v5582_v5  ;;  %176 = vst.msk [vmem:[#allocation2 + $0x98] sm:$0xff] %vm8143_vm9, %v5582_v5  ;;  %v4988_v2 = vcombine.low %v5713_v6, %v1676_v42 }
  0x50   : > { %vm6023_vm13 = vcmp.eq.s32.totalorder %v407_v44, 15  ;;  %v209_v7 = vadd.s32 248, %v5664_v45  ;;  %v442_v8 = vand.u32 15, %v210_v46  ;;  %v6028_v9 = vrot.slane %v1156_v47, 7  ;;  %vm967_vm14 = vmpackc.low %vm6003_vm8, %vm6003_vm8 }
  0x51   : > { %v1159_v11 = vshll.u32 %v4971_v27, 16  ;;  %vm6033_vm15 = vcmp.eq.s32.totalorder %v414_v53, 0  ;;  %v456_v13 = vand.u32 15, %v212_v54  ;;  %v1815_v14 = vor.u32 %v1813_v20, %v1811_v32  ;;  %vm1644_vm0 = vmpackc.low %vm6010_vm11, %vm6010_vm11 }
  0x52   : > { %v1821_v15 = vshrl.u32 %v5950_v61, 16  ;;  %v1678_v21 = vsel %vm1642_vm10, 65537, %v5582_v5  ;;  %vm6047_vm1 = vcmp.eq.s32.totalorder %v428_v59, 0  ;;  %v6053_v20 = vsel %vm8197_vm3, %v5932_v51, %v1145_v31  ;;  %vm1646_vm2 = vmpackc.low %vm6023_vm13, %vm6023_vm13 }
  0x53   : > { %vm6058_vm4 = vcmp.eq.s32.totalorder %v421_v0, 15  ;;  %v449_v27 = vand.u32 15, %v211_v1  ;;  %v213_v28 = vadd.s32 280, %v5664_v45  ;;  %v1153_v30 = vor.u32 %v1151_v40, %v1150_v60  ;;  %vm971_vm9 = vmpackc.low %vm6047_vm1, %vm6047_vm1 }
  0x54   : > { %v1825_v35 = vshll.u32 %v4988_v2, 16  ;;  %v435_v36 = vand.u32 15, %v209_v7  ;;  %vm6066_vm10 = vcmp.eq.s32.totalorder %v442_v8, 0  ;;  %v1161_v31 = vor.u32 %v1159_v11, %v6028_v9  ;;  %vm1648_vm7 = vmpackc.low %vm6058_vm4, %vm6058_vm4 }
  0x55   : > { %v4989_v38 = vcombine.low %v5713_v6, %v1678_v21  ;;  %v1001_v45 = vsel %vm965_vm12, 65537, %v5582_v5  ;;  %vm6081_vm5 = vcmp.eq.s32.totalorder %v456_v13, 0  ;;  %v6087_v17 = vsel %vm8144_vm6, %v5977_v16, %v1811_v32  ;;  %vm973_vm12 = vmpackc.low %vm6066_vm10, %vm6066_vm10 }
  0x56   : > { %v6090_v42 = vsel %vm8144_vm6, %v1815_v14, %v1819_v37  ;;  %v6092_v43 = vor.u32 %v1821_v15, %v1819_v37  ;;  %v1829_v44 = vshrl.u32 %v4988_v2, 16  ;;  %v1003_v46 = vsel %vm967_vm14, 65537, %v5582_v5  ;;  %vm975_vm11 = vmpackc.low %vm6081_vm5, %vm6081_vm5 }
  0x57   : > { %v1680_v16 = vsel %vm1644_vm0, 65537, %v5582_v5  ;;  %vm6112_vm6 = vcmp.eq.s32.totalorder %v449_v27, 15  ;;  %v463_v37 = vand.u32 15, %v213_v28  ;;  %v6116_v47 = vrot.slane %v1825_v35, 1  ;;  %vm8295_vm13 = vmpackc.low %vm6033_vm15, %vm6033_vm15 }
  0x58   : > { %v6119_v48 = vcombine.low %v1001_v45, %v5713_v6  ;;  %v1682_v53 = vsel %vm1646_vm2, 65537, %v5582_v5  ;;  %vm6127_vm8 = vcmp.eq.s32.totalorder %v435_v36, 15  ;;  %v6136_v40 = vsel %vm8197_vm3, %v5961_v3, %v1153_v30  ;;  %vm1652_vm14 = vmpackc.low %vm6112_vm6, %vm6112_vm6 }
  0x59   : > { %8293 = vst [vmem:[#allocation12_spill] sm:$0xff] %v6136_v40  ;;  %v6139_v58 = vsel %vm8197_vm3, %v1150_v60, %v1161_v31  ;;  %v1833_v59 = vshll.u32 %v4989_v38, 16  ;;  %v1005_v55 = vsel %vm8295_vm13, 65537, %v5582_v5  ;;  %v6148_v0 = vcombine.low %v1003_v46, %v5713_v6  ;;  %vm1650_vm0 = vmpackc.low %vm6127_vm8, %vm6127_vm8 }
  0x5a   : > { %8294 = vst [vmem:[#allocation13_spill] sm:$0xff] %v6139_v58  ;;  %v6151_v1 = vcombine.low %v5713_v6, %v1680_v16  ;;  %v1007_v3 = vsel %vm971_vm9, 65537, %v5582_v5  ;;  %v1684_v60 = vsel %vm1648_vm7, 65537, %v5582_v5  ;;  %vm770_vm15 = vcmask 64544  }
  0x5b   : > { %v6169_v2 = vcombine.low %v5713_v6, %v1682_v53  ;;  %v1009_v4 = vsel %vm973_vm12, 65537, %v5582_v5  ;;  %v1011_v7 = vsel %vm975_vm11, 65537, %v5582_v5  ;;  %vm6181_vm9 = vcmp.eq.s32.totalorder %v463_v37, 15 }
  0x5c   : > { %v6186_v11 = vor.u32 %v1829_v44, %v6116_v47  ;;  %v1164_v52 = vshrl.u32 %v6119_v48, 16  ;;  %v1837_v13 = vshrl.u32 %v4989_v38, 16  ;;  %v4974_v14 = vcombine.low %v1005_v55, %v5713_v6  ;;  %vm1654_vm6 = vmpackc.low %vm6181_vm9, %vm6181_vm9 }
  0x5d   : > { %v6190_v15 = vrot.slane %v1833_v59, 1  ;;  %v4975_v21 = vcombine.low %v1007_v3, %v5713_v6  ;;  %v4992_v24 = vcombine.low %v5713_v6, %v1684_v60  ;;  %v1688_v61 = vsel %vm1652_vm14, 65537, %v5582_v5 }
  0x5e   : > { %v1172_v27 = vshrl.u32 %v6148_v0, 16  ;;  %v1686_v28 = vsel %vm1650_vm0, 65537, %v5582_v5  ;;  %v4976_v30 = vcombine.low %v1009_v4, %v5713_v6  ;;  %v4977_v35 = vcombine.low %v1011_v7, %v5713_v6 }
  0x5f   : > { %v1167_v36 = vshll.u32 %v6119_v48, 16  ;;  %v1175_v51 = vshll.u32 %v6148_v0, 16  ;;  %v1841_v31 = vshll.u32 %v6151_v1, 16  ;;  %v1849_v38 = vshll.u32 %v6169_v2, 16 }
  0x60   : > { %v6206_v45 = vrot.slane %v1164_v52, 7  ;;  %v1845_v41 = vshrl.u32 %v6151_v1, 16  ;;  %v1180_v44 = vshrl.u32 %v4974_v14, 16  ;;  %v6210_v46 = vcombine.low %v5713_v6, %v1688_v61 }
  0x61   : > { %v1188_v16 = vshrl.u32 %v4975_v21, 16  ;;  %v1857_v32 = vshll.u32 %v4992_v24, 16  ;;  %v4993_v37 = vcombine.low %v5713_v6, %v1686_v28  ;;  %v1690_v48 = vsel %vm1654_vm6, 65537, %v5582_v5 }
  0x62   : > { %v6214_v53 = vrot.slane %v1172_v27, 7  ;;  %v1839_v54 = vor.u32 %v1837_v13, %v6190_v15  ;;  %v1196_v59 = vshrl.u32 %v4976_v30, 16  ;;  %v1204_v55 = vshrl.u32 %v4977_v35, 16 }
  0x63   : > { %v1843_v0 = vrot.slane %v1841_v31, 1  ;;  %v1851_v3 = vrot.slane %v1849_v38, 1  ;;  %v1183_v60 = vshll.u32 %v4974_v14, 16  ;;  %v1853_v1 = vshrl.u32 %v6169_v2, 16 }
  0x64   : > { %v1182_v4 = vrot.slane %v1180_v44, 7  ;;  %v1191_v7 = vshll.u32 %v4975_v21, 16  ;;  %v1873_v8 = vshll.u32 %v6210_v46, 16  ;;  %v6220_v52 = vcombine.low %v5713_v6, %v1690_v48 }
  0x65   : > { %v6222_v5 = vrot.slane %v1188_v16, 7  ;;  %v1859_v27 = vrot.slane %v1857_v32, 1  ;;  %v1861_v28 = vshrl.u32 %v4992_v24, 16  ;;  %v1865_v13 = vshll.u32 %v4993_v37, 16 }
  0x66   : > { %vm1249_vm1 = vcmask 1040384   ;;  %vm1908_vm2 = vcmask 1046528   ;;  %v1198_v14 = vrot.slane %v1196_v59, 7  ;;  %v1199_v2 = vshll.u32 %v4976_v30, 16 }
  0x67   : > { %v6225_v38 = vrot.slane %v1204_v55, 7  ;;  %v1207_v21 = vshll.u32 %v4977_v35, 16  ;;  %vm8159_vm4 = vcmp.ne.s16.totalorder %v5831_v22, 0  ;;  %vm8156_vm5 = vcmp.ne.s16.totalorder %v5840_v26, 0 }
  0x68   : > { %v1169_v6 = vor.u32 %v1167_v36, %v6206_v45  ;;  %v1177_v24 = vor.u32 %v1175_v51, %v6214_v53  ;;  %v1847_v44 = vor.u32 %v1845_v41, %v1843_v0  ;;  %v1869_v16 = vshrl.u32 %v4993_v37, 16 }
  0x69   : > { %8298 = vst [vmem:[#allocation14_spill] sm:$0xff] %v6225_v38  ;;  %v1855_v32 = vor.u32 %v1853_v1, %v1851_v3  ;;  %v1875_v48 = vrot.slane %v1873_v8, 1  ;;  %v1877_v30 = vshrl.u32 %v6210_v46, 16  ;;  %v1881_v35 = vshll.u32 %v6220_v52, 16 }
  0x6a   : > { %v1185_v55 = vor.u32 %v1183_v60, %v1182_v4  ;;  %v1867_v34 = vrot.slane %v1865_v13, 1  ;;  %vm8299_vm10 = vsmask.f32 7424  ;;  %v1201_v41 = vor.u32 %v1199_v2, %v1198_v14 }
  0x6b   : > { %v6240_v36 = vsel %vm8299_vm10, %v6092_v43, %v6116_v47  ;;  %vm8300_vm7 = vmmov %vm8299_vm10  ;;  %v1209_v46 = vor.u32 %v1207_v21, %v6225_v38  ;;  %vm1213_vm12 = vcmp.ne.s16.totalorder %v5820_v18, 0  ;;  %vm1212_vm8 = vcmp.ne.s16.totalorder %v5824_v19, 0 }
  0x6c   : > { %v6245_v51 = vsel %vm8300_vm7, %v6186_v11, %v6190_v15  ;;  %vm8157_vm11 = vcmp.ne.s16.totalorder %v5834_v23, 0  ;;  %v6254_v43 = vsel %vm8197_vm3, %v6028_v9, %v1169_v6  ;;  %vm8303_vm13 = vmmov %vm8300_vm7  ;;  %v1871_v11 = vor.u32 %v1869_v16, %v1867_v34 }
  0x6d   : > { %8301 = vst [vmem:[#allocation15_spill] sm:$0xff] %v6245_v51  ;;  %8302 = vst [vmem:[#allocation16_spill] sm:$0xff] %v6254_v43  ;;  %v6257_v47 = vsel %vm8303_vm13, %v1839_v54, %v1843_v0  ;;  %v1072_v15 = vshll.u32 %v5763_v39, 16  ;;  %v6262_v37 = vsel %vm8197_vm3, %v6206_v45, %v1177_v24  ;;  %v1879_v60 = vor.u32 %v1877_v30, %v1875_v48  ;;  %v6284_v0 = vld [vmem:[#allocation2] sm:$0x80] }
  0x6e   : > { %8304 = vst [vmem:[#allocation17_spill] sm:$0xff] %v6257_v47  ;;  %8305 = vst [vmem:[#allocation18_spill] sm:$0xff] %v6262_v37  ;;  %v6267_v1 = vrot.slane %v1881_v35, 1  ;;  %v6273_v9 = vsel %vm8197_vm3, %v6214_v53, %v1185_v55  ;;  %vm8158_vm6 = vcmp.ne.s16.totalorder %v5885_v62, 0  ;;  %vm8154_vm10 = vcmp.ne.s16.totalorder %v5916_v33, 0 }
  0x6f   : > { %vm8306_vm14 = vmmov %vm8300_vm7  ;;  %8308 = vst [vmem:[#allocation20_spill] sm:$0xff] %v6273_v9 }
  0x70   : > { %vm8310_vm0 = vmmov %vm8300_vm7 }
  0x71   : > { %v6279_v39 = vsel %vm8310_vm0, %v1855_v32, %v1859_v27  ;;  %vm8312_vm9 = vmmov %vm8310_vm0 }
  0x72   : > { %8311 = vst [vmem:[#allocation22_spill] sm:$0xff] %v6279_v39  ;;  %vm8317_vm7 = vmmov %vm8310_vm0 }
  0x73   : > { %v6304_v24 = vsel %vm8317_vm7, %v1871_v11, %v1875_v48  ;;  %vm8319_vm13 = vmmov %vm8310_vm0  ;;  %vm8195_vm0 = vcmp.ne.s16.totalorder %v5930_v49, 0  ;;  %vm8163_vm7 = vcmp.ne.s16.totalorder %v5941_v57, 0 }
  0x74   : > { %8318 = vst [vmem:[#allocation27_spill] sm:$0xff] %v6304_v24  ;;  %v6311_v16 = vsel %vm8319_vm13, %v1879_v60, %v6267_v1  ;;  %vm8164_vm13 = vcmp.ne.s16.totalorder %v5947_v50, 0 }
  0x75   : > { %8320 = vst [vmem:[#allocation28_spill] sm:$0xff] %v6311_v16 }
  0x87   : > { %v790_v61 = vpop.permute.xlu1 %789 }
  0x88   : > { %834 = vst.msk [vmem:[#allocation2 + $0x20] sm:$0xff] %vm770_vm15, %v790_v61  ;;  %v768_v31 = vpop.permute.xlu0 %767  ;;  %v1193_v61 = vor.u32 %v1191_v7, %v6222_v5 }
  0x89   : > { %771 = vst.msk [vmem:[#allocation2 + $0x8] sm:$0xff] %vm770_vm15, %v768_v31  ;;  %833 = vst.msk [vmem:[#allocation2 + $0x18] sm:$0xff] %vm770_vm15, %v768_v31  ;;  %v1863_v31 = vor.u32 %v1861_v28, %v1859_v27  ;;  %v6300_v27 = vsel %vm8197_vm3, %v1198_v14, %v1209_v46 }
  0x8a   : > { %v6276_v54 = vsel %vm8197_vm3, %v1182_v4, %v1193_v61  ;;  %8316 = vst [vmem:[#allocation26_spill] sm:$0xff] %v6300_v27 }
  0x8b   : > { %v792_v59 = vpop.permute.xlu1 %791  ;;  %8309 = vst [vmem:[#allocation21_spill] sm:$0xff] %v6276_v54  ;;  %v6282_v45 = vsel %vm8312_vm9, %v1863_v31, %v1867_v34  ;;  %v6297_v34 = vsel %vm8197_vm3, %v6222_v5, %v1201_v41  ;;  %vm8165_vm9 = vcmp.ne.s16.totalorder %v5938_v56, 0 }
  0x8c   : > { %835 = vst.msk [vmem:[#allocation2 + $0x28] sm:$0xff] %vm770_vm15, %v792_v59  ;;  %v788_v58 = vpop.permute.xlu0 %787  ;;  %8313 = vst [vmem:[#allocation23_spill] sm:$0xff] %v6282_v45 }
  0x8d   : > { %832 = vst.msk [vmem:[#allocation2 + $0x10] sm:$0xff] %vm770_vm15, %v788_v58  ;;  %v6265_v58 = vsel %vm8306_vm14, %v1847_v44, %v1851_v3  ;;  %v6286_v3 = vld [vmem:[#allocation2 + $0x98] sm:$0x1]  ;;  %8315 = vst [vmem:[#allocation25_spill] sm:$0xff] %v6297_v34  ;;  %v6307_v44 = vor.u32 %v1072_v15, %v5811_v10  ;;  %vm8170_vm14 = vcmp.ne.s16.totalorder %v5908_v29, 0 }
  0x8e   : > { %8307 = vst [vmem:[#allocation19_spill] sm:$0xff] %v6265_v58  ;;  %8314 = vst [vmem:[#allocation24_spill] sm:$0xff] %v6286_v3 }
  0x8f   : > { %v796_v7 = vpop.permute.xlu1 %795  ;;  %v6269_v8 = vld [vmem:[#allocation2 + $0x20] sm:$0xff] }
  0x90   : > { %837 = vst.msk [vmem:[#allocation2 + $0x38] sm:$0xff] %vm770_vm15, %v796_v7  ;;  %v794_v28 = vpop.permute.xlu0 %793  ;;  %v852_v13 = vld [vmem:[#allocation2 + $0x18] sm:$0xff]  ;;  %v1257_v53 = vrot.slane %v6269_v8, 7  ;;  %v6290_v2 = vld [vmem:[#allocation2 + $0x8] sm:$0xff]  ;;  %v1914_v4 = vrot.slane %v6269_v8, 1 }
  0x91   : > { %836 = vst.msk [vmem:[#allocation2 + $0x30] sm:$0xff] %vm770_vm15, %v794_v28  ;;  %v1255_v21 = vrot.slane %v852_v13, 7  ;;  %v1912_v6 = vrot.slane %v852_v13, 1 }
  0x93   : > { %v800_v30 = vpop.permute.xlu1 %799  ;;  %v1258_v35 = vsel %vm1249_vm1, %v1255_v21, %v1257_v53  ;;  %v1915_v48 = vsel %vm1908_vm2, %v1912_v6, %v1914_v4  ;;  %v6320_v55 = vld [vmem:[#allocation2 + $0x28] sm:$0xff] }
  0x94   : > { %v798_v61 = vpop.permute.xlu0 %797  ;;  %839 = vst.msk [vmem:[#allocation2 + $0x48] sm:$0xff] %vm770_vm15, %v800_v30  ;;  %v851_v31 = vld [vmem:[#allocation2 + $0x10] sm:$0xff]  ;;  %v1309_v41 = vsel %vm8159_vm4, %v6269_v8, %v1258_v35  ;;  %v1968_v46 = vsel %vm8156_vm5, %v852_v13, %v1915_v48  ;;  %v1259_v11 = vrot.slane %v6320_v55, 7  ;;  %v8152_v15 = vrot.slane %v6320_v55, 1 }
  0x95   : > { %838 = vst.msk [vmem:[#allocation2 + $0x40] sm:$0xff] %vm770_vm15, %v798_v61  ;;  %v1253_v60 = vrot.slane %v851_v31, 7  ;;  %v1350_v7 = vshll.u32 %v1309_v41, 16  ;;  %v1910_v28 = vrot.slane %v851_v31, 1  ;;  %v2005_v30 = vshrl.u32 %v1968_v46, 16 }
  0x96   : > { %v2008_v32 = vshll.u32 %v1968_v46, 16  ;;  %v1260_v35 = vsel %vm1249_vm1, %v1257_v53, %v1259_v11  ;;  %v1354_v5 = vshrl.u32 %v1309_v41, 16  ;;  %v1917_v48 = vsel %vm1908_vm2, %v1914_v4, %v8152_v15 }
  0x97   : > { %v804_v14 = vpop.permute.xlu1 %803  ;;  %v1256_v10 = vsel %vm1249_vm1, %v1253_v60, %v1255_v21  ;;  %v1352_v59 = vrot.slane %v1350_v7, 1  ;;  %v8321_v61 = vrot.slane %v6290_v2, 7  ;;  %v1913_v22 = vsel %vm1908_vm2, %v1910_v28, %v1912_v6 }
  0x98   : > { %v802_v3 = vpop.permute.xlu0 %801  ;;  %841 = vst.msk [vmem:[#allocation2 + $0x58] sm:$0xff] %vm770_vm15, %v804_v14  ;;  %v1308_v53 = vsel %vm1213_vm12, %v852_v13, %v1256_v10  ;;  %v1967_v4 = vsel %vm8157_vm11, %v851_v31, %v1913_v22  ;;  %v6349_v21 = vrot.slane %v2005_v30, 7  ;;  %v8322_v13 = vrot.slane %v6290_v2, 1  ;;  %v6357_v15 = vld [vmem:[#allocation2 + $0x30] sm:$0xff] }
  0x99   : > { %v1254_v26 = vsel %vm1249_vm1, %v8321_v61, %v1253_v60  ;;  %840 = vst.msk [vmem:[#allocation2 + $0x50] sm:$0xff] %vm770_vm15, %v802_v3  ;;  %v1342_v46 = vshll.u32 %v1308_v53, 16  ;;  %v1346_v60 = vshrl.u32 %v1308_v53, 16  ;;  %v1997_v14 = vshrl.u32 %v1967_v4, 16 }
  0x9a   : > { %v1307_v41 = vsel %vm1212_vm8, %v851_v31, %v1254_v26  ;;  %v2010_v61 = vor.u32 %v2008_v32, %v6349_v21  ;;  %v1911_v26 = vsel %vm1908_vm2, %v8322_v13, %v1910_v28  ;;  %v2000_v10 = vshll.u32 %v1967_v4, 16 }
  0x9b   : > { %v1334_v7 = vshll.u32 %v1307_v41, 16  ;;  %v1338_v6 = vshrl.u32 %v1307_v41, 16  ;;  %v1344_v22 = vrot.slane %v1342_v46, 1  ;;  %v6365_v31 = vsel %vm8158_vm6, %v6290_v2, %v1911_v26  ;;  %v808_v30 = vpop.permute.xlu1 %807 }
  0x9c   : > { %v1310_v32 = vsel %vm8154_vm10, %v6320_v55, %v1260_v35  ;;  %v806_v53 = vpop.permute.xlu0 %805  ;;  %v1999_v28 = vrot.slane %v1997_v14, 7  ;;  %v1989_v41 = vshrl.u32 %v6365_v31, 16  ;;  %843 = vst.msk [vmem:[#allocation2 + $0x68] sm:$0xff] %vm770_vm15, %v808_v30  ;;  %v1356_v4 = vor.u32 %v1354_v5, %v1352_v59 }
  0x9d   : > { %v6360_v3 = vrot.slane %v1334_v7, 1  ;;  %v1358_v46 = vshll.u32 %v1310_v32, 16  ;;  %v1348_v7 = vor.u32 %v1346_v60, %v1344_v22  ;;  %842 = vst.msk [vmem:[#allocation2 + $0x60] sm:$0xff] %vm770_vm15, %v806_v53  ;;  %v1261_v26 = vrot.slane %v6357_v15, 7 }
  0x9e   : > { %v1362_v23 = vshrl.u32 %v1310_v32, 16  ;;  %vm8167_vm10 = vcmp.ne.s16.totalorder %v5956_v63, 0  ;;  %v2011_v35 = vsel %vm8197_vm3, %v1999_v28, %v2010_v61  ;;  %v6378_v14 = vrot.slane %v1989_v41, 7  ;;  %v8330_v63 = vld [vmem:[#allocation13_spill] sm:$0xff] }
  0x9f   : > { %v1340_v13 = vor.u32 %v1338_v6, %v6360_v3  ;;  %v2002_v33 = vor.u32 %v2000_v10, %v1999_v28  ;;  %v1360_v30 = vrot.slane %v1358_v46, 1  ;;  %vm8168_vm5 = vcmp.ne.s16.totalorder %v5972_v12, 0  ;;  %v812_v53 = vpop.permute.xlu1 %811 }
  0xa0   : > { %vm8323_vm11 = vsmask.f32 7424  ;;  %v1262_v6 = vsel %vm1249_vm1, %v1259_v11, %v1261_v26  ;;  %v1969_v32 = vsel %vm8170_vm14, %v6269_v8, %v1917_v48  ;;  %v810_v11 = vpop.permute.xlu0 %809  ;;  %845 = vst.msk [vmem:[#allocation2 + $0x78] sm:$0xff] %vm770_vm15, %v812_v53  ;;  %v856_v8 = vld [vmem:[#allocation2 + $0x38] sm:$0xff]  ;;  %v6396_v48 = vld [vmem:[#allocation2 + $0x40] sm:$0xff]  ;;  %vm8177_vm14 = vcmp.ne.s16.totalorder %v6254_v43, 0 }
  0xa1   : > { %v1353_v5 = vsel %vm8323_vm11, %v1348_v7, %v1352_v59  ;;  %vm8324_vm6 = vmmov %vm8323_vm11  ;;  %v2003_v61 = vsel %vm8197_vm3, %v6378_v14, %v2002_v33  ;;  %v1311_v59 = vsel %vm8195_vm0, %v6357_v15, %v1262_v6  ;;  %v1364_v28 = vor.u32 %v1362_v23, %v1360_v30  ;;  %844 = vst.msk [vmem:[#allocation2 + $0x70] sm:$0xff] %vm770_vm15, %v810_v11  ;;  %v6406_v11 = vld [vmem:[#allocation2 + $0x48] sm:$0xff] }
  0xa2   : > { %v1345_v60 = vsel %vm8324_vm6, %v1340_v13, %v1344_v22  ;;  %1478 = vrot.lane.b32.xlu1 %v1353_v5, %s5583_s19  ;;  %vm8325_vm4 = vmmov %vm8324_vm6  ;;  %v2013_v22 = vshrl.u32 %v1969_v32, 16  ;;  %v1366_v41 = vshll.u32 %v1311_v59, 16  ;;  %v2016_v46 = vshll.u32 %v1969_v32, 16 }
  0xa3   : > { %1476 = vrot.lane.b32.xlu0 %v1345_v60, %s5583_s19  ;;  %v1361_v10 = vsel %vm8325_vm4, %v1356_v4, %v1360_v30  ;;  %v1918_v33 = vrot.slane %v6357_v15, 1  ;;  %vm8169_vm4 = vcmp.ne.s16.totalorder %v5982_v25, 0  ;;  %v1263_v7 = vrot.slane %v856_v8, 7  ;;  %v816_v30 = vpop.permute.xlu1 %815  ;;  %vm8327_vm11 = vmmov %vm8324_vm6 }
  0xa4   : > { %v2015_v4 = vrot.slane %v2013_v22, 7  ;;  %v1370_v13 = vshrl.u32 %v1311_v59, 16  ;;  %v1265_v5 = vrot.slane %v6396_v48, 7  ;;  %v1368_v60 = vrot.slane %v1366_v41, 1  ;;  %v814_v41 = vpop.permute.xlu0 %813  ;;  %847 = vst.msk [vmem:[#allocation2 + $0x88] sm:$0xff] %vm770_vm15, %v816_v30 }
  0xa5   : > { %v8326_v6 = vrot.slane %v6320_v55, 1  ;;  %v1920_v29 = vrot.slane %v856_v8, 1  ;;  %v1264_v22 = vsel %vm1249_vm1, %v1261_v26, %v1263_v7  ;;  %846 = vst.msk [vmem:[#allocation2 + $0x80] sm:$0xff] %vm770_vm15, %v814_v41  ;;  %848 = vst.msk [vmem:[#allocation2 + $0x90] sm:$0xff] %vm770_vm15, %v814_v41  ;;  %vm8194_vm6 = vcmp.ne.s16.totalorder %v6053_v20, 0 }
  0xa6   : > { %2136 = vrot.lane.b32.xlu1 %v2011_v35, %s5580_s18  ;;  %v2018_v32 = vor.u32 %v2016_v46, %v2015_v4  ;;  %v1369_v23 = vsel %vm8327_vm11, %v1364_v28, %v1368_v60  ;;  %v1312_v35 = vsel %vm8163_vm7, %v856_v8, %v1264_v22  ;;  %v1372_v26 = vor.u32 %v1370_v13, %v1368_v60 }
  0xa7   : > { %v1919_v53 = vsel %vm1908_vm2, %v8326_v6, %v1918_v33  ;;  %2134 = vrot.lane.b32.xlu0 %v2003_v61, %s5580_s18  ;;  %v1267_v6 = vrot.slane %v6406_v11, 7  ;;  %v1374_v61 = vshll.u32 %v1312_v35, 16  ;;  %v1266_v46 = vsel %vm1249_vm1, %v1263_v7, %v1265_v5 }
  0xa8   : > { %v1970_v59 = vsel %vm8165_vm9, %v6320_v55, %v1919_v53  ;;  %v2019_v55 = vsel %vm8197_vm3, %v6349_v21, %v2018_v32  ;;  %vm8171_vm11 = vcmp.ne.s16.totalorder %v6087_v17, 0  ;;  %v1313_v53 = vsel %vm8164_vm13, %v6396_v48, %v1266_v46 }
  0xa9   : > { %v2021_v49 = vshrl.u32 %v1970_v59, 16  ;;  %v2024_v62 = vshll.u32 %v1970_v59, 16  ;;  %v1378_v30 = vshrl.u32 %v1312_v35, 16  ;;  %v1921_v59 = vsel %vm1908_vm2, %v1918_v33, %v1920_v29 }
  0xaa   : > { %1482 = vrot.lane.b32.xlu1 %v1369_v23, %s5583_s19  ;;  %v1376_v22 = vrot.slane %v1374_v61, 1  ;;  %v1382_v21 = vshll.u32 %v1313_v53, 16  ;;  %v1971_v7 = vsel %vm8167_vm10, %v6357_v15, %v1921_v59  ;;  %v8328_v13 = vrot.slane %v6396_v48, 1 }
  0xab   : > { %v2023_v28 = vrot.slane %v2021_v49, 7  ;;  %1480 = vrot.lane.b32.xlu0 %v1361_v10, %s5583_s19  ;;  %vm8174_vm7 = vcmp.ne.s16.totalorder %v6090_v42, 0  ;;  %vm8173_vm13 = vcmp.ne.s16.totalorder %v6136_v40, 0  ;;  %v2029_v33 = vshrl.u32 %v1971_v7, 16 }
  0xac   : > { %v1923_v49 = vsel %vm1908_vm2, %v1920_v29, %v8328_v13  ;;  %v2032_v32 = vshll.u32 %v1971_v7, 16  ;;  %vm8329_vm9 = vsmask.f32 7424  ;;  %v1380_v41 = vor.u32 %v1378_v30, %v1376_v22  ;;  %v6445_v13 = vld [vmem:[#allocation2 + $0x50] sm:$0xff] }
  0xad   : > { %v2026_v60 = vor.u32 %v2024_v62, %v2023_v28  ;;  %v1972_v10 = vsel %vm8168_vm5, %v856_v8, %v1923_v49  ;;  %v1377_v23 = vsel %vm8329_vm9, %v1372_v26, %v1376_v22  ;;  %v1384_v35 = vrot.slane %v1382_v21, 1  ;;  %vm8331_vm5 = vmmov %vm8329_vm9 }
  0xae   : > { %v2037_v61 = vshrl.u32 %v1972_v10, 16  ;;  %v2031_v46 = vrot.slane %v2029_v33, 7  ;;  %v2040_v59 = vshll.u32 %v1972_v10, 16  ;;  %v1268_v29 = vsel %vm1249_vm1, %v1265_v5, %v1267_v6  ;;  %v6460_v33 = vld [vmem:[#allocation2 + $0x58] sm:$0xff] }
  0xaf   : > { %v2027_v15 = vsel %vm8197_vm3, %v2015_v4, %v2026_v60  ;;  %vm8175_vm10 = vcmp.ne.s16.totalorder %v8330_v63, 0  ;;  %2138 = vrot.lane.b32.xlu0 %v2019_v55, %s5580_s18  ;;  %v1385_v62 = vsel %vm8331_vm5, %v1380_v41, %v1384_v35  ;;  %v1314_v4 = vsel %vm8169_vm4, %v6406_v11, %v1268_v29 }
  0xb0   : > { %2140 = vrot.lane.b32.xlu1 %v2027_v15, %s5580_s18  ;;  %v6451_v8 = vrot.slane %v2037_v61, 7  ;;  %v1386_v26 = vshrl.u32 %v1313_v53, 16  ;;  %v2034_v30 = vor.u32 %v2032_v32, %v2031_v46  ;;  %v1390_v22 = vshll.u32 %v1314_v4, 16  ;;  %v6465_v32 = vld [vmem:[#allocation2 + $0x60] sm:$0xff] }
  0xb1   : > { %v1269_v5 = vrot.slane %v6445_v13, 7  ;;  %v1394_v21 = vshrl.u32 %v1314_v4, 16  ;;  %v1924_v55 = vrot.slane %v6406_v11, 1  ;;  %v1926_v60 = vrot.slane %v6445_v13, 1 }
  0xb2   : > { %v2042_v7 = vor.u32 %v2040_v59, %v6451_v8  ;;  %v1388_v49 = vor.u32 %v1386_v26, %v1384_v35  ;;  %v2035_v10 = vsel %vm8197_vm3, %v2023_v28, %v2034_v30  ;;  %v1392_v41 = vrot.slane %v1390_v22, 1 }
  0xb3   : > { %v1270_v61 = vsel %vm1249_vm1, %v1267_v6, %v1269_v5  ;;  %v1271_v53 = vrot.slane %v6460_v33, 7  ;;  %vm8179_vm5 = vcmp.ne.s16.totalorder %v6240_v36, 0  ;;  %vm8176_vm9 = vcmp.ne.s16.totalorder %v6245_v51, 0  ;;  %1484 = vrot.lane.b32.xlu0 %v1377_v23, %s5583_s19 }
  0xb4   : > { %1486 = vrot.lane.b32.xlu1 %v1385_v62, %s5583_s19  ;;  %v2043_v35 = vsel %vm8197_vm3, %v2031_v46, %v2042_v7  ;;  %v1315_v28 = vsel %vm8194_vm6, %v6445_v13, %v1270_v61  ;;  %v8332_v6 = vrot.slane %v6396_v48, 1  ;;  %v1273_v59 = vrot.slane %v6465_v32, 7 }
  0xb5   : > { %vm8333_vm4 = vsmask.f32 7424  ;;  %v1396_v4 = vor.u32 %v1394_v21, %v1392_v41  ;;  %v1398_v26 = vshll.u32 %v1315_v28, 16  ;;  %v1927_v30 = vsel %vm1908_vm2, %v1924_v55, %v1926_v60 }
  0xb6   : > { %v1925_v15 = vsel %vm1908_vm2, %v8332_v6, %v1924_v55  ;;  %v1393_v29 = vsel %vm8333_vm4, %v1388_v49, %v1392_v41  ;;  %v1272_v22 = vsel %vm1249_vm1, %v1269_v5, %v1271_v53  ;;  %v1974_v61 = vsel %vm8174_vm7, %v6406_v11, %v1927_v30 }
  0xb7   : > { %v1973_v23 = vsel %vm8171_vm11, %v6396_v48, %v1925_v15  ;;  %v1400_v7 = vrot.slane %v1398_v26, 1  ;;  %v1316_v21 = vsel %vm8173_vm13, %v6460_v33, %v1272_v22  ;;  %v1402_v49 = vshrl.u32 %v1315_v28, 16  ;;  %2142 = vrot.lane.b32.xlu0 %v2035_v10, %s5580_s18 }
  0xb8   : > { %v2045_v46 = vshrl.u32 %v1973_v23, 16  ;;  %v2048_v62 = vshll.u32 %v1973_v23, 16  ;;  %2144 = vrot.lane.b32.xlu1 %v2043_v35, %s5580_s18  ;;  %v2053_v41 = vshrl.u32 %v1974_v61, 16  ;;  %v2056_v6 = vshll.u32 %v1974_v61, 16  ;;  %v862_v35 = vld [vmem:[#allocation2 + $0x68] sm:$0xff] }
  0xb9   : > { %v1406_v55 = vshll.u32 %v1316_v21, 16  ;;  %vm8178_vm4 = vcmp.ne.s16.totalorder %v6262_v37, 0  ;;  %vm8334_vm11 = vsmask.f32 7424  ;;  %v1404_v15 = vor.u32 %v1402_v49, %v1400_v7 }
  0xba   : > { %v2047_v48 = vrot.slane %v2045_v46, 7  ;;  %v1401_v5 = vsel %vm8334_vm11, %v1396_v4, %v1400_v7  ;;  %v1274_v11 = vsel %vm1249_vm1, %v1271_v53, %v1273_v59  ;;  %v1410_v26 = vshrl.u32 %v1316_v21, 16 }
  0xbb   : > { %v2055_v30 = vrot.slane %v2053_v41, 7  ;;  %v1408_v22 = vrot.slane %v1406_v55, 1  ;;  %v1317_v10 = vsel %vm8175_vm10, %v6465_v32, %v1274_v11  ;;  %v1928_v46 = vrot.slane %v6460_v33, 1  ;;  %1488 = vrot.lane.b32.xlu0 %v1393_v29, %s5583_s19 }
  0xbc   : > { %v2050_v23 = vor.u32 %v2048_v62, %v2047_v48  ;;  %v1414_v28 = vshll.u32 %v1317_v10, 16  ;;  %v1930_v61 = vrot.slane %v6465_v32, 1  ;;  %v1275_v40 = vrot.slane %v862_v35, 7  ;;  %1490 = vrot.lane.b32.xlu1 %v1401_v5, %s5583_s19 }
  0xbd   : > { %vm8180_vm11 = vcmp.ne.s16.totalorder %v6257_v47, 0  ;;  %vm8182_vm13 = vcmp.ne.s16.totalorder %v6265_v58, 0  ;;  %vm8181_vm7 = vcmp.ne.s16.totalorder %v6273_v9, 0  ;;  %v2058_v4 = vor.u32 %v2056_v6, %v2055_v30 }
  0xbe   : > { %v2051_v53 = vsel %vm8197_vm3, %v6451_v8, %v2050_v23  ;;  %vm8335_vm10 = vsmask.f32 7424  ;;  %v1418_v7 = vshrl.u32 %v1317_v10, 16  ;;  %v1412_v21 = vor.u32 %v1410_v26, %v1408_v22 }
  0xbf   : > { %v1409_v62 = vsel %vm8335_vm10, %v1404_v15, %v1408_v22  ;;  %v1416_v49 = vrot.slane %v1414_v28, 1  ;;  %v1929_v41 = vsel %vm1908_vm2, %v1926_v60, %v1928_v46  ;;  %v1931_v55 = vsel %vm1908_vm2, %v1928_v46, %v1930_v61  ;;  %v6521_v60 = vld [vmem:[#allocation2 + $0x70] sm:$0xff]  ;;  %2146 = vrot.lane.b32.xlu0 %v2051_v53, %s5580_s18 }
  0xc0   : > { %v2059_v11 = vsel %vm8197_vm3, %v2047_v48, %v2058_v4  ;;  %v1975_v29 = vsel %vm8179_vm5, %v6445_v13, %v1929_v41  ;;  %v1976_v8 = vsel %vm8176_vm9, %v6460_v33, %v1931_v55  ;;  %v1276_v6 = vsel %vm1249_vm1, %v1273_v59, %v1275_v40  ;;  %v6531_v4 = vld [vmem:[#allocation2 + $0x78] sm:$0xff] }
  0xc1   : > { %v1417_v5 = vsel %vm8335_vm10, %v1412_v21, %v1416_v49  ;;  %v2061_v15 = vshrl.u32 %v1975_v29, 16  ;;  %v2064_v26 = vshll.u32 %v1975_v29, 16  ;;  %v2069_v23 = vshrl.u32 %v1976_v8, 16  ;;  %2148 = vrot.lane.b32.xlu1 %v2059_v11, %s5580_s18 }
  0xc2   : > { %v2072_v48 = vshll.u32 %v1976_v8, 16  ;;  %v1318_v13 = vsel %vm8177_vm14, %v862_v35, %v1276_v6  ;;  %v1420_v22 = vor.u32 %v1418_v7, %v1416_v49  ;;  %v1277_v33 = vrot.slane %v6521_v60, 7 }
  0xc3   : > { %vm8183_vm9 = vcmp.ne.s16.totalorder %v6276_v54, 0  ;;  %v2063_v59 = vrot.slane %v2061_v15, 7  ;;  %v6529_v10 = vrot.slane %v2069_v23, 7  ;;  %v1422_v28 = vshll.u32 %v1318_v13, 16  ;;  %1492 = vrot.lane.b32.xlu0 %v1409_v62, %s5583_s19 }
  0xc4   : > { %v1426_v46 = vshrl.u32 %v1318_v13, 16  ;;  %vm8185_vm10 = vcmp.ne.s16.totalorder %v6279_v39, 0  ;;  %v1278_v53 = vsel %vm1249_vm1, %v1275_v40, %v1277_v33  ;;  %v1932_v21 = vrot.slane %v862_v35, 1 }
  0xc5   : > { %v1934_v41 = vrot.slane %v6521_v60, 1  ;;  %v1279_v7 = vrot.slane %v6531_v4, 7  ;;  %v2066_v49 = vor.u32 %v2064_v26, %v2063_v59  ;;  %v2074_v55 = vor.u32 %v2072_v48, %v6529_v10  ;;  %1494 = vrot.lane.b32.xlu1 %v1417_v5, %s5583_s19 }
  0xc6   : > { %v1424_v11 = vrot.slane %v1422_v28, 1  ;;  %v1319_v29 = vsel %vm8178_vm4, %v6521_v60, %v1278_v53  ;;  %v1933_v40 = vsel %vm1908_vm2, %v1930_v61, %v1932_v21  ;;  %vm8184_vm14 = vcmp.ne.s16.totalorder %v6282_v45, 0 }
  0xc7   : > { %v1430_v8 = vshll.u32 %v1319_v29, 16  ;;  %v1935_v6 = vsel %vm1908_vm2, %v1932_v21, %v1934_v41  ;;  %v1280_v15 = vsel %vm1249_vm1, %v1277_v33, %v1279_v7  ;;  %v2067_v26 = vsel %vm8197_vm3, %v2055_v30, %v2066_v49 }
  0xc8   : > { %v2075_v23 = vsel %vm8197_vm3, %v2063_v59, %v2074_v55  ;;  %v1428_v48 = vor.u32 %v1426_v46, %v1424_v11  ;;  %v8336_v13 = vshrl.u32 %v6220_v52, 16  ;;  %v1977_v61 = vsel %vm8180_vm11, %v6465_v32, %v1933_v40  ;;  %2150 = vrot.lane.b32.xlu0 %v2067_v26, %s5580_s18 }
  0xc9   : > { %v1432_v5 = vrot.slane %v1430_v8, 1  ;;  %v1978_v33 = vsel %vm8182_vm13, %v862_v35, %v1935_v6  ;;  %v1320_v30 = vsel %vm8181_vm7, %v6531_v4, %v1280_v15  ;;  %vm8193_vm4 = vcmp.ne.s16.totalorder %v6297_v34, 0  ;;  %2152 = vrot.lane.b32.xlu1 %v2075_v23, %s5580_s18 }
  0xca   : > { %v6552_v62 = vor.u32 %v8336_v13, %v6267_v1  ;;  %v2077_v59 = vshrl.u32 %v1977_v61, 16  ;;  %v2080_v28 = vshll.u32 %v1977_v61, 16  ;;  %v2085_v46 = vshrl.u32 %v1978_v33, 16  ;;  %v6563_v1 = vld [vmem:[#allocation2 + $0x80] sm:$0xff] }
  0xcb   : > { %v2088_v52 = vshll.u32 %v1978_v33, 16  ;;  %vm8192_vm5 = vcmp.ne.s16.totalorder %v6300_v27, 0  ;;  %vm8338_vm11 = vsmask.f32 7424  ;;  %v1434_v35 = vshrl.u32 %v1319_v29, 16  ;;  %v866_v33 = vld [vmem:[#allocation2 + $0x88] sm:$0xff] }
  0xcc   : > { %8337 = vst [vmem:[#allocation13_spill] sm:$0xff] %v6552_v62  ;;  %v1425_v32 = vsel %vm8338_vm11, %v1420_v22, %v1424_v11  ;;  %v1438_v53 = vshll.u32 %v1320_v30, 16  ;;  %v1281_v21 = vrot.slane %v6563_v1, 7  ;;  %v2079_v49 = vrot.slane %v2077_v59, 7  ;;  %vm8339_vm13 = vmmov %vm8338_vm11 }
  0xcd   : > { %v6570_v55 = vrot.slane %v2085_v46, 7  ;;  %v1442_v8 = vshrl.u32 %v1320_v30, 16  ;;  %v1936_v40 = vrot.slane %v6531_v4, 1  ;;  %vm8188_vm7 = vcmp.ne.s16.totalorder %v6304_v24, 0  ;;  %1496 = vrot.lane.b32.xlu0 %v1425_v32, %s5583_s19  ;;  %v6588_v30 = vld [vmem:[#allocation2 + $0x90] sm:$0xff] }
  0xce   : > { %v1433_v6 = vsel %vm8339_vm13, %v1428_v48, %v1432_v5  ;;  %v1440_v15 = vrot.slane %v1438_v53, 1  ;;  %v1282_v26 = vsel %vm1249_vm1, %v1279_v7, %v1281_v21  ;;  %v1938_v23 = vrot.slane %v6563_v1, 1  ;;  %v8340_v53 = vld [vmem:[#allocation6_spill] sm:$0xff] }
  0xcf   : > { %vm1211_vm11 = vcmp.ne.s16.totalorder %v6307_v44, 0  ;;  %v2082_v22 = vor.u32 %v2080_v28, %v2079_v49  ;;  %v2090_v11 = vor.u32 %v2088_v52, %v6570_v55  ;;  %v1321_v29 = vsel %vm8183_vm9, %v6563_v1, %v1282_v26  ;;  %1498 = vrot.lane.b32.xlu1 %v1433_v6, %s5583_s19 }
  0xd0   : > { %v1937_v13 = vsel %vm1908_vm2, %v1934_v41, %v1936_v40  ;;  %v1436_v48 = vor.u32 %v1434_v35, %v1432_v5  ;;  %v1446_v61 = vshll.u32 %v1321_v29, 16  ;;  %vm8187_vm13 = vcmp.ne.s16.totalorder %v6311_v16, 0 }
  0xd1   : > { %v1979_v7 = vsel %vm8185_vm10, %v6521_v60, %v1937_v13  ;;  %v2083_v59 = vsel %vm8197_vm3, %v6529_v10, %v2082_v22  ;;  %v1444_v28 = vor.u32 %v1442_v8, %v1440_v15  ;;  %v2091_v52 = vsel %vm8197_vm3, %v2079_v49, %v2090_v11 }
  0xd2   : > { %v2093_v41 = vshrl.u32 %v1979_v7, 16  ;;  %v2096_v46 = vshll.u32 %v1979_v7, 16  ;;  %v1448_v32 = vrot.slane %v1446_v61, 1  ;;  %v1939_v5 = vsel %vm1908_vm2, %v1936_v40, %v1938_v23  ;;  %2154 = vrot.lane.b32.xlu0 %v2083_v59, %s5580_s18 }
  0xd3   : > { %v1283_v35 = vrot.slane %v866_v33, 7  ;;  %vm8191_vm9 = vcmp.ne.s16.totalorder %v8340_v53, 0  ;;  %v1980_v6 = vsel %vm8184_vm14, %v6531_v4, %v1939_v5  ;;  %v1285_v26 = vrot.slane %v6588_v30, 7  ;;  %2156 = vrot.lane.b32.xlu1 %v2091_v52, %s5580_s18 }
  0xd4   : > { %v2095_v60 = vrot.slane %v2093_v41, 7  ;;  %v1940_v13 = vrot.slane %v866_v33, 1  ;;  %v2101_v10 = vshrl.u32 %v1980_v6, 16  ;;  %v2104_v49 = vshll.u32 %v1980_v6, 16 }
  0xd5   : > { %v1284_v8 = vsel %vm1249_vm1, %v1281_v21, %v1283_v35  ;;  %v8341_v40 = vrot.slane %v6290_v2, 7  ;;  %v8342_v22 = vrot.slane %v6284_v0, 7  ;;  %v1450_v7 = vshrl.u32 %v1321_v29, 16 }
  0xd6   : > { %v2098_v61 = vor.u32 %v2096_v46, %v2095_v60  ;;  %v1322_v4 = vsel %vm8193_vm4, %v866_v33, %v1284_v8  ;;  %v1286_v41 = vsel %vm1249_vm1, %v1283_v35, %v1285_v26  ;;  %v2103_v59 = vrot.slane %v2101_v10, 7 }
  0xd7   : > { %v1252_v11 = vsel %vm1249_vm1, %v8342_v22, %v8341_v40  ;;  %v1454_v5 = vshll.u32 %v1322_v4, 16  ;;  %v6614_v52 = vsel %vm8192_vm5, %v6588_v30, %v1286_v41  ;;  %v1458_v21 = vshrl.u32 %v1322_v4, 16 }
  0xd8   : > { %vm8343_vm14 = vsmask.f32 7424  ;;  %v1941_v46 = vsel %vm1908_vm2, %v1938_v23, %v1940_v13  ;;  %v1942_v40 = vrot.slane %v6588_v30, 1  ;;  %v2106_v29 = vor.u32 %v2104_v49, %v2103_v59 }
  0xd9   : > { %v1441_v6 = vsel %vm8343_vm14, %v1436_v48, %v1440_v15  ;;  %vm8344_vm10 = vmmov %vm8343_vm14  ;;  %v1456_v35 = vrot.slane %v1454_v5, 1  ;;  %v1462_v10 = vshll.u32 %v6614_v52, 16  ;;  %v1981_v8 = vsel %vm8188_vm7, %v6563_v1, %v1941_v46 }
  0xda   : > { %v1449_v45 = vsel %vm8344_vm10, %v1444_v28, %v1448_v32  ;;  %1500 = vrot.lane.b32.xlu0 %v1441_v6, %s5583_s19  ;;  %v1452_v22 = vor.u32 %v1450_v7, %v1448_v32  ;;  %v2109_v15 = vshrl.u32 %v1981_v8, 16  ;;  %v1943_v48 = vsel %vm1908_vm2, %v1940_v13, %v1942_v40  ;;  %vm8346_vm7 = vmmov %vm8344_vm10 }
  0xdb   : > { %1502 = vrot.lane.b32.xlu1 %v1449_v45, %s5583_s19  ;;  %v1306_v23 = vsel %vm1211_vm11, %v6290_v2, %v1252_v11  ;;  %v2099_v28 = vsel %vm8197_vm3, %v6570_v55, %v2098_v61  ;;  %v1460_v45 = vor.u32 %v1458_v21, %v1456_v35  ;;  %v2112_v49 = vshll.u32 %v1981_v8, 16  ;;  %v8347_v8 = vld [vmem:[#allocation24_spill] sm:$0xff] }
  0xdc   : > { %v1982_v4 = vsel %vm8187_vm13, %v866_v33, %v1943_v48  ;;  %v2107_v41 = vsel %vm8197_vm3, %v2095_v60, %v2106_v29  ;;  %v2111_v5 = vrot.slane %v2109_v15, 7  ;;  %v1464_v13 = vrot.slane %v1462_v10, 1 }
  0xdd   : > { %v2117_v1 = vshrl.u32 %v1982_v4, 16  ;;  %v2120_v32 = vshll.u32 %v1982_v4, 16  ;;  %v1329_v7 = vshll.u32 %v1306_v23, 16  ;;  %vm8189_vm14 = vcmp.ne.s16.totalorder %v6225_v38, 0  ;;  %v5563_v4 = vld [vmem:[%s8140_s1] sm:$0x3f]  }
  0xde   : > { %2158 = vrot.lane.b32.xlu0 %v2099_v28, %s5580_s18  ;;  %v1457_v55 = vsel %vm8344_vm10, %v1452_v22, %v1456_v35  ;;  %v8345_v61 = vrot.slane %v6290_v2, 1  ;;  %vm8190_vm13 = vcmp.ne.s16.totalorder %v6552_v62, 0  ;;  %v1465_v60 = vsel %vm8346_vm7, %v1460_v45, %v1464_v13 }
  0xdf   : > { %2160 = vrot.lane.b32.xlu1 %v2107_v41, %s5580_s18  ;;  %v2119_v11 = vrot.slane %v2117_v1, 7  ;;  %v2114_v21 = vor.u32 %v2112_v49, %v2111_v5  ;;  %v1327_v6 = vshrl.u32 %v1306_v23, 16  ;;  %v1331_v46 = vrot.slane %v1329_v7, 1 }
  0xe0   : > { %v1965_v33 = vsel %vm8191_vm9, %v6284_v0, %v8345_v61  ;;  %v1992_v10 = vshll.u32 %v6365_v31, 16  ;;  %v1324_v35 = vsel %vm8189_vm14, %v8347_v8, %v1285_v26  ;;  %v8348_v2 = vrot.slane %v8347_v8, 1  ;;  %v5562_v0 = vld [vmem:[%s8140_s1 + $0x8] sm:$0x3f]  }
  0xe1   : > { %v2122_v29 = vor.u32 %v2120_v32, %v2119_v11  ;;  %v1332_v15 = vor.u32 %v1331_v46, %v1327_v6  ;;  %v1985_v48 = vshrl.u32 %v1965_v33, 16  ;;  %v1466_v23 = vshrl.u32 %v6614_v52, 16 }
  0xe2   : > { %v1945_v22 = vsel %vm1908_vm2, %v1942_v40, %v8348_v2  ;;  %1504 = vrot.lane.b32.xlu0 %v1457_v55, %s5583_s19  ;;  %v1994_v26 = vor.u32 %v1992_v10, %v6378_v14  ;;  %v2115_v40 = vsel %vm8197_vm3, %v2103_v59, %v2114_v21  ;;  %v1470_v49 = vshll.u32 %v1324_v35, 16  ;;  %v6696_v35 = vld [vmem:[%s8140_s1 + $0x10] sm:$0x3f]  }
  0xe3   : > { %1506 = vrot.lane.b32.xlu1 %v1465_v60, %s5583_s19  ;;  %v1983_v31 = vsel %vm8190_vm13, %v6588_v30, %v1945_v22  ;;  %v1337_v45 = vsel %vm8346_vm7, %v1332_v15, %v6360_v3  ;;  %vm8198_vm10 = vcmask 1045504   ;;  %v2123_v41 = vsel %vm8197_vm3, %v2111_v5, %v2122_v29 }
  0xe4   : > { %v2125_v28 = vshrl.u32 %v1983_v31, 16  ;;  %v2128_v1 = vshll.u32 %v1983_v31, 16  ;;  %5544 = vmatprep.subr.msk.bf16.mxu0 %vm8198_vm10, %v5562_v0  ;;  %v2282_v14 = vsel %vm8198_vm10, %v5562_v0, 0  ;;  %v1987_v59 = vrot.slane %v1985_v48, 7 }
  0xe5   : > { %5213 = vmatpush3.bf16.msra.mxu0 %v2282_v14  ;;  %v1468_v52 = vor.u32 %v1466_v23, %v1464_v13  ;;  %v1472_v32 = vrot.slane %v1470_v49, 1  ;;  %vm1528_vm14 = vcmask 31744   ;;  %vm8196_vm13 = vcmask 97344  }
  0xe6   : > { %v2127_v30 = vrot.slane %v2125_v28, 7  ;;  %2162 = vrot.lane.b32.xlu0 %v2115_v40, %s5580_s18  ;;  %5545 = vmatprep.subr.msk.bf16.mxu0 %vm8198_vm10, %v5563_v4  ;;  %v1995_v3 = vsel %vm8197_vm3, %v1987_v59, %v1994_v26  ;;  %v2454_v8 = vsel %vm8198_vm10, %v5563_v4, 0 }
  0xe7   : > { %2164 = vrot.lane.b32.xlu1 %v2123_v41, %s5580_s18  ;;  %v1473_v5 = vsel %vm8346_vm7, %v1468_v52, %v1472_v32  ;;  %vm8349_vm7 = vcmask 97280  }
  0xe8   : > { %v2130_v7 = vor.u32 %v2128_v1, %v2127_v30  ;;  %vm8350_vm9 = vmmov %vm8349_vm7 }
  0xe9   : > { %vm8355_vm5 = vmmov %vm8349_vm7 }
  0xea   : > { %1474 = vrot.lane.b32.xlu0 %v1337_v45, %s5583_s19  ;;  %v2131_v55 = vsel %vm8197_vm3, %v2119_v11, %v2130_v7  ;;  %vm8358_vm4 = vmmov %vm8355_vm5 }
  0xeb   : > { %2132 = vrot.lane.b32.xlu1 %v1995_v3, %s5580_s18  ;;  %vm8362_vm6 = vmmov %vm8358_vm4 }
  0xec   : > { %vm8363_vm0 = vmmov %vm8358_vm4 }
  0xed   : > { %vm8370_vm3 = vmmov %vm8363_vm0 }
  0xee   : > { %1508 = vrot.lane.b32.xlu0 %v1473_v5, %s5583_s19 }
  0xef   : > { %2166 = vrot.lane.b32.xlu1 %v2131_v55, %s5580_s18 }
 0x114   : > { %v1479_v61 = vpop.permute.xlu1 %1478 }
 0x115   : > { %v1477_v33 = vpop.permute.xlu0 %1476  ;;  %1531 = vst.msk [vmem:[#allocation2 + $0x18] sm:$0xff] %vm1528_vm14, %v1479_v61 }
 0x116   : > { %1530 = vst.msk [vmem:[#allocation2 + $0x10] sm:$0xff] %vm1528_vm14, %v1477_v33 }
 0x118   : > { %v2137_v13 = vpop.permute.xlu1 %2136 }
 0x119   : > { %v2135_v60 = vpop.permute.xlu0 %2134  ;;  %2189 = vst.msk [vmem:[#allocation2 + $0x18] sm:$0xff] %vm8196_vm13, %v2137_v13 }
 0x11a   : > { %2188 = vst.msk [vmem:[#allocation2 + $0x10] sm:$0xff] %vm8196_vm13, %v2135_v60 }
 0x11c   : > { %v1483_v21 = vpop.permute.xlu1 %1482 }
 0x11d   : > { %v1481_v11 = vpop.permute.xlu0 %1480  ;;  %1533 = vst.msk [vmem:[#allocation2 + $0x28] sm:$0xff] %vm1528_vm14, %v1483_v21 }
 0x11e   : > { %1532 = vst.msk [vmem:[#allocation2 + $0x20] sm:$0xff] %vm1528_vm14, %v1481_v11 }
 0x120   : > { %v6690_v10 = vld [vmem:[#allocation2 + $0x18] sm:$0xff] }
 0x121   : > { %v2139_v46 = vpop.permute.xlu0 %2138  ;;  %v6688_v29 = vld [vmem:[#allocation2 + $0x10] sm:$0xff] }
 0x122   : > { %v2141_v6 = vpop.permute.xlu1 %2140  ;;  %2190 = vst.msk [vmem:[#allocation2 + $0x20] sm:$0xff] %vm8196_vm13, %v2139_v46  ;;  %5214 = vmatprep.mubr.msk.bf16.mxu0 %vm8349_vm7, %v6688_v29 }
 0x123   : > { %2191 = vst.msk [vmem:[#allocation2 + $0x28] sm:$0xff] %vm8196_vm13, %v2141_v6  ;;  %5215 = vmatmul.mubr.msk.bf16.vlgmr.msra.gmra.mrb[0].mxu0 %vm8350_vm9, %v6690_v10  ;;  %vm8351_vm9 = vmmov %vm8349_vm7 }
 0x124   : > { %5247 = vmatpush3.bf16.msra.mxu0 %v2454_v8 }
 0x125   : > { %v1485_v22 = vpop.permute.xlu0 %1484  ;;  %5546 = vmatprep.subr.msk.bf16.mxu0 %vm8198_vm10, %v6696_v35 }
 0x126   : > { %v1487_v2 = vpop.permute.xlu1 %1486  ;;  %1534 = vst.msk [vmem:[#allocation2 + $0x30] sm:$0xff] %vm1528_vm14, %v1485_v22 }
 0x127   : > { %1535 = vst.msk [vmem:[#allocation2 + $0x38] sm:$0xff] %vm1528_vm14, %v1487_v2 }
 0x129   : > { %v2143_v15 = vpop.permute.xlu0 %2142  ;;  %v6708_v31 = vld [vmem:[#allocation2 + $0x20] sm:$0xff] }
 0x12a   : > { %v2145_v0 = vpop.permute.xlu1 %2144  ;;  %v6710_v48 = vld [vmem:[#allocation2 + $0x28] sm:$0xff]  ;;  %2192 = vst.msk [vmem:[#allocation2 + $0x30] sm:$0xff] %vm8196_vm13, %v2143_v15  ;;  %5218 = vmatprep.mubr.msk.bf16.mxu0 %vm8351_vm9, %v6708_v31  ;;  %vm8352_vm9 = vmmov %vm8349_vm7 }
 0x12b   : > { %2193 = vst.msk [vmem:[#allocation2 + $0x38] sm:$0xff] %vm8196_vm13, %v2145_v0  ;;  %5219 = vmatmul.mubr.msk.bf16.gmra.mrb[4].mxu0 %vm8349_vm7, %v6710_v48 }
 0x12d   : > { %v1489_v23 = vpop.permute.xlu0 %1488 }
 0x12e   : > { %v1491_v26 = vpop.permute.xlu1 %1490  ;;  %1536 = vst.msk [vmem:[#allocation2 + $0x40] sm:$0xff] %vm1528_vm14, %v1489_v23 }
 0x12f   : > { %1537 = vst.msk [vmem:[#allocation2 + $0x48] sm:$0xff] %vm1528_vm14, %v1491_v26 }
 0x131   : > { %v2147_v40 = vpop.permute.xlu0 %2146  ;;  %v6720_v45 = vld [vmem:[#allocation2 + $0x30] sm:$0xff] }
 0x132   : > { %v6722_v49 = vld [vmem:[#allocation2 + $0x38] sm:$0xff]  ;;  %2194 = vst.msk [vmem:[#allocation2 + $0x40] sm:$0xff] %vm8196_vm13, %v2147_v40  ;;  %5222 = vmatprep.mubr.msk.bf16.mxu0 %vm8352_vm9, %v6720_v45  ;;  %vm8353_vm9 = vmmov %vm8349_vm7 }
 0x133   : > { %v2149_v28 = vpop.permute.xlu1 %2148  ;;  %5223 = vmatmul.mubr.msk.bf16.gmra.mrb[8].mxu0 %vm8349_vm7, %v6722_v49 }
 0x134   : > { %2195 = vst.msk [vmem:[#allocation2 + $0x48] sm:$0xff] %vm8196_vm13, %v2149_v28 }
 0x135   : > { %v1493_v41 = vpop.permute.xlu0 %1492 }
 0x136   : > { %1538 = vst.msk [vmem:[#allocation2 + $0x50] sm:$0xff] %vm1528_vm14, %v1493_v41 }
 0x137   : > { %v1495_v4 = vpop.permute.xlu1 %1494 }
 0x138   : > { %1539 = vst.msk [vmem:[#allocation2 + $0x58] sm:$0xff] %vm1528_vm14, %v1495_v4 }
 0x139   : > { %v6732_v14 = vld [vmem:[#allocation2 + $0x40] sm:$0xff] }
 0x13a   : > { %v2151_v1 = vpop.permute.xlu0 %2150  ;;  %5226 = vmatprep.mubr.msk.bf16.mxu0 %vm8353_vm9, %v6732_v14  ;;  %vm8354_vm9 = vmmov %vm8349_vm7 }
 0x13b   : > { %v2153_v30 = vpop.permute.xlu1 %2152  ;;  %v6734_v59 = vld [vmem:[#allocation2 + $0x48] sm:$0xff]  ;;  %2196 = vst.msk [vmem:[#allocation2 + $0x50] sm:$0xff] %vm8196_vm13, %v2151_v1 }
 0x13c   : > { %2197 = vst.msk [vmem:[#allocation2 + $0x58] sm:$0xff] %vm8196_vm13, %v2153_v30  ;;  %5227 = vmatmul.mubr.msk.bf16.gmra.mrb[12].mxu0 %vm8349_vm7, %v6734_v59  ;;  %v2690_v30 = vsel %vm8198_vm10, %v6696_v35, 0  ;;  %vm8373_vm10 = vmmov %vm8363_vm0 }
 0x13f   : > { %v1497_v52 = vpop.permute.xlu0 %1496 }
 0x140   : > { %1540 = vst.msk [vmem:[#allocation2 + $0x60] sm:$0xff] %vm1528_vm14, %v1497_v52 }
 0x141   : > { %v1499_v3 = vpop.permute.xlu1 %1498 }
 0x142   : > { %1541 = vst.msk [vmem:[#allocation2 + $0x68] sm:$0xff] %vm1528_vm14, %v1499_v3  ;;  %v6744_v5 = vld [vmem:[#allocation2 + $0x50] sm:$0xff] }
 0x143   : > { %v6746_v55 = vld [vmem:[#allocation2 + $0x58] sm:$0xff]  ;;  %5230 = vmatprep.mubr.msk.bf16.mxu0 %vm8354_vm9, %v6744_v5  ;;  %vm8356_vm9 = vmmov %vm8355_vm5 }
 0x144   : > { %v2155_v7 = vpop.permute.xlu0 %2154  ;;  %5231 = vmatmul.mubr.msk.bf16.gmra.mrb[16].mxu0 %vm8349_vm7, %v6746_v55  ;;  %vm8357_vm7 = vmmov %vm8355_vm5 }
 0x145   : > { %v2157_v32 = vpop.permute.xlu1 %2156  ;;  %2198 = vst.msk [vmem:[#allocation2 + $0x60] sm:$0xff] %vm8196_vm13, %v2155_v7 }
 0x146   : > { %2199 = vst.msk [vmem:[#allocation2 + $0x68] sm:$0xff] %vm8196_vm13, %v2157_v32 }
 0x14c   : > { %v1501_v33 = vpop.permute.xlu0 %1500  ;;  %v2216_v21 = vld [vmem:[#allocation2 + $0x60] sm:$0xff] }
 0x14d   : > { %v1503_v61 = vpop.permute.xlu1 %1502  ;;  %1542 = vst.msk [vmem:[#allocation2 + $0x70] sm:$0xff] %vm1528_vm14, %v1501_v33  ;;  %v2217_v11 = vld [vmem:[#allocation2 + $0x68] sm:$0xff]  ;;  %5234 = vmatprep.mubr.msk.bf16.mxu0 %vm8355_vm5, %v2216_v21  ;;  %vm8359_vm5 = vmmov %vm8358_vm4 }
 0x14e   : > { %1543 = vst.msk [vmem:[#allocation2 + $0x78] sm:$0xff] %vm1528_vm14, %v1503_v61  ;;  %5235 = vmatmul.mubr.msk.bf16.gmra.mrb[20].mxu0 %vm8356_vm9, %v2217_v11  ;;  %vm8360_vm9 = vmmov %vm8358_vm4 }
 0x150   : > { %v2159_v60 = vpop.permute.xlu0 %2158 }
 0x151   : > { %v2161_v13 = vpop.permute.xlu1 %2160  ;;  %2200 = vst.msk [vmem:[#allocation2 + $0x70] sm:$0xff] %vm8196_vm13, %v2159_v60 }
 0x152   : > { %2201 = vst.msk [vmem:[#allocation2 + $0x78] sm:$0xff] %vm8196_vm13, %v2161_v13 }
 0x154   : > { %v1505_v46 = vpop.permute.xlu0 %1504 }
 0x155   : > { %v1507_v6 = vpop.permute.xlu1 %1506  ;;  %1544 = vst.msk [vmem:[#allocation2 + $0x80] sm:$0xff] %vm1528_vm14, %v1505_v46 }
 0x156   : > { %1545 = vst.msk [vmem:[#allocation2 + $0x88] sm:$0xff] %vm1528_vm14, %v1507_v6 }
 0x158   : > { %v2163_v2 = vpop.permute.xlu0 %2162  ;;  %v2218_v22 = vld [vmem:[#allocation2 + $0x70] sm:$0xff] }
 0x159   : > { %v2165_v8 = vpop.permute.xlu1 %2164  ;;  %v2219_v0 = vld [vmem:[#allocation2 + $0x78] sm:$0xff]  ;;  %2202 = vst.msk [vmem:[#allocation2 + $0x80] sm:$0xff] %vm8196_vm13, %v2163_v2  ;;  %5238 = vmatprep.mubr.msk.bf16.mxu0 %vm8357_vm7, %v2218_v22  ;;  %vm8361_vm7 = vmmov %vm8358_vm4 }
 0x15a   : > { %2203 = vst.msk [vmem:[#allocation2 + $0x88] sm:$0xff] %vm8196_vm13, %v2165_v8  ;;  %5239 = vmatmul.mubr.msk.bf16.gmra.mrb[24].mxu0 %vm8358_vm4, %v2219_v0 }
 0x15c   : > { %v1475_v26 = vpop.permute.xlu0 %1474 }
 0x15d   : > { %v2133_v15 = vpop.permute.xlu1 %2132  ;;  %1529 = vst.msk [vmem:[#allocation2 + $0x8] sm:$0xff] %vm1528_vm14, %v1475_v26 }
 0x15e   : > { %2187 = vst.msk [vmem:[#allocation2 + $0x8] sm:$0xff] %vm8196_vm13, %v2133_v15 }
 0x160   : > { %v1509_v28 = vpop.permute.xlu0 %1508  ;;  %v2220_v40 = vld [vmem:[#allocation2 + $0x80] sm:$0xff] }
 0x161   : > { %v2167_v23 = vpop.permute.xlu1 %2166  ;;  %v2223_v4 = vld [vmem:[#allocation2 + $0x88] sm:$0xff]  ;;  %1546 = vst.msk [vmem:[#allocation2 + $0x90] sm:$0xff] %vm1528_vm14, %v1509_v28  ;;  %5242 = vmatprep.mubr.msk.bf16.mxu0 %vm8359_vm5, %v2220_v40  ;;  %vm8364_vm5 = vmmov %vm8363_vm0 }
 0x162   : > { %2204 = vst.msk [vmem:[#allocation2 + $0x90] sm:$0xff] %vm8196_vm13, %v2167_v23  ;;  %5243 = vmatmul.mubr.msk.bf16.gmra.mrb[28].mxu0 %vm8360_vm9, %v2223_v4  ;;  %vm8365_vm9 = vmmov %vm8363_vm0 }
 0x163   : > { %vm8367_vm13 = vmmov %vm8363_vm0 }
 0x165   : > { %v2205_v41 = vld [vmem:[#allocation2 + $0x8] sm:$0xff] }
 0x166   : > { %5248 = vmatprep.mubr.msk.bf16.mxu0 %vm8358_vm4, %v2205_v41  ;;  %vm8366_vm4 = vmmov %vm8363_vm0 }
 0x16a   : > { %5249 = vmatmul.mubr.msk.bf16.vlgmr.msra.gmra.mrb[0].mxu0 %vm8361_vm7, %v6688_v29  ;;  %vm8368_vm7 = vmmov %vm8363_vm0  ;;  %v2632_v29 = vld [vmem:[#allocation2 + $0x90] sm:$0xff] }
 0x16b   : > { %5281 = vmatpush3.bf16.msra.mxu0 %v2690_v30  ;;  %5252 = vmatprep.mubr.msk.bf16.mxu0 %vm8362_vm6, %v6690_v10  ;;  %vm8369_vm6 = vmmov %vm8363_vm0 }
 0x172   : > { %5253 = vmatmul.mubr.msk.bf16.gmra.mrb[4].mxu0 %vm8363_vm0, %v6708_v31 }
 0x173   : > { %5256 = vmatprep.mubr.msk.bf16.mxu0 %vm8364_vm5, %v6710_v48  ;;  %vm8371_vm5 = vmmov %vm8363_vm0 }
 0x17a   : > { %5257 = vmatmul.mubr.msk.bf16.gmra.mrb[8].mxu0 %vm8365_vm9, %v6720_v45  ;;  %vm8372_vm9 = vmmov %vm8363_vm0 }
 0x17b   : > { %5260 = vmatprep.mubr.msk.bf16.mxu0 %vm8366_vm4, %v6722_v49  ;;  %vm8374_vm4 = vmmov %vm8363_vm0 }
 0x182   : > { %5261 = vmatmul.mubr.msk.bf16.gmra.mrb[12].mxu0 %vm8367_vm13, %v6732_v14  ;;  %vm8375_vm13 = vmmov %vm8363_vm0 }
 0x183   : > { %5264 = vmatprep.mubr.msk.bf16.mxu0 %vm8368_vm7, %v6734_v59  ;;  %vm8376_vm7 = vmmov %vm8363_vm0 }
 0x18a   : > { %5265 = vmatmul.mubr.msk.bf16.gmra.mrb[16].mxu0 %vm8369_vm6, %v6744_v5  ;;  %vm8377_vm6 = vmmov %vm8363_vm0 }
 0x18b   : > { %5268 = vmatprep.mubr.msk.bf16.mxu0 %vm8363_vm0, %v6746_v55 }
 0x192   : > { %5269 = vmatmul.mubr.msk.bf16.gmra.mrb[20].mxu0 %vm8370_vm3, %v2216_v21  ;;  %vm8378_vm3 = vmmov %vm8363_vm0 }
 0x193   : > { %5272 = vmatprep.mubr.msk.bf16.mxu0 %vm8371_vm5, %v2217_v11  ;;  %vm8379_vm5 = vmmov %vm8363_vm0 }
 0x19a   : > { %5273 = vmatmul.mubr.msk.bf16.gmra.mrb[24].mxu0 %vm8372_vm9, %v2218_v22  ;;  %vm8381_vm9 = vmmov %vm8363_vm0 }
 0x19b   : > { %5276 = vmatprep.mubr.msk.bf16.mxu0 %vm8373_vm10, %v2219_v0  ;;  %vm8380_vm10 = vmmov %vm8363_vm0 }
 0x1a2   : > { %5277 = vmatmul.mubr.msk.bf16.gmra.mrb[28].mxu0 %vm8374_vm4, %v2220_v40  ;;  %vm8382_vm4 = vmmov %vm8363_vm0 }
 0x1a3   : > { %5282 = vmatprep.mubr.msk.bf16.mxu0 %vm8375_vm13, %v6690_v10  ;;  %vm8383_vm13 = vmmov %vm8363_vm0 }
 0x1aa   : > { %5283 = vmatmul.mubr.msk.bf16.vlgmr.msra.gmra.mrb[0].mxu0 %vm8376_vm7, %v6708_v31  ;;  %vm8384_vm7 = vmmov %vm8363_vm0 }
 0x1ab   : > { %5286 = vmatprep.mubr.msk.bf16.mxu0 %vm8377_vm6, %v6710_v48  ;;  %vm8385_vm6 = vmmov %vm8363_vm0 }
 0x1b2   : > { %5287 = vmatmul.mubr.msk.bf16.gmra.mrb[4].mxu0 %vm8363_vm0, %v6720_v45 }
 0x1b3   : > { %5290 = vmatprep.mubr.msk.bf16.mxu0 %vm8378_vm3, %v6722_v49  ;;  %vm8386_vm3 = vmmov %vm8363_vm0 }
 0x1ba   : > { %5291 = vmatmul.mubr.msk.bf16.gmra.mrb[8].mxu0 %vm8379_vm5, %v6732_v14  ;;  %vm8387_vm5 = vmmov %vm8363_vm0 }
 0x1bb   : > { %5294 = vmatprep.mubr.msk.bf16.mxu0 %vm8380_vm10, %v6734_v59  ;;  %vm8388_vm10 = vmmov %vm8363_vm0 }
 0x1c2   : > { %5295 = vmatmul.mubr.msk.bf16.gmra.mrb[12].mxu0 %vm8381_vm9, %v6744_v5 }
 0x1c3   : > { %5298 = vmatprep.mubr.msk.bf16.mxu0 %vm8382_vm4, %v6746_v55  ;;  %vm8397_vm4 = vcmask 1045504  }
 0x1ca   : > { %5299 = vmatmul.mubr.msk.bf16.gmra.mrb[16].mxu0 %vm8383_vm13, %v2216_v21  ;;  %vm8398_vm13 = vsmask.f32 7424 }
 0x1cb   : > { %5302 = vmatprep.mubr.msk.bf16.mxu0 %vm8384_vm7, %v2217_v11  ;;  %vm8399_vm7 = vmmov %vm8398_vm13 }
 0x1d2   : > { %5303 = vmatmul.mubr.msk.bf16.gmra.mrb[20].mxu0 %vm8385_vm6, %v2218_v22 }
 0x1d3   : > { %5306 = vmatprep.mubr.msk.bf16.mxu0 %vm8363_vm0, %v2219_v0  ;;  %vm8402_vm0 = vsmask.f32 256 }
 0x1da   : > { %5307 = vmatmul.mubr.msk.bf16.gmra.mrb[24].mxu0 %vm8386_vm3, %v2220_v40 }
 0x1db   : > { %5310 = vmatprep.mubr.msk.bf16.mxu0 %vm8387_vm5, %v2223_v4  ;;  %vm8405_vm5 = vmmov %vm8402_vm0 }
 0x1e2   : > { %5311 = vmatmul.mubr.msk.bf16.gmra.mrb[28].mxu0 %vm8388_vm10, %v2632_v29 }
 0x27d   : > { %v6825_v10 = vpop.f32.mrb[0].mxu0 }
 0x27e   : > { %v6827_v35 = vpop.f32.mrb[1].mxu0  ;;  %v2888_v14 = vsel %vm1528_vm14, %v6825_v10, 0.0 }
 0x27f   : > { %v6829_v31 = vpop.f32.mrb[2].mxu0  ;;  %v2885_v45 = vsel %vm1528_vm14, %v6827_v35, 0.0 }
 0x280   : > { %v6831_v48 = vpop.f32.mrb[3].mxu0  ;;  %v2890_v3 = vsel %vm1528_vm14, %v6829_v31, 0.0 }
 0x281   : > { %v2886_v49 = vsel %vm1528_vm14, %v6831_v48, 0.0 }
 0x282   : > { %v2887_v1 = vadd.f32 %v2886_v49, %v2885_v45 }
 0x284   : > { %v2889_v59 = vadd.f32 %v2888_v14, %v2887_v1 }
 0x285   : > { %v6841_v52 = vpop.f32.mrb[4].mxu0 }
 0x286   : > { %v6843_v32 = vpop.f32.mrb[5].mxu0  ;;  %v2891_v7 = vadd.f32 %v2890_v3, %v2889_v59  ;;  %v2896_v21 = vsel %vm1528_vm14, %v6841_v52, 0.0 }
 0x287   : > { %v2892_v5 = vsel %vm1528_vm14, %v6843_v32, 0.0  ;;  %v6847_v55 = vpop.f32.mrb[6].mxu0 }
 0x288   : > { %v2893_v61 = vadd.f32 %v2892_v5, %v2891_v7  ;;  %v6849_v33 = vpop.f32.mrb[7].mxu0  ;;  %v2898_v6 = vsel %vm1528_vm14, %v6847_v55, 0.0 }
 0x289   : > { %v2894_v13 = vsel %vm1528_vm14, %v6849_v33, 0.0 }
 0x28a   : > { %v2895_v60 = vadd.f32 %v2894_v13, %v2893_v61 }
 0x28c   : > { %v2897_v11 = vadd.f32 %v2896_v21, %v2895_v60 }
 0x28d   : > { %v6857_v46 = vpop.f32.mrb[8].mxu0 }
 0x28e   : > { %v6859_v8 = vpop.f32.mrb[9].mxu0  ;;  %v2899_v2 = vadd.f32 %v2898_v6, %v2897_v11  ;;  %v2904_v40 = vsel %vm1528_vm14, %v6857_v46, 0.0 }
 0x28f   : > { %v2900_v22 = vsel %vm1528_vm14, %v6859_v8, 0.0  ;;  %v6863_v0 = vpop.f32.mrb[10].mxu0 }
 0x290   : > { %v2901_v15 = vadd.f32 %v2900_v22, %v2899_v2  ;;  %v6865_v26 = vpop.f32.mrb[11].mxu0  ;;  %v2906_v41 = vsel %vm1528_vm14, %v6863_v0, 0.0 }
 0x291   : > { %v2902_v23 = vsel %vm1528_vm14, %v6865_v26, 0.0 }
 0x292   : > { %v2903_v28 = vadd.f32 %v2902_v23, %v2901_v15 }
 0x294   : > { %v2905_v4 = vadd.f32 %v2904_v40, %v2903_v28 }
 0x295   : > { %v6873_v30 = vpop.f32.mrb[12].mxu0 }
 0x296   : > { %v6875_v29 = vpop.f32.mrb[13].mxu0  ;;  %v2907_v45 = vadd.f32 %v2906_v41, %v2905_v4  ;;  %v2912_v5 = vsel %vm1528_vm14, %v6873_v30, 0.0 }
 0x297   : > { %v2908_v49 = vsel %vm1528_vm14, %v6875_v29, 0.0  ;;  %v6879_v1 = vpop.f32.mrb[14].mxu0 }
 0x298   : > { %v2909_v14 = vadd.f32 %v2908_v49, %v2907_v45  ;;  %v6881_v59 = vpop.f32.mrb[15].mxu0  ;;  %v2914_v13 = vsel %vm1528_vm14, %v6879_v1, 0.0 }
 0x299   : > { %v2910_v3 = vsel %vm1528_vm14, %v6881_v59, 0.0 }
 0x29a   : > { %v2911_v7 = vadd.f32 %v2910_v3, %v2909_v14 }
 0x29c   : > { %v2913_v61 = vadd.f32 %v2912_v5, %v2911_v7 }
 0x29d   : > { %v6889_v60 = vpop.f32.mrb[16].mxu0 }
 0x29e   : > { %v6891_v21 = vpop.f32.mrb[17].mxu0  ;;  %v2915_v11 = vadd.f32 %v2914_v13, %v2913_v61  ;;  %v2920_v40 = vsel %vm1528_vm14, %v6889_v60, 0.0 }
 0x29f   : > { %v2916_v6 = vsel %vm1528_vm14, %v6891_v21, 0.0  ;;  %v6895_v2 = vpop.f32.mrb[18].mxu0 }
 0x2a0   : > { %v2917_v22 = vadd.f32 %v2916_v6, %v2915_v11  ;;  %v6897_v15 = vpop.f32.mrb[19].mxu0  ;;  %v2922_v41 = vsel %vm1528_vm14, %v6895_v2, 0.0 }
 0x2a1   : > { %v2918_v23 = vsel %vm1528_vm14, %v6897_v15, 0.0 }
 0x2a2   : > { %v2919_v28 = vadd.f32 %v2918_v23, %v2917_v22 }
 0x2a4   : > { %v2921_v4 = vadd.f32 %v2920_v40, %v2919_v28 }
 0x2a5   : > { %v6905_v45 = vpop.f32.mrb[20].mxu0 }
 0x2a6   : > { %v6907_v49 = vpop.f32.mrb[21].mxu0  ;;  %v2923_v14 = vadd.f32 %v2922_v41, %v2921_v4  ;;  %v2928_v6 = vsel %vm1528_vm14, %v6905_v45, 0.0 }
 0x2a7   : > { %v2924_v3 = vsel %vm1528_vm14, %v6907_v49, 0.0  ;;  %v6911_v7 = vpop.f32.mrb[22].mxu0 }
 0x2a8   : > { %v2925_v5 = vadd.f32 %v2924_v3, %v2923_v14  ;;  %v2809_v61 = vpop.f32.mrb[23].mxu0  ;;  %v2930_v23 = vsel %vm1528_vm14, %v6911_v7, 0.0 }
 0x2a9   : > { %v2926_v13 = vsel %vm1528_vm14, %v2809_v61, 0.0 }
 0x2aa   : > { %v2927_v11 = vadd.f32 %v2926_v13, %v2925_v5 }
 0x2ac   : > { %v2929_v22 = vadd.f32 %v2928_v6, %v2927_v11 }
 0x2ad   : > { %v5308_v28 = vpop.f32.mrb[24].mxu0 }
 0x2ae   : > { %v2822_v40 = vpop.f32.mrb[25].mxu0  ;;  %v2931_v4 = vadd.f32 %v2930_v23, %v2929_v22  ;;  %v2936_v5 = vsel %vm1528_vm14, %v5308_v28, 0.0 }
 0x2af   : > { %v2932_v41 = vsel %vm1528_vm14, %v2822_v40, 0.0  ;;  %v5309_v38 = vpop.f32.mrb[26].mxu0 }
 0x2b0   : > { %v2933_v62 = vadd.f32 %v2932_v41, %v2931_v4  ;;  %v2825_v53 = vpop.f32.mrb[27].mxu0  ;;  %v2938_v16 = vsel %vm1528_vm14, %v5309_v38, 0.0 }
 0x2b1   : > { %v2934_v14 = vsel %vm1528_vm14, %v2825_v53, 0.0 }
 0x2b2   : > { %v2935_v3 = vadd.f32 %v2934_v14, %v2933_v62 }
 0x2b4   : > { %v2937_v13 = vadd.f32 %v2936_v5, %v2935_v3 }
 0x2b5   : > { %v5312_v11 = vpop.f32.mrb[28].mxu0 }
 0x2b6   : > { %v2838_v6 = vpop.f32.mrb[29].mxu0  ;;  %v2939_v24 = vadd.f32 %v2938_v16, %v2937_v13  ;;  %v2944_v41 = vsel %vm1528_vm14, %v5312_v11, 0.0 }
 0x2b7   : > { %v2940_v27 = vsel %vm1528_vm14, %v2838_v6, 0.0  ;;  %v5313_v34 = vpop.f32.mrb[30].mxu0 }
 0x2b8   : > { %v2941_v22 = vadd.f32 %v2940_v27, %v2939_v24  ;;  %v2841_v23 = vpop.f32.mrb[31].mxu0  ;;  %v2946_v62 = vsel %vm1528_vm14, %v5313_v34, 0.0 }
 0x2b9   : > { %v2942_v39 = vsel %vm1528_vm14, %v2841_v23, 0.0 }
 0x2ba   : > { %v2943_v4 = vadd.f32 %v2942_v39, %v2941_v22 }
 0x2bc   : > { %v2945_v54 = vadd.f32 %v2944_v41, %v2943_v4 }
 0x2be   : > { %v2947_v14 = vadd.f32 %v2946_v62, %v2945_v54 }
 0x2c0   : > { %v2948_v3 = vrot.slane %v2947_v14, 4 }
 0x2c2   : > { %v2949_v5 = vadd.f32 %v2948_v3, %v2947_v14 }
 0x2c4   : > { %v2950_v9 = vrot.slane %v2949_v5, 2 }
 0x2c6   : > { %v2951_v58 = vadd.f32 %v2950_v9, %v2949_v5 }
 0x2c8   : > { %v2952_v47 = vrot.slane %v2951_v58, 1 }
 0x2ca   : > { %v2953_v16 = vadd.f32 %v2952_v47, %v2951_v58 }
 0x2cc   : > { %v2954_v13 = vmul.f32 0.00390625, %v2953_v16 }
 0x2ce   : > { %v6927_v37 = vsub.f32 %v6827_v35, %v2954_v13  ;;  %v6930_v27 = vsub.f32 %v6831_v48, %v2954_v13  ;;  %v6933_v39 = vsub.f32 %v6825_v10, %v2954_v13  ;;  %v6936_v24 = vsub.f32 %v6829_v31, %v2954_v13 }
 0x2cf   : > { %v6939_v54 = vsub.f32 %v6843_v32, %v2954_v13  ;;  %v6942_v9 = vsub.f32 %v6849_v33, %v2954_v13  ;;  %v6945_v47 = vsub.f32 %v6841_v52, %v2954_v13  ;;  %v6948_v58 = vsub.f32 %v6847_v55, %v2954_v13 }
 0x2d0   : > { %v6951_v35 = vsub.f32 %v6859_v8, %v2954_v13  ;;  %v6954_v10 = vsub.f32 %v6865_v26, %v2954_v13  ;;  %v6957_v31 = vsub.f32 %v6857_v46, %v2954_v13  ;;  %v6960_v48 = vsub.f32 %v6863_v0, %v2954_v13 }
 0x2d1   : > { %v6963_v32 = vsub.f32 %v6875_v29, %v2954_v13  ;;  %v6966_v52 = vsub.f32 %v6881_v59, %v2954_v13  ;;  %v6969_v55 = vsub.f32 %v6873_v30, %v2954_v13  ;;  %v6972_v33 = vsub.f32 %v6879_v1, %v2954_v13 }
 0x2d2   : > { %v6975_v8 = vsub.f32 %v6891_v21, %v2954_v13  ;;  %v6978_v46 = vsub.f32 %v6897_v15, %v2954_v13  ;;  %v6981_v0 = vsub.f32 %v6889_v60, %v2954_v13  ;;  %v6984_v26 = vsub.f32 %v6895_v2, %v2954_v13 }
 0x2d3   : > { %v6987_v29 = vsub.f32 %v6907_v49, %v2954_v13  ;;  %v6989_v30 = vsub.f32 %v2809_v61, %v2954_v13  ;;  %v6992_v1 = vsub.f32 %v6905_v45, %v2954_v13  ;;  %v6995_v59 = vsub.f32 %v6911_v7, %v2954_v13 }
 0x2d4   : > { %v6997_v21 = vsub.f32 %v2822_v40, %v2954_v13  ;;  %v6999_v15 = vsub.f32 %v2825_v53, %v2954_v13  ;;  %v7001_v60 = vsub.f32 %v5308_v28, %v2954_v13  ;;  %v7003_v22 = vsub.f32 %v5309_v38, %v2954_v13 }
 0x2d5   : > { %v7005_v2 = vsub.f32 %v2838_v6, %v2954_v13  ;;  %v7007_v49 = vsub.f32 %v2841_v23, %v2954_v13  ;;  %v7009_v61 = vsub.f32 %v5312_v11, %v2954_v13  ;;  %v7011_v4 = vsub.f32 %v5313_v34, %v2954_v13 }
 0x2d6   : > { %v2987_v45 = vmul.f32 %v6927_v37, %v6927_v37  ;;  %v2988_v7 = vmul.f32 %v6930_v27, %v6930_v27  ;;  %v2989_v53 = vmul.f32 %v6933_v39, %v6933_v39  ;;  %v2990_v38 = vmul.f32 %v6936_v24, %v6936_v24 }
 0x2d7   : > { %v2991_v34 = vmul.f32 %v6939_v54, %v6939_v54  ;;  %v2992_v41 = vmul.f32 %v6942_v9, %v6942_v9  ;;  %v2993_v3 = vmul.f32 %v6945_v47, %v6945_v47  ;;  %v2994_v13 = vmul.f32 %v6948_v58, %v6948_v58 }
 0x2d8   : > { %v3019_v28 = vsel %vm1528_vm14, %v2987_v45, 0.0  ;;  %v3020_v40 = vsel %vm1528_vm14, %v2988_v7, 0.0  ;;  %v3022_v6 = vsel %vm1528_vm14, %v2989_v53, 0.0  ;;  %v3024_v62 = vsel %vm1528_vm14, %v2990_v38, 0.0 }
 0x2d9   : > { %v3021_v11 = vadd.f32 %v3020_v40, %v3019_v28  ;;  %v3026_v5 = vsel %vm1528_vm14, %v2991_v34, 0.0  ;;  %v3028_v45 = vsel %vm1528_vm14, %v2992_v41, 0.0  ;;  %v2995_v53 = vmul.f32 %v6951_v35, %v6951_v35 }
 0x2da   : > { %v3030_v28 = vsel %vm1528_vm14, %v2993_v3, 0.0  ;;  %v2996_v38 = vmul.f32 %v6954_v10, %v6954_v10  ;;  %v2997_v34 = vmul.f32 %v6957_v31, %v6957_v31  ;;  %v2998_v41 = vmul.f32 %v6960_v48, %v6960_v48 }
 0x2db   : > { %v3023_v23 = vadd.f32 %v3022_v6, %v3021_v11  ;;  %v3032_v11 = vsel %vm1528_vm14, %v2994_v13, 0.0  ;;  %v2999_v3 = vmul.f32 %v6963_v32, %v6963_v32  ;;  %v3000_v13 = vmul.f32 %v6966_v52, %v6966_v52 }
 0x2dd   : > { %v3025_v14 = vadd.f32 %v3024_v62, %v3023_v23  ;;  %v3034_v23 = vsel %vm1528_vm14, %v2995_v53, 0.0  ;;  %v3001_v53 = vmul.f32 %v6969_v55, %v6969_v55 }
 0x2df   : > { %v3027_v16 = vadd.f32 %v3026_v5, %v3025_v14  ;;  %v3036_v14 = vsel %vm1528_vm14, %v2996_v38, 0.0  ;;  %v3002_v38 = vmul.f32 %v6972_v33, %v6972_v33 }
 0x2e1   : > { %v3029_v7 = vadd.f32 %v3028_v45, %v3027_v16  ;;  %v3038_v16 = vsel %vm1528_vm14, %v2997_v34, 0.0  ;;  %v3003_v34 = vmul.f32 %v6975_v8, %v6975_v8 }
 0x2e3   : > { %v3031_v40 = vadd.f32 %v3030_v28, %v3029_v7  ;;  %v3040_v7 = vsel %vm1528_vm14, %v2998_v41, 0.0  ;;  %v3004_v41 = vmul.f32 %v6978_v46, %v6978_v46 }
 0x2e5   : > { %v3033_v6 = vadd.f32 %v3032_v11, %v3031_v40  ;;  %v3042_v40 = vsel %vm1528_vm14, %v2999_v3, 0.0  ;;  %v3005_v3 = vmul.f32 %v6981_v0, %v6981_v0 }
 0x2e7   : > { %v3035_v62 = vadd.f32 %v3034_v23, %v3033_v6  ;;  %v3044_v6 = vsel %vm1528_vm14, %v3000_v13, 0.0  ;;  %v3006_v13 = vmul.f32 %v6984_v26, %v6984_v26 }
 0x2e9   : > { %v3037_v5 = vadd.f32 %v3036_v14, %v3035_v62  ;;  %v3046_v62 = vsel %vm1528_vm14, %v3001_v53, 0.0  ;;  %v3007_v53 = vmul.f32 %v6987_v29, %v6987_v29 }
 0x2eb   : > { %v3039_v45 = vadd.f32 %v3038_v16, %v3037_v5  ;;  %v3048_v5 = vsel %vm1528_vm14, %v3002_v38, 0.0  ;;  %v3008_v38 = vmul.f32 %v6989_v30, %v6989_v30 }
 0x2ed   : > { %v3041_v28 = vadd.f32 %v3040_v7, %v3039_v45  ;;  %v3050_v45 = vsel %vm1528_vm14, %v3003_v34, 0.0  ;;  %v3009_v34 = vmul.f32 %v6992_v1, %v6992_v1 }
 0x2ef   : > { %v3043_v11 = vadd.f32 %v3042_v40, %v3041_v28  ;;  %v3052_v28 = vsel %vm1528_vm14, %v3004_v41, 0.0  ;;  %v3010_v41 = vmul.f32 %v6995_v59, %v6995_v59 }
 0x2f1   : > { %v3045_v23 = vadd.f32 %v3044_v6, %v3043_v11  ;;  %v3054_v11 = vsel %vm1528_vm14, %v3005_v3, 0.0  ;;  %v3011_v3 = vmul.f32 %v6997_v21, %v6997_v21 }
 0x2f3   : > { %v3047_v14 = vadd.f32 %v3046_v62, %v3045_v23  ;;  %v3056_v23 = vsel %vm1528_vm14, %v3006_v13, 0.0  ;;  %v3012_v13 = vmul.f32 %v6999_v15, %v6999_v15 }
 0x2f5   : > { %v3049_v16 = vadd.f32 %v3048_v5, %v3047_v14  ;;  %v3058_v14 = vsel %vm1528_vm14, %v3007_v53, 0.0  ;;  %v3013_v53 = vmul.f32 %v7001_v60, %v7001_v60 }
 0x2f7   : > { %v3051_v7 = vadd.f32 %v3050_v45, %v3049_v16  ;;  %v3060_v16 = vsel %vm1528_vm14, %v3008_v38, 0.0  ;;  %v3014_v38 = vmul.f32 %v7003_v22, %v7003_v22 }
 0x2f9   : > { %v3053_v40 = vadd.f32 %v3052_v28, %v3051_v7  ;;  %v3062_v7 = vsel %vm1528_vm14, %v3009_v34, 0.0  ;;  %v3015_v34 = vmul.f32 %v7005_v2, %v7005_v2 }
 0x2fb   : > { %v3055_v6 = vadd.f32 %v3054_v11, %v3053_v40  ;;  %v3064_v40 = vsel %vm1528_vm14, %v3010_v41, 0.0  ;;  %v3016_v41 = vmul.f32 %v7007_v49, %v7007_v49 }
 0x2fd   : > { %v3057_v62 = vadd.f32 %v3056_v23, %v3055_v6  ;;  %v3066_v6 = vsel %vm1528_vm14, %v3011_v3, 0.0  ;;  %v3017_v3 = vmul.f32 %v7009_v61, %v7009_v61 }
 0x2ff   : > { %v3059_v5 = vadd.f32 %v3058_v14, %v3057_v62  ;;  %v3068_v62 = vsel %vm1528_vm14, %v3012_v13, 0.0  ;;  %v3018_v13 = vmul.f32 %v7011_v4, %v7011_v4 }
 0x301   : > { %v3061_v45 = vadd.f32 %v3060_v16, %v3059_v5  ;;  %v3070_v5 = vsel %vm1528_vm14, %v3013_v53, 0.0  ;;  %v3078_v53 = vsel %vm1528_vm14, %v3017_v3, 0.0 }
 0x303   : > { %v3063_v28 = vadd.f32 %v3062_v7, %v3061_v45  ;;  %v3072_v45 = vsel %vm1528_vm14, %v3014_v38, 0.0 }
 0x305   : > { %v3065_v11 = vadd.f32 %v3064_v40, %v3063_v28  ;;  %v3074_v28 = vsel %vm1528_vm14, %v3015_v34, 0.0 }
 0x307   : > { %v3067_v23 = vadd.f32 %v3066_v6, %v3065_v11  ;;  %v3076_v11 = vsel %vm1528_vm14, %v3016_v41, 0.0 }
 0x309   : > { %v3069_v14 = vadd.f32 %v3068_v62, %v3067_v23  ;;  %v3080_v62 = vsel %vm1528_vm14, %v3018_v13, 0.0 }
 0x30b   : > { %v3071_v16 = vadd.f32 %v3070_v5, %v3069_v14 }
 0x30d   : > { %v3073_v7 = vadd.f32 %v3072_v45, %v3071_v16 }
 0x30f   : > { %v3075_v40 = vadd.f32 %v3074_v28, %v3073_v7 }
 0x311   : > { %v3077_v6 = vadd.f32 %v3076_v11, %v3075_v40 }
 0x313   : > { %v3079_v23 = vadd.f32 %v3078_v53, %v3077_v6 }
 0x315   : > { %v3081_v14 = vadd.f32 %v3080_v62, %v3079_v23 }
 0x317   : > { %v3082_v38 = vrot.slane %v3081_v14, 4 }
 0x319   : > { %v3083_v5 = vadd.f32 %v3082_v38, %v3081_v14 }
 0x31b   : > { %v3084_v16 = vrot.slane %v3083_v5, 2 }
 0x31d   : > { %v3085_v45 = vadd.f32 %v3084_v16, %v3083_v5 }
 0x31f   : > { %v3086_v43 = vrot.slane %v3085_v45, 1 }
 0x321   : > { %v3087_v51 = vadd.f32 %v3086_v43, %v3085_v45 }
 0x323   : > { %v3088_v34 = vmul.f32 0.00390625, %v3087_v51 }
 0x325   : > { %v3089_v7 = vadd.f32 1e-05, %v3088_v34 }
 0x327   : > { %5568 = vrsqrt.f32 %v3089_v7 }
 0x331   : > { %v7109_v28 = vpop.eup %5568 }
 0x332   : > { %v3093_v41 = vmul.f32 %v7109_v28, %v6933_v39  ;;  %v3094_v3 = vmul.f32 %v7109_v28, %v6936_v24  ;;  %v3091_v40 = vmul.f32 %v7109_v28, %v6927_v37  ;;  %v3092_v13 = vmul.f32 %v7109_v28, %v6930_v27 }
 0x333   : > { %v3095_v43 = vmul.f32 %v7109_v28, %v6939_v54  ;;  %v3096_v51 = vmul.f32 %v7109_v28, %v6942_v9  ;;  %v3097_v39 = vmul.f32 %v7109_v28, %v6945_v47  ;;  %v3098_v24 = vmul.f32 %v7109_v28, %v6948_v58 }
 0x334   : > { %v3125_v11 = vmax.f32 %v3093_v41, 0.0  ;;  %v3126_v6 = vmax.f32 %v3094_v3, 0.0  ;;  %v3099_v37 = vmul.f32 %v7109_v28, %v6951_v35  ;;  %v3100_v27 = vmul.f32 %v7109_v28, %v6954_v10 }
 0x335   : > { %v3123_v54 = vmax.f32 %v3091_v40, 0.0  ;;  %v3124_v23 = vmax.f32 %v3092_v13, 0.0  ;;  %v3127_v9 = vmax.f32 %v3095_v43, 0.0  ;;  %v3128_v62 = vmax.f32 %v3096_v51, 0.0 }
 0x336   : > { %v3156_v53 = vpack.c.bf16 %v3126_v6, %v3125_v11  ;;  %v3101_v14 = vmul.f32 %v7109_v28, %v6957_v31  ;;  %v3102_v47 = vmul.f32 %v7109_v28, %v6960_v48  ;;  %v3103_v58 = vmul.f32 %v7109_v28, %v6963_v32 }
 0x337   : > { %v3104_v35 = vmul.f32 %v7109_v28, %v6966_v52  ;;  %v3129_v38 = vmax.f32 %v3097_v39, 0.0  ;;  %v3130_v10 = vmax.f32 %v3098_v24, 0.0  ;;  %v3131_v5 = vmax.f32 %v3099_v37, 0.0 }
 0x338   : > { %3172 = vrot.lane.b32.xlu0 %v3156_v53, %s5580_s18  ;;  %v3132_v16 = vmax.f32 %v3100_v27, 0.0  ;;  %v3155_v45 = vpack.c.bf16 %v3124_v23, %v3123_v54  ;;  %v3157_v34 = vpack.c.bf16 %v3128_v62, %v3127_v9  ;;  %v3105_v7 = vmul.f32 %v7109_v28, %v6969_v55 }
 0x339   : > { %v3106_v31 = vmul.f32 %v7109_v28, %v6972_v33  ;;  %v3107_v48 = vmul.f32 %v7109_v28, %v6975_v8  ;;  %v3108_v32 = vmul.f32 %v7109_v28, %v6978_v46  ;;  %v3133_v52 = vmax.f32 %v3101_v14, 0.0 }
 0x33a   : > { %3191 = vrot.lane.b32.xlu1 %v3155_v45, %s5580_s18  ;;  %v3134_v41 = vmax.f32 %v3102_v47, 0.0  ;;  %v3135_v3 = vmax.f32 %v3103_v58, 0.0  ;;  %v3136_v40 = vmax.f32 %v3104_v35, 0.0  ;;  %v3158_v13 = vpack.c.bf16 %v3130_v10, %v3129_v38 }
 0x33b   : > { %v3159_v43 = vpack.c.bf16 %v3132_v16, %v3131_v5  ;;  %v3109_v55 = vmul.f32 %v7109_v28, %v6981_v0  ;;  %v3110_v33 = vmul.f32 %v7109_v28, %v6984_v26  ;;  %v3111_v8 = vmul.f32 %v7109_v28, %v6987_v29 }
 0x33c   : > { %3193 = vrot.lane.b32.xlu0 %v3157_v34, %s5580_s18  ;;  %v3112_v46 = vmul.f32 %v7109_v28, %v6989_v30  ;;  %v3137_v51 = vmax.f32 %v3105_v7, 0.0  ;;  %v3138_v11 = vmax.f32 %v3106_v31, 0.0  ;;  %v3139_v6 = vmax.f32 %v3107_v48, 0.0 }
 0x33d   : > { %v3140_v53 = vmax.f32 %v3108_v32, 0.0  ;;  %v3160_v39 = vpack.c.bf16 %v3134_v41, %v3133_v52  ;;  %v3161_v24 = vpack.c.bf16 %v3136_v40, %v3135_v3  ;;  %v3113_v0 = vmul.f32 %v7109_v28, %v6992_v1 }
 0x33e   : > { %3195 = vrot.lane.b32.xlu1 %v3158_v13, %s5580_s18  ;;  %v3114_v26 = vmul.f32 %v7109_v28, %v6995_v59  ;;  %v3115_v29 = vmul.f32 %v7109_v28, %v6997_v21  ;;  %v3116_v30 = vmul.f32 %v7109_v28, %v6999_v15  ;;  %v3141_v37 = vmax.f32 %v3109_v55, 0.0 }
 0x33f   : > { %v3142_v27 = vmax.f32 %v3110_v33, 0.0  ;;  %v3143_v54 = vmax.f32 %v3111_v8, 0.0  ;;  %v3144_v23 = vmax.f32 %v3112_v46, 0.0  ;;  %v3162_v9 = vpack.c.bf16 %v3138_v11, %v3137_v51 }
 0x340   : > { %3197 = vrot.lane.b32.xlu0 %v3159_v43, %s5580_s18  ;;  %v3163_v62 = vpack.c.bf16 %v3140_v53, %v3139_v6  ;;  %v3120_v1 = vmul.f32 %v7109_v28, %v7007_v49  ;;  %v3117_v59 = vmul.f32 %v7109_v28, %v7001_v60  ;;  %v3118_v21 = vmul.f32 %v7109_v28, %v7003_v22 }
 0x341   : > { %v3119_v15 = vmul.f32 %v7109_v28, %v7005_v2  ;;  %v3145_v14 = vmax.f32 %v3113_v0, 0.0  ;;  %v3146_v47 = vmax.f32 %v3114_v26, 0.0  ;;  %v3147_v58 = vmax.f32 %v3115_v29, 0.0 }
 0x342   : > { %3199 = vrot.lane.b32.xlu1 %v3160_v39, %s5580_s18  ;;  %v3148_v35 = vmax.f32 %v3116_v30, 0.0  ;;  %v3164_v38 = vpack.c.bf16 %v3142_v27, %v3141_v37  ;;  %v3165_v10 = vpack.c.bf16 %v3144_v23, %v3143_v54  ;;  %v3152_v60 = vmax.f32 %v3120_v1, 0.0 }
 0x343   : > { %v3121_v49 = vmul.f32 %v7109_v28, %v7009_v61  ;;  %v3122_v22 = vmul.f32 %v7109_v28, %v7011_v4  ;;  %v3149_v5 = vmax.f32 %v3117_v59, 0.0  ;;  %v3150_v16 = vmax.f32 %v3118_v21, 0.0  ;;  %v7193_v28 = vld [vmem:[#allocation2] sm:$0x80] }
 0x344   : > { %3201 = vrot.lane.b32.xlu0 %v3161_v24, %s5580_s18  ;;  %v3151_v2 = vmax.f32 %v3119_v15, 0.0  ;;  %v3166_v45 = vpack.c.bf16 %v3146_v47, %v3145_v14  ;;  %v3167_v34 = vpack.c.bf16 %v3148_v35, %v3147_v58  ;;  %v3292_v3 = vrot.slane %v7193_v28, 7  ;;  %v8389_v15 = vld [vmem:[#allocation3_spill] sm:$0xff] }
 0x345   : > { %v3153_v7 = vmax.f32 %v3121_v49, 0.0  ;;  %v3154_v31 = vmax.f32 %v3122_v22, 0.0  ;;  %v3168_v48 = vpack.c.bf16 %v3150_v16, %v3149_v5  ;;  %v8393_v49 = vld [vmem:[#allocation4_spill] sm:$0xff] }
 0x346   : > { %3203 = vrot.lane.b32.xlu1 %v3162_v9, %s5580_s18  ;;  %v3169_v32 = vpack.c.bf16 %v3152_v60, %v3151_v2  ;;  %v8391_v60 = vld [vmem:[#allocation7_spill] sm:$0xff] }
 0x347   : > { %v3170_v61 = vpack.c.bf16 %v3154_v31, %v3153_v7  ;;  %v7250_v31 = vld [vmem:[%s8141_s2 + $0x8] sm:$0x3f]  }
 0x348   : > { %3205 = vrot.lane.b32.xlu0 %v3163_v62, %s5580_s18  ;;  %5547 = vmatprep.subr.msk.bf16.mxu1 %vm8397_vm4, %v7250_v31  ;;  %vm8412_vm4 = vmmov %vm8402_vm0 }
 0x34a   : > { %3207 = vrot.lane.b32.xlu1 %v3164_v38, %s5580_s18 }
 0x34c   : > { %3209 = vrot.lane.b32.xlu0 %v3165_v10, %s5580_s18 }
 0x34e   : > { %3211 = vrot.lane.b32.xlu1 %v3166_v45, %s5580_s18 }
 0x350   : > { %3213 = vrot.lane.b32.xlu0 %v3167_v34, %s5580_s18 }
 0x352   : > { %3215 = vrot.lane.b32.xlu1 %v3168_v48, %s5580_s18 }
 0x354   : > { %3217 = vrot.lane.b32.xlu0 %v3169_v32, %s5580_s18 }
 0x356   : > { %3219 = vrot.lane.b32.xlu1 %v3170_v61, %s5580_s18 }
 0x3aa   : > { %v3173_v4 = vpop.permute.xlu0 %3172 }
 0x3ab   : > { %3175 = vst.msk [vmem:[#allocation2 + $0x8] sm:$0xff] %vm770_vm15, %v3173_v4  ;;  %3237 = vst.msk [vmem:[#allocation2 + $0x18] sm:$0xff] %vm770_vm15, %v3173_v4 }
 0x3ac   : > { %v3192_v52 = vpop.permute.xlu1 %3191 }
 0x3ad   : > { %3236 = vst.msk [vmem:[#allocation2 + $0x10] sm:$0xff] %vm770_vm15, %v3192_v52 }
 0x3ae   : > { %v3194_v41 = vpop.permute.xlu0 %3193 }
 0x3af   : > { %3238 = vst.msk [vmem:[#allocation2 + $0x20] sm:$0xff] %vm770_vm15, %v3194_v41  ;;  %v8395_v41 = vld [vmem:[#allocation5_spill] sm:$0xff] }
 0x3b0   : > { %v3196_v43 = vpop.permute.xlu1 %3195  ;;  %vm8396_vm9 = vcmp.ne.s16.totalorder %v8395_v41, 0 }
 0x3b1   : > { %3239 = vst.msk [vmem:[#allocation2 + $0x28] sm:$0xff] %vm770_vm15, %v3196_v43 }
 0x3b2   : > { %v7198_v40 = vld [vmem:[#allocation2 + $0x8] sm:$0xff]  ;;  %v3198_v55 = vpop.permute.xlu0 %3197  ;;  %v3256_v33 = vld [vmem:[#allocation2 + $0x18] sm:$0xff] }
 0x3b3   : > { %v3293_v13 = vrot.slane %v7198_v40, 7  ;;  %3240 = vst.msk [vmem:[#allocation2 + $0x30] sm:$0xff] %vm770_vm15, %v3198_v55  ;;  %v3297_v46 = vrot.slane %v3256_v33, 7  ;;  %v3588_v51 = vrot.slane %v7198_v40, 1  ;;  %v3591_v0 = vrot.slane %v3256_v33, 1 }
 0x3b4   : > { %v3200_v6 = vpop.permute.xlu1 %3199  ;;  %v3255_v39 = vld [vmem:[#allocation2 + $0x10] sm:$0xff] }
 0x3b5   : > { %v3294_v8 = vsel %vm1249_vm1, %v3292_v3, %v3293_v13  ;;  %3241 = vst.msk [vmem:[#allocation2 + $0x38] sm:$0xff] %vm770_vm15, %v3200_v6  ;;  %v3295_v26 = vrot.slane %v3255_v39, 7  ;;  %v3589_v30 = vrot.slane %v3255_v39, 1 }
 0x3b6   : > { %v7208_v11 = vsel %vm1211_vm11, %v7198_v40, %v3294_v8  ;;  %v3202_v53 = vpop.permute.xlu0 %3201  ;;  %v7210_v24 = vld [vmem:[#allocation2 + $0x20] sm:$0xff]  ;;  %vm8390_vm11 = vcmp.ne.s16.totalorder %v8389_v15, 0  ;;  %v8400_v15 = vld [vmem:[#allocation9_spill] sm:$0xff] }
 0x3b7   : > { %3242 = vst.msk [vmem:[#allocation2 + $0x40] sm:$0xff] %vm770_vm15, %v3202_v53  ;;  %v3299_v29 = vrot.slane %v7210_v24, 7  ;;  %v3593_v37 = vrot.slane %v7210_v24, 1  ;;  %v3368_v44 = vshrl.u32 %v7208_v11, 16  ;;  %v3296_v27 = vsel %vm1249_vm1, %v3293_v13, %v3295_v26 }
 0x3b8   : > { %v3298_v54 = vsel %vm1249_vm1, %v3295_v26, %v3297_v46  ;;  %v3590_v9 = vsel %vm1908_vm2, %v3588_v51, %v3589_v30  ;;  %v3204_v62 = vpop.permute.xlu1 %3203  ;;  %v3349_v59 = vsel %vm1212_vm8, %v3255_v39, %v3296_v27  ;;  %v3592_v47 = vsel %vm1908_vm2, %v3589_v30, %v3591_v0  ;;  %v3258_v16 = vld [vmem:[#allocation2 + $0x28] sm:$0xff] }
 0x3b9   : > { %v3300_v23 = vsel %vm1249_vm1, %v3297_v46, %v3299_v29  ;;  %v3350_v21 = vsel %vm1213_vm12, %v3256_v33, %v3298_v54  ;;  %3243 = vst.msk [vmem:[#allocation2 + $0x48] sm:$0xff] %vm770_vm15, %v3204_v62  ;;  %v3375_v58 = vshll.u32 %v3349_v59, 16  ;;  %v3379_v35 = vshrl.u32 %v3349_v59, 16 }
 0x3ba   : > { %v3206_v1 = vpop.permute.xlu0 %3205  ;;  %v3351_v14 = vsel %vm8390_vm11, %v7210_v24, %v3300_v23  ;;  %v3383_v38 = vshll.u32 %v3350_v21, 16  ;;  %v3370_v10 = vshll.u32 %v7208_v11, 16  ;;  %vm8392_vm8 = vcmp.ne.s16.totalorder %v8391_v60, 0  ;;  %v7254_v13 = vld [vmem:[#allocation2 + $0x30] sm:$0xff]  ;;  %v8467_v11 = vld [vmem:[#allocation27_spill] sm:$0xff] }
 0x3bb   : > { %3244 = vst.msk [vmem:[#allocation2 + $0x50] sm:$0xff] %vm770_vm15, %v3206_v1  ;;  %v3391_v19 = vshll.u32 %v3351_v14, 16  ;;  %v7237_v18 = vsel %vm8392_vm8, %v7198_v40, %v3590_v9  ;;  %vm8394_vm12 = vcmp.ne.s16.totalorder %v8393_v49, 0  ;;  %v3594_v5 = vsel %vm1908_vm2, %v3591_v0, %v3593_v37  ;;  %vm8409_vm8 = vmmov %vm8399_vm7 }
 0x3bc   : > { %v3646_v22 = vsel %vm8394_vm12, %v3255_v39, %v3592_v47  ;;  %v7244_v2 = vrot.slane %v3375_v58, 1  ;;  %v3385_v45 = vrot.slane %v3383_v38, 1  ;;  %v3387_v34 = vshrl.u32 %v3350_v21, 16  ;;  %v3208_v48 = vpop.permute.xlu1 %3207 }
 0x3bd   : > { %v3668_v7 = vshrl.u32 %v7237_v18, 16  ;;  %v3393_v61 = vrot.slane %v3391_v19, 1  ;;  %v3676_v4 = vshrl.u32 %v3646_v22, 16  ;;  %v3679_v52 = vshll.u32 %v3646_v22, 16  ;;  %3245 = vst.msk [vmem:[#allocation2 + $0x58] sm:$0xff] %vm770_vm15, %v3208_v48  ;;  %v8403_v19 = vld [vmem:[#allocation10_spill] sm:$0xff] }
 0x3be   : > { %v3210_v32 = vpop.permute.xlu0 %3209  ;;  %v3647_v3 = vsel %vm8396_vm9, %v3256_v33, %v3594_v5  ;;  %v3381_v43 = vor.u32 %v3379_v35, %v7244_v2  ;;  %v3389_v55 = vor.u32 %v3387_v34, %v3385_v45  ;;  %v3301_v39 = vrot.slane %v3258_v16, 7  ;;  %v7278_v35 = vld [vmem:[#allocation2 + $0x38] sm:$0xff]  ;;  %vm8411_vm9 = vmmov %vm8399_vm7 }
 0x3bf   : > { %3246 = vst.msk [vmem:[#allocation2 + $0x60] sm:$0xff] %vm770_vm15, %v3210_v32  ;;  %v7259_v8 = vrot.slane %v3668_v7, 7  ;;  %v3684_v46 = vshrl.u32 %v3647_v3, 16  ;;  %v3678_v6 = vrot.slane %v3676_v4, 7  ;;  %v3687_v53 = vshll.u32 %v3647_v3, 16 }
 0x3c0   : > { %v3395_v0 = vshrl.u32 %v3351_v14, 16  ;;  %v3386_v33 = vsel %vm8398_vm13, %v3381_v43, %v3385_v45  ;;  %v3394_v26 = vsel %vm8399_vm7, %v3389_v55, %v3393_v61  ;;  %v3303_v27 = vrot.slane %v7254_v13, 7  ;;  %v3212_v54 = vpop.permute.xlu1 %3211  ;;  %vm8413_vm13 = vmmov %vm8402_vm0 }
 0x3c1   : > { %v7265_v30 = vrot.slane %v3684_v46, 7  ;;  %3517 = vrot.lane.b32.xlu0 %v3386_v33, %s5583_s19  ;;  %3519 = vrot.lane.b32.xlu1 %v3394_v26, %s5583_s19  ;;  %v3681_v9 = vor.u32 %v3679_v52, %v3678_v6  ;;  %v3302_v62 = vsel %vm1249_vm1, %v3299_v29, %v3301_v39  ;;  %v3595_v59 = vrot.slane %v3258_v16, 1  ;;  %3247 = vst.msk [vmem:[#allocation2 + $0x68] sm:$0xff] %vm770_vm15, %v3212_v54  ;;  %v7301_v46 = vld [vmem:[#allocation2 + $0x40] sm:$0xff]  ;;  %v7308_v26 = vld [vmem:[#allocation2 + $0x48] sm:$0xff] }
 0x3c2   : > { %v3214_v23 = vpop.permute.xlu0 %3213  ;;  %v3397_v1 = vor.u32 %v3395_v0, %v3393_v61  ;;  %vm8401_vm6 = vcmp.ne.s16.totalorder %v8400_v15, 0  ;;  %v3304_v47 = vsel %vm1249_vm1, %v3301_v39, %v3303_v27  ;;  %v3597_v58 = vrot.slane %v7254_v13, 1  ;;  %v8406_v61 = vld [vmem:[#allocation8_spill] sm:$0xff] }
 0x3c3   : > { %3248 = vst.msk [vmem:[#allocation2 + $0x70] sm:$0xff] %vm770_vm15, %v3214_v23  ;;  %v3689_v21 = vor.u32 %v3687_v53, %v7265_v30  ;;  %v3352_v14 = vsel %vm8401_vm6, %v3258_v16, %v3302_v62  ;;  %v3682_v29 = vsel %vm8402_vm0, %v7259_v8, %v3681_v9  ;;  %vm8404_vm3 = vcmp.ne.s16.totalorder %v8403_v19, 0 }
 0x3c4   : > { %v3399_v38 = vshll.u32 %v3352_v14, 16  ;;  %v3353_v60 = vsel %vm8404_vm3, %v7254_v13, %v3304_v47  ;;  %v3403_v49 = vshrl.u32 %v3352_v14, 16  ;;  %v3596_v45 = vsel %vm1908_vm2, %v3593_v37, %v3595_v59  ;;  %v3216_v7 = vpop.permute.xlu1 %3215 }
 0x3c5   : > { %v3690_v22 = vsel %vm8405_vm5, %v3678_v6, %v3689_v21  ;;  %v3407_v5 = vshll.u32 %v3353_v60, 16  ;;  %v3598_v34 = vsel %vm1908_vm2, %v3595_v59, %v3597_v58  ;;  %3813 = vrot.lane.b32.xlu0 %v3682_v29, %s5580_s18  ;;  %vm8407_vm10 = vcmp.ne.s16.totalorder %v8406_v61, 0  ;;  %3249 = vst.msk [vmem:[#allocation2 + $0x78] sm:$0xff] %vm770_vm15, %v3216_v7  ;;  %v7334_v61 = vld [vmem:[#allocation2 + $0x50] sm:$0xff]  ;;  %vm8419_vm5 = vmmov %vm8399_vm7 }
 0x3c6   : > { %3815 = vrot.lane.b32.xlu1 %v3690_v22, %s5580_s18  ;;  %v3218_v48 = vpop.permute.xlu0 %3217  ;;  %v3401_v32 = vrot.slane %v3399_v38, 1  ;;  %v3648_v4 = vsel %vm8407_vm10, %v7210_v24, %v3596_v45  ;;  %vm8408_vm11 = vcmp.ne.s16.totalorder %v5938_v56, 0  ;;  %v3305_v41 = vrot.slane %v7278_v35, 7  ;;  %vm8420_vm10 = vmmov %vm8412_vm4 }
 0x3c7   : > { %v3649_v52 = vsel %vm8408_vm11, %v3258_v16, %v3598_v34  ;;  %3250 = vst.msk [vmem:[#allocation2 + $0x80] sm:$0xff] %vm770_vm15, %v3218_v48  ;;  %3252 = vst.msk [vmem:[#allocation2 + $0x90] sm:$0xff] %vm770_vm15, %v3218_v48  ;;  %v3409_v37 = vrot.slane %v3407_v5, 1  ;;  %v3692_v3 = vshrl.u32 %v3648_v4, 16  ;;  %v3695_v43 = vshll.u32 %v3648_v4, 16  ;;  %v8415_v34 = vld [vmem:[#allocation11_spill] sm:$0xff] }
 0x3c8   : > { %v3700_v55 = vshrl.u32 %v3649_v52, 16  ;;  %v3402_v6 = vsel %vm8409_vm8, %v3397_v1, %v3401_v32  ;;  %v3405_v24 = vor.u32 %v3403_v49, %v3401_v32  ;;  %v3703_v53 = vshll.u32 %v3649_v52, 16  ;;  %v3220_v54 = vpop.permute.xlu1 %3219  ;;  %vm8421_vm11 = vmmov %vm8419_vm5 }
 0x3c9   : > { %v3306_v56 = vsel %vm1249_vm1, %v3303_v27, %v3305_v41  ;;  %v3694_v16 = vrot.slane %v3692_v3, 7  ;;  %vm8410_vm12 = vcmp.ne.s16.totalorder %v5941_v57, 0  ;;  %v3411_v33 = vshrl.u32 %v3353_v60, 16  ;;  %3521 = vrot.lane.b32.xlu0 %v3402_v6, %s5583_s19  ;;  %3251 = vst.msk [vmem:[#allocation2 + $0x88] sm:$0xff] %vm770_vm15, %v3220_v54  ;;  %v7344_v6 = vld [vmem:[#allocation2 + $0x60] sm:$0xff] }
 0x3ca   : > { %v3702_v39 = vrot.slane %v3700_v55, 7  ;;  %v3354_v0 = vsel %vm8410_vm12, %v7278_v35, %v3306_v56  ;;  %v3410_v23 = vsel %vm8411_vm9, %v3405_v24, %v3409_v37  ;;  %v3307_v62 = vrot.slane %v7301_v46, 7  ;;  %v7342_v55 = vld [vmem:[#allocation2 + $0x58] sm:$0xff]  ;;  %vm8423_vm12 = vmmov %vm8412_vm4 }
 0x3cb   : > { %v3415_v9 = vshll.u32 %v3354_v0, 16  ;;  %v3419_v1 = vshrl.u32 %v3354_v0, 16  ;;  %3523 = vrot.lane.b32.xlu1 %v3410_v23, %s5583_s19  ;;  %v3697_v27 = vor.u32 %v3695_v43, %v3694_v16  ;;  %v3413_v57 = vor.u32 %v3411_v33, %v3409_v37 }
 0x3cc   : > { %v3705_v59 = vor.u32 %v3703_v53, %v3702_v39  ;;  %v3599_v21 = vrot.slane %v7278_v35, 1  ;;  %v3308_v14 = vsel %vm1249_vm1, %v3305_v41, %v3307_v62  ;;  %v3601_v47 = vrot.slane %v7301_v46, 1 }
 0x3cd   : > { %v3417_v15 = vrot.slane %v3415_v9, 1  ;;  %v3309_v29 = vrot.slane %v7308_v26, 7  ;;  %v3698_v38 = vsel %vm8412_vm4, %v7265_v30, %v3697_v27  ;;  %vm8414_vm15 = vcmp.ne.s16.totalorder %v5947_v50, 0 }
 0x3ce   : > { %v3706_v19 = vsel %vm8413_vm13, %v3694_v16, %v3705_v59  ;;  %v3355_v60 = vsel %vm8414_vm15, %v7301_v46, %v3308_v14  ;;  %v3600_v49 = vsel %vm1908_vm2, %v3597_v58, %v3599_v21  ;;  %3817 = vrot.lane.b32.xlu0 %v3698_v38, %s5580_s18  ;;  %vm8416_vm6 = vcmp.ne.s16.totalorder %v8415_v34, 0  ;;  %vm8428_vm15 = vmmov %vm8419_vm5 }
 0x3cf   : > { %v3418_v22 = vsel %vm8399_vm7, %v3413_v57, %v3417_v15  ;;  %v3421_v5 = vor.u32 %v3419_v1, %v3417_v15  ;;  %v3423_v45 = vshll.u32 %v3355_v60, 16  ;;  %v3650_v7 = vsel %vm8416_vm6, %v7254_v13, %v3600_v49  ;;  %3819 = vrot.lane.b32.xlu1 %v3706_v19, %s5580_s18  ;;  %vm8430_vm6 = vmmov %vm8420_vm10 }
 0x3d0   : > { %v3708_v30 = vshrl.u32 %v3650_v7, 16  ;;  %v3711_v48 = vshll.u32 %v3650_v7, 16  ;;  %v3602_v32 = vsel %vm1908_vm2, %v3599_v21, %v3601_v47  ;;  %v3310_v50 = vsel %vm1249_vm1, %v3307_v62, %v3309_v29 }
 0x3d1   : > { %v3425_v58 = vrot.slane %v3423_v45, 1  ;;  %vm8417_vm0 = vcmp.ne.s16.totalorder %v5972_v12, 0  ;;  %vm8418_vm3 = vcmp.ne.s16.totalorder %v5982_v25, 0  ;;  %v3427_v13 = vshrl.u32 %v3355_v60, 16 }
 0x3d2   : > { %v3651_v4 = vsel %vm8417_vm0, %v7278_v35, %v3602_v32  ;;  %v3356_v52 = vsel %vm8418_vm3, %v7308_v26, %v3310_v50  ;;  %v3710_v41 = vrot.slane %v3708_v30, 7  ;;  %3525 = vrot.lane.b32.xlu0 %v3418_v22, %s5583_s19  ;;  %v3311_v12 = vrot.slane %v7334_v61, 7  ;;  %v3266_v30 = vld [vmem:[#allocation2 + $0x68] sm:$0xff]  ;;  %vm8431_vm0 = vmmov %vm8430_vm6 }
 0x3d3   : > { %v3716_v37 = vshrl.u32 %v3651_v4, 16  ;;  %v3719_v3 = vshll.u32 %v3651_v4, 16  ;;  %v3431_v43 = vshll.u32 %v3356_v52, 16  ;;  %v3426_v24 = vsel %vm8419_vm5, %v3421_v5, %v3425_v58  ;;  %v8426_v5 = vld [vmem:[#allocation12_spill] sm:$0xff]  ;;  %vm8432_vm3 = vmmov %vm8419_vm5 }
 0x3d4   : > { %v3429_v53 = vor.u32 %v3427_v13, %v3425_v58  ;;  %v3435_v35 = vshrl.u32 %v3356_v52, 16  ;;  %3527 = vrot.lane.b32.xlu1 %v3426_v24, %s5583_s19  ;;  %v3713_v25 = vor.u32 %v3711_v48, %v3710_v41  ;;  %v3603_v0 = vrot.slane %v7308_v26, 1 }
 0x3d5   : > { %v3718_v56 = vrot.slane %v3716_v37, 7  ;;  %v3433_v16 = vrot.slane %v3431_v43, 1  ;;  %v3312_v33 = vsel %vm1249_vm1, %v3309_v29, %v3311_v12  ;;  %v3605_v54 = vrot.slane %v7334_v61, 1 }
 0x3d6   : > { %v3313_v23 = vrot.slane %v7342_v55, 7  ;;  %v3315_v9 = vrot.slane %v7344_v6, 7  ;;  %v3714_v62 = vsel %vm8420_vm10, %v3702_v39, %v3713_v25  ;;  %vm8422_vm8 = vcmp.ne.s16.totalorder %v6053_v20, 0 }
 0x3d7   : > { %v3721_v1 = vor.u32 %v3719_v3, %v3718_v56  ;;  %v3434_v27 = vsel %vm8421_vm11, %v3429_v53, %v3433_v16  ;;  %v3357_v59 = vsel %vm8422_vm8, %v7334_v61, %v3312_v33  ;;  %3821 = vrot.lane.b32.xlu0 %v3714_v62, %s5580_s18  ;;  %v3437_v57 = vor.u32 %v3435_v35, %v3433_v16  ;;  %v8434_v62 = vld [vmem:[#allocation15_spill] sm:$0xff]  ;;  %vm8438_vm8 = vmmov %vm8432_vm3 }
 0x3d8   : > { %v3439_v21 = vshll.u32 %v3357_v59, 16  ;;  %v3604_v15 = vsel %vm1908_vm2, %v3601_v47, %v3603_v0  ;;  %v3606_v14 = vsel %vm1908_vm2, %v3603_v0, %v3605_v54  ;;  %vm8424_vm9 = vcmp.ne.s16.totalorder %v6087_v17, 0 }
 0x3d9   : > { %v3722_v29 = vsel %vm8423_vm12, %v3710_v41, %v3721_v1  ;;  %v3652_v39 = vsel %vm8424_vm9, %v7301_v46, %v3604_v15  ;;  %vm8425_vm4 = vcmp.ne.s16.totalorder %v6090_v42, 0  ;;  %v3314_v20 = vsel %vm1249_vm1, %v3311_v12, %v3313_v23  ;;  %v7405_v15 = vld [vmem:[#allocation2 + $0x80] sm:$0xff]  ;;  %vm8441_vm9 = vmmov %vm8431_vm0 }
 0x3da   : > { %v3653_v38 = vsel %vm8425_vm4, %v7308_v26, %v3606_v14  ;;  %3823 = vrot.lane.b32.xlu1 %v3722_v29, %s5580_s18  ;;  %v3441_v19 = vrot.slane %v3439_v21, 1  ;;  %v3724_v60 = vshrl.u32 %v3652_v39, 16  ;;  %v3727_v49 = vshll.u32 %v3652_v39, 16  ;;  %vm8442_vm4 = vmmov %vm8432_vm3 }
 0x3db   : > { %v3732_v47 = vshrl.u32 %v3653_v38, 16  ;;  %v3735_v22 = vshll.u32 %v3653_v38, 16  ;;  %vm8427_vm13 = vcmp.ne.s16.totalorder %v8426_v5, 0  ;;  %v3443_v34 = vshrl.u32 %v3357_v59, 16  ;;  %3529 = vrot.lane.b32.xlu0 %v3434_v27, %s5583_s19  ;;  %v8436_v27 = vld [vmem:[#allocation16_spill] sm:$0xff] }
 0x3dc   : > { %v3358_v45 = vsel %vm8427_vm13, %v7342_v55, %v3314_v20  ;;  %v3316_v17 = vsel %vm1249_vm1, %v3313_v23, %v3315_v9  ;;  %v3442_v42 = vsel %vm8428_vm15, %v3437_v57, %v3441_v19  ;;  %v3726_v46 = vrot.slane %v3724_v60, 7  ;;  %v7402_v57 = vld [vmem:[#allocation2 + $0x78] sm:$0xff]  ;;  %vm8443_vm13 = vmmov %vm8431_vm0 }
 0x3dd   : > { %v3734_v26 = vrot.slane %v3732_v47, 7  ;;  %v3447_v7 = vshll.u32 %v3358_v45, 16  ;;  %v3445_v48 = vor.u32 %v3443_v34, %v3441_v19  ;;  %vm8429_vm7 = vcmp.ne.s16.totalorder %v8330_v63, 0  ;;  %v8439_v34 = vld [vmem:[#allocation18_spill] sm:$0xff] }
 0x3de   : > { %v3359_v32 = vsel %vm8429_vm7, %v7344_v6, %v3316_v17  ;;  %v3451_v50 = vshrl.u32 %v3358_v45, 16  ;;  %v3607_v58 = vrot.slane %v7342_v55, 1  ;;  %3531 = vrot.lane.b32.xlu1 %v3442_v42, %s5583_s19  ;;  %v3729_v4 = vor.u32 %v3727_v49, %v3726_v46 }
 0x3df   : > { %v3737_v52 = vor.u32 %v3735_v22, %v3734_v26  ;;  %v3449_v13 = vrot.slane %v3447_v7, 1  ;;  %v3455_v41 = vshll.u32 %v3359_v32, 16  ;;  %v3609_v3 = vrot.slane %v7344_v6, 1 }
 0x3e0   : > { %v3608_v37 = vsel %vm1908_vm2, %v3605_v54, %v3607_v58  ;;  %v3317_v43 = vrot.slane %v3266_v30, 7  ;;  %v3459_v24 = vshrl.u32 %v3359_v32, 16  ;;  %v3730_v53 = vsel %vm8430_vm6, %v3718_v56, %v3729_v4  ;;  %v7394_v54 = vld [vmem:[#allocation2 + $0x70] sm:$0xff] }
 0x3e1   : > { %v3738_v63 = vsel %vm8431_vm0, %v3726_v46, %v3737_v52  ;;  %v3450_v12 = vsel %vm8432_vm3, %v3445_v48, %v3449_v13  ;;  %v3453_v35 = vor.u32 %v3451_v50, %v3449_v13  ;;  %3825 = vrot.lane.b32.xlu0 %v3730_v53, %s5580_s18  ;;  %v3457_v25 = vrot.slane %v3455_v41, 1  ;;  %v8444_v4 = vld [vmem:[#allocation17_spill] sm:$0xff]  ;;  %v8446_v13 = vld [vmem:[#allocation19_spill] sm:$0xff]  ;;  %vm8450_vm0 = vmmov %vm8432_vm3 }
 0x3e2   : > { %vm8433_vm5 = vcmp.ne.s16.totalorder %v6240_v36, 0  ;;  %v3610_v0 = vsel %vm1908_vm2, %v3607_v58, %v3609_v3  ;;  %v3318_v33 = vsel %vm1249_vm1, %v3315_v9, %v3317_v43  ;;  %3827 = vrot.lane.b32.xlu1 %v3738_v63, %s5580_s18  ;;  %vm8435_vm10 = vcmp.ne.s16.totalorder %v8434_v62, 0  ;;  %v8448_v63 = vld [vmem:[#allocation20_spill] sm:$0xff] }
 0x3e3   : > { %v3654_v16 = vsel %vm8433_vm5, %v7334_v61, %v3608_v37  ;;  %v3655_v1 = vsel %vm8435_vm10, %v7342_v55, %v3610_v0  ;;  %vm8437_vm11 = vcmp.ne.s16.totalorder %v8436_v27, 0  ;;  %v3458_v36 = vsel %vm8438_vm8, %v3453_v35, %v3457_v25  ;;  %vm8453_vm5 = vmmov %vm8441_vm9 }
 0x3e4   : > { %v3740_v56 = vshrl.u32 %v3654_v16, 16  ;;  %v3743_v23 = vshll.u32 %v3654_v16, 16  ;;  %v3360_v59 = vsel %vm8437_vm11, %v3266_v30, %v3318_v33  ;;  %v3748_v61 = vshrl.u32 %v3655_v1, 16  ;;  %v3270_v33 = vld [vmem:[#allocation2 + $0x88] sm:$0xff]  ;;  %vm8454_vm10 = vmmov %vm8453_vm5 }
 0x3e5   : > { %v3751_v21 = vshll.u32 %v3655_v1, 16  ;;  %v3461_v9 = vor.u32 %v3459_v24, %v3457_v25  ;;  %v3463_v29 = vshll.u32 %v3360_v59, 16  ;;  %v3319_v39 = vrot.slane %v7394_v54, 7  ;;  %3533 = vrot.lane.b32.xlu0 %v3450_v12, %s5583_s19  ;;  %vm8457_vm8 = vmmov %vm8450_vm0 }
 0x3e6   : > { %v3742_v14 = vrot.slane %v3740_v56, 7  ;;  %v3467_v38 = vshrl.u32 %v3360_v59, 16  ;;  %v3750_v55 = vrot.slane %v3748_v61, 7  ;;  %v3611_v20 = vrot.slane %v3266_v30, 1  ;;  %3535 = vrot.lane.b32.xlu1 %v3458_v36, %s5583_s19 }
 0x3e7   : > { %v3613_v19 = vrot.slane %v7394_v54, 1  ;;  %v3321_v60 = vrot.slane %v7402_v57, 7  ;;  %v3465_v47 = vrot.slane %v3463_v29, 1  ;;  %v3320_v22 = vsel %vm1249_vm1, %v3317_v43, %v3319_v39 }
 0x3e8   : > { %v3745_v49 = vor.u32 %v3743_v23, %v3742_v14  ;;  %v3323_v5 = vrot.slane %v7405_v15, 7  ;;  %v3753_v45 = vor.u32 %v3751_v21, %v3750_v55  ;;  %vm8440_vm12 = vcmp.ne.s16.totalorder %v8439_v34, 0  ;;  %v8451_v23 = vld [vmem:[#allocation21_spill] sm:$0xff] }
 0x3e9   : > { %v3361_v17 = vsel %vm8440_vm12, %v7394_v54, %v3320_v22  ;;  %v3612_v42 = vsel %vm1908_vm2, %v3609_v3, %v3611_v20  ;;  %v3614_v46 = vsel %vm1908_vm2, %v3611_v20, %v3613_v19  ;;  %v3466_v48 = vsel %vm8442_vm4, %v3461_v9, %v3465_v47  ;;  %v8455_v22 = vld [vmem:[#allocation22_spill] sm:$0xff]  ;;  %vm8462_vm4 = vmmov %vm8450_vm0 }
 0x3ea   : > { %v3746_v7 = vsel %vm8441_vm9, %v3734_v26, %v3745_v49  ;;  %v3469_v32 = vor.u32 %v3467_v38, %v3465_v47  ;;  %v3471_v50 = vshll.u32 %v3361_v17, 16  ;;  %v3754_v58 = vsel %vm8443_vm13, %v3742_v14, %v3753_v45 }
 0x3eb   : > { %3829 = vrot.lane.b32.xlu0 %v3746_v7, %s5580_s18  ;;  %vm8445_vm15 = vcmp.ne.s16.totalorder %v8444_v4, 0  ;;  %vm8447_vm7 = vcmp.ne.s16.totalorder %v8446_v13, 0  ;;  %v3322_v37 = vsel %vm1249_vm1, %v3319_v39, %v3321_v60  ;;  %3831 = vrot.lane.b32.xlu1 %v3754_v58, %s5580_s18  ;;  %vm8449_vm6 = vcmp.ne.s16.totalorder %v8448_v63, 0  ;;  %v8460_v7 = vld [vmem:[#allocation25_spill] sm:$0xff] }
 0x3ec   : > { %v3656_v52 = vsel %vm8445_vm15, %v7344_v6, %v3612_v42  ;;  %v3657_v41 = vsel %vm8447_vm7, %v3266_v30, %v3614_v46  ;;  %v3473_v26 = vrot.slane %v3471_v50, 1  ;;  %v3362_v12 = vsel %vm8449_vm6, %v7402_v57, %v3322_v37  ;;  %v8458_v42 = vld [vmem:[#allocation23_spill] sm:$0xff]  ;;  %vm8465_vm15 = vmmov %vm8453_vm5 }
 0x3ed   : > { %v3756_v3 = vshrl.u32 %v3656_v52, 16  ;;  %v3759_v43 = vshll.u32 %v3656_v52, 16  ;;  %v3764_v24 = vshrl.u32 %v3657_v41, 16  ;;  %v3767_v53 = vshll.u32 %v3657_v41, 16  ;;  %vm8466_vm7 = vmmov %vm8453_vm5 }
 0x3ee   : > { %v3475_v35 = vshrl.u32 %v3361_v17, 16  ;;  %v3324_v25 = vsel %vm1249_vm1, %v3321_v60, %v3323_v5  ;;  %v3474_v6 = vsel %vm8450_vm0, %v3469_v32, %v3473_v26  ;;  %v3479_v0 = vshll.u32 %v3362_v12, 16  ;;  %v3271_v17 = vld [vmem:[#allocation2 + $0x90] sm:$0xff] }
 0x3ef   : > { %v3758_v16 = vrot.slane %v3756_v3, 7  ;;  %v3766_v30 = vrot.slane %v3764_v24, 7  ;;  %3537 = vrot.lane.b32.xlu0 %v3466_v48, %s5583_s19  ;;  %vm8452_vm3 = vcmp.ne.s16.totalorder %v8451_v23, 0  ;;  %v3483_v1 = vshrl.u32 %v3362_v12, 16  ;;  %3539 = vrot.lane.b32.xlu1 %v3474_v6, %s5583_s19 }
 0x3f0   : > { %v3477_v56 = vor.u32 %v3475_v35, %v3473_v26  ;;  %v3363_v62 = vsel %vm8452_vm3, %v7405_v15, %v3324_v25  ;;  %v3615_v27 = vrot.slane %v7402_v57, 1  ;;  %v3481_v61 = vrot.slane %v3479_v0, 1  ;;  %v8463_v35 = vld [vmem:[#allocation26_spill] sm:$0xff]  ;;  %vm8471_vm3 = vmmov %vm8450_vm0 }
 0x3f1   : > { %v3761_v59 = vor.u32 %v3759_v43, %v3758_v16  ;;  %v3769_v36 = vor.u32 %v3767_v53, %v3766_v30  ;;  %v3487_v21 = vshll.u32 %v3363_v62, 16  ;;  %v3617_v14 = vrot.slane %v7405_v15, 1  ;;  %v3272_v43 = vld [vmem:[#allocation2 + $0x98] sm:$0x1] }
 0x3f2   : > { %v3616_v9 = vsel %vm1908_vm2, %v3613_v19, %v3615_v27  ;;  %v3325_v29 = vrot.slane %v3270_v33, 7  ;;  %v3372_v39 = vrot.slane %v3370_v10, 1  ;;  %v3485_v60 = vor.u32 %v3483_v1, %v3481_v61 }
 0x3f3   : > { %v3762_v38 = vsel %vm8453_vm5, %v3750_v55, %v3761_v59  ;;  %v3770_v20 = vsel %vm8454_vm10, %v3758_v16, %v3769_v36  ;;  %v3491_v49 = vshrl.u32 %v3363_v62, 16  ;;  %v3489_v47 = vrot.slane %v3487_v21, 1  ;;  %vm8474_vm10 = vmmov %vm8450_vm0 }
 0x3f4   : > { %3833 = vrot.lane.b32.xlu0 %v3762_v38, %s5580_s18  ;;  %vm8456_vm11 = vcmp.ne.s16.totalorder %v8455_v22, 0  ;;  %v3618_v19 = vsel %vm1908_vm2, %v3615_v27, %v3617_v14  ;;  %v3326_v34 = vsel %vm1249_vm1, %v3323_v5, %v3325_v29  ;;  %3835 = vrot.lane.b32.xlu1 %v3770_v20, %s5580_s18  ;;  %v3482_v10 = vsel %vm8457_vm8, %v3477_v56, %v3481_v61  ;;  %v8469_v27 = vld [vmem:[#allocation28_spill] sm:$0xff] }
 0x3f5   : > { %v3658_v45 = vsel %vm8456_vm11, %v7394_v54, %v3616_v9  ;;  %vm8459_vm12 = vcmp.ne.s16.totalorder %v8458_v42, 0  ;;  %vm8461_vm9 = vcmp.ne.s16.totalorder %v8460_v7, 0  ;;  %v3490_v32 = vsel %vm8462_vm4, %v3485_v60, %v3489_v47 }
 0x3f6   : > { %v3772_v55 = vshrl.u32 %v3658_v45, 16  ;;  %v3659_v46 = vsel %vm8459_vm12, %v7402_v57, %v3618_v19  ;;  %v3364_v48 = vsel %vm8461_vm9, %v3270_v33, %v3326_v34  ;;  %v3775_v54 = vshll.u32 %v3658_v45, 16  ;;  %v8478_v19 = vld [vmem:[#allocation14_spill] sm:$0xff] }
 0x3f7   : > { %v3780_v50 = vshrl.u32 %v3659_v46, 16  ;;  %v3783_v58 = vshll.u32 %v3659_v46, 16  ;;  %v3493_v5 = vor.u32 %v3491_v49, %v3489_v47  ;;  %v3495_v52 = vshll.u32 %v3364_v48, 16  ;;  %v8476_v49 = vld [vmem:[#allocation13_spill] sm:$0xff] }
 0x3f8   : > { %v3774_v4 = vrot.slane %v3772_v55, 7  ;;  %v3327_v13 = vrot.slane %v3271_v17, 7  ;;  %3541 = vrot.lane.b32.xlu0 %v3482_v10, %s5583_s19  ;;  %v3499_v37 = vshrl.u32 %v3364_v48, 16  ;;  %v3619_v26 = vrot.slane %v3270_v33, 1  ;;  %3543 = vrot.lane.b32.xlu1 %v3490_v32, %s5583_s19 }
 0x3f9   : > { %v3782_v41 = vrot.slane %v3780_v50, 7  ;;  %v3621_v3 = vrot.slane %v3271_v17, 1  ;;  %v3497_v24 = vrot.slane %v3495_v52, 1  ;;  %v3373_v63 = vor.u32 %v3372_v39, %v3368_v44 }
 0x3fa   : > { %v3777_v57 = vor.u32 %v3775_v54, %v3774_v4  ;;  %v3328_v53 = vsel %vm1249_vm1, %v3325_v29, %v3327_v13  ;;  %vm8464_vm13 = vcmp.ne.s16.totalorder %v8463_v35, 0  ;;  %v3620_v6 = vsel %vm1908_vm2, %v3617_v14, %v3619_v26  ;;  %v8472_v14 = vld [vmem:[#allocation6_spill] sm:$0xff] }
 0x3fb   : > { %v3785_v12 = vor.u32 %v3783_v58, %v3782_v41  ;;  %v3365_v25 = vsel %vm8464_vm13, %v3271_v17, %v3328_v53  ;;  %v3622_v16 = vsel %vm1908_vm2, %v3619_v26, %v3621_v3  ;;  %v3623_v23 = vrot.slane %v3272_v43, 1  ;;  %v7528_v53 = vld [vmem:[%s8141_s2 + $0x10] sm:$0x3f]  }
 0x3fc   : > { %v3778_v0 = vsel %vm8465_vm15, %v3766_v30, %v3777_v57  ;;  %v3503_v56 = vshll.u32 %v3365_v25, 16  ;;  %v3501_v1 = vor.u32 %v3499_v37, %v3497_v24  ;;  %vm8468_vm1 = vcmp.ne.s16.totalorder %v8467_v11, 0  ;;  %vm8484_vm15 = vmmov %vm8450_vm0 }
 0x3fd   : > { %3837 = vrot.lane.b32.xlu0 %v3778_v0, %s5580_s18  ;;  %v3786_v62 = vsel %vm8466_vm7, %v3774_v4, %v3785_v12  ;;  %v3660_v44 = vsel %vm8468_vm1, %v7405_v15, %v3620_v6  ;;  %vm8470_vm6 = vcmp.ne.s16.totalorder %v8469_v27, 0  ;;  %v3498_v30 = vsel %vm8450_vm0, %v3493_v5, %v3497_v24  ;;  %v5566_v15 = vld [vmem:[%s8141_s2] sm:$0x3f]  }
 0x3fe   : > { %v3661_v59 = vsel %vm8470_vm6, %v3270_v33, %v3622_v16  ;;  %3839 = vrot.lane.b32.xlu1 %v3786_v62, %s5580_s18  ;;  %v3788_v36 = vshrl.u32 %v3660_v44, 16  ;;  %v3505_v21 = vrot.slane %v3503_v56, 1  ;;  %v3378_v9 = vsel %vm8471_vm3, %v3373_v63, %v7244_v2 }
 0x3ff   : > { %v3796_v61 = vshrl.u32 %v3661_v59, 16  ;;  %vm8473_vm5 = vcmp.ne.s16.totalorder %v8472_v14, 0  ;;  %v3791_v39 = vshll.u32 %v3660_v44, 16  ;;  %v3799_v20 = vshll.u32 %v3661_v59, 16 }
 0x400   : > { %v3644_v29 = vsel %vm8473_vm5, %v7193_v28, %v3588_v51  ;;  %v3790_v33 = vrot.slane %v3788_v36, 7  ;;  %v3506_v60 = vsel %vm8474_vm10, %v3501_v1, %v3505_v21  ;;  %v3624_v2 = vsel %vm1908_vm2, %v3621_v3, %v3623_v23  ;;  %vm8481_vm2 = vmmov %vm8466_vm7 }
 0x401   : > { %v3798_v38 = vrot.slane %v3796_v61, 7  ;;  %3545 = vrot.lane.b32.xlu0 %v3498_v30, %s5583_s19  ;;  %vm8475_vm11 = vcmask 1045504   ;;  %vm8477_vm8 = vcmp.ne.s16.totalorder %v8476_v49, 0  ;;  %v3671_v22 = vshll.u32 %v7237_v18, 16  ;;  %vm8482_vm4 = vmmov %vm8481_vm2 }
 0x402   : > { %v3959_v40 = vsel %vm8475_vm11, %v7250_v31, 0  ;;  %3547 = vrot.lane.b32.xlu1 %v3506_v60, %s5583_s19  ;;  %v3793_v28 = vor.u32 %v3791_v39, %v3790_v33  ;;  %v3662_v47 = vsel %vm8477_vm8, %v3271_v17, %v3624_v2  ;;  %v3664_v45 = vshrl.u32 %v3644_v29, 16  ;;  %vm8480_vm9 = vmmov %vm8475_vm11 }
 0x403   : > { %v3801_v51 = vor.u32 %v3799_v20, %v3798_v38  ;;  %5315 = vmatpush3.bf16.msra.mxu1 %v3959_v40  ;;  %vm8479_vm12 = vcmp.ne.s16.totalorder %v8478_v19, 0  ;;  %v3804_v10 = vshrl.u32 %v3662_v47, 16  ;;  %v3673_v42 = vor.u32 %v3671_v22, %v7259_v8  ;;  %vm8483_vm13 = vmmov %vm8481_vm2 }
 0x404   : > { %v3366_v34 = vsel %vm8479_vm12, %v3272_v43, %v3327_v13  ;;  %5548 = vmatprep.subr.msk.bf16.mxu1 %vm8480_vm9, %v5566_v15  ;;  %v3794_v55 = vsel %vm8481_vm2, %v3782_v41, %v3793_v28  ;;  %v3507_v17 = vshrl.u32 %v3365_v25, 16  ;;  %v3666_v7 = vrot.slane %v3664_v45, 7  ;;  %vm8485_vm7 = vmmov %vm8481_vm2 }
 0x405   : > { %3841 = vrot.lane.b32.xlu0 %v3794_v55, %s5580_s18  ;;  %v3802_v31 = vsel %vm8482_vm4, %v3790_v33, %v3801_v51  ;;  %v3806_v46 = vrot.slane %v3804_v10, 7  ;;  %v3511_v18 = vshll.u32 %v3366_v34, 16  ;;  %v3807_v48 = vshll.u32 %v3662_v47, 16  ;;  %vm8488_vm0 = vmmov %vm8480_vm9 }
 0x406   : > { %3843 = vrot.lane.b32.xlu1 %v3802_v31, %s5580_s18  ;;  %v3509_v32 = vor.u32 %v3507_v17, %v3505_v21  ;;  %v3674_v54 = vsel %vm8483_vm13, %v3666_v7, %v3673_v42  ;;  %vm8486_vm1 = vcmask 97344   ;;  %v4131_v24 = vsel %vm8488_vm0, %v5566_v15, 0  ;;  %vm8493_vm8 = vmmov %vm8488_vm0 }
 0x407   : > { %v3809_v50 = vor.u32 %v3807_v48, %v3806_v46  ;;  %v3513_v58 = vrot.slane %v3511_v18, 1  ;;  %vm8487_vm6 = vmmov %vm8486_vm1  ;;  %vm8490_vm5 = vcmask 97280  }
 0x408   : > { %vm8489_vm3 = vmmov %vm8486_vm1 }
 0x409   : > { %3515 = vrot.lane.b32.xlu0 %v3378_v9, %s5583_s19  ;;  %v3514_v4 = vsel %vm8484_vm15, %v3509_v32, %v3513_v58  ;;  %v3810_v8 = vsel %vm8485_vm7, %v3798_v38, %v3809_v50  ;;  %vm8491_vm10 = vmmov %vm8486_vm1 }
 0x40a   : > { %3811 = vrot.lane.b32.xlu1 %v3674_v54, %s5580_s18  ;;  %vm8492_vm11 = vmmov %vm8490_vm5 }
 0x40b   : > { %vm8494_vm12 = vmmov %vm8486_vm1 }
 0x40c   : > { %vm8495_vm9 = vmmov %vm8490_vm5 }
 0x40d   : > { %3549 = vrot.lane.b32.xlu0 %v3514_v4, %s5583_s19  ;;  %vm8496_vm2 = vmmov %vm8490_vm5 }
 0x40e   : > { %3845 = vrot.lane.b32.xlu1 %v3810_v8, %s5580_s18  ;;  %vm8497_vm4 = vmmov %vm8486_vm1 }
 0x40f   : > { %vm8498_vm13 = vmmov %vm8496_vm2 }
 0x410   : > { %vm8499_vm15 = vmmov %vm8486_vm1 }
 0x411   : > { %vm8500_vm7 = vmmov %vm8486_vm1 }
 0x433   : > { %v3518_v5 = vpop.permute.xlu0 %3517  ;;  %v3520_v52 = vpop.permute.xlu1 %3519 }
 0x434   : > { %3570 = vst.msk [vmem:[#allocation2 + $0x10] sm:$0xff] %vm1528_vm14, %v3518_v5  ;;  %3571 = vst.msk [vmem:[#allocation2 + $0x18] sm:$0xff] %vm1528_vm14, %v3520_v52 }
 0x437   : > { %v3814_v13 = vpop.permute.xlu0 %3813 }
 0x438   : > { %v3816_v41 = vpop.permute.xlu1 %3815  ;;  %3866 = vst.msk [vmem:[#allocation2 + $0x10] sm:$0xff] %vm8486_vm1, %v3814_v13  ;;  %vm8501_vm1 = vmmov %vm8496_vm2 }
 0x439   : > { %3867 = vst.msk [vmem:[#allocation2 + $0x18] sm:$0xff] %vm8487_vm6, %v3816_v41  ;;  %vm8502_vm6 = vmmov %vm8489_vm3 }
 0x43a   : > { %vm8503_vm0 = vmmov %vm8501_vm1 }
 0x43b   : > { %v3522_v37 = vpop.permute.xlu0 %3521 }
 0x43c   : > { %3572 = vst.msk [vmem:[#allocation2 + $0x20] sm:$0xff] %vm1528_vm14, %v3522_v37 }
 0x43d   : > { %v3524_v26 = vpop.permute.xlu1 %3523 }
 0x43e   : > { %3573 = vst.msk [vmem:[#allocation2 + $0x28] sm:$0xff] %vm1528_vm14, %v3524_v26 }
 0x43f   : > { %v7520_v43 = vld [vmem:[#allocation2 + $0x10] sm:$0xff] }
 0x440   : > { %v3818_v3 = vpop.permute.xlu0 %3817  ;;  %v7522_v57 = vld [vmem:[#allocation2 + $0x18] sm:$0xff]  ;;  %5316 = vmatprep.mubr.msk.bf16.mxu1 %vm8490_vm5, %v7520_v43  ;;  %vm8504_vm5 = vmmov %vm8503_vm0 }
 0x441   : > { %3868 = vst.msk [vmem:[#allocation2 + $0x20] sm:$0xff] %vm8489_vm3, %v3818_v3  ;;  %v3820_v63 = vpop.permute.xlu1 %3819  ;;  %5317 = vmatmul.mubr.msk.bf16.vlgmr.msra.gmra.mrb[0].mxu1 %vm8492_vm11, %v7522_v57  ;;  %vm8506_vm11 = vmmov %vm8503_vm0 }
 0x442   : > { %3869 = vst.msk [vmem:[#allocation2 + $0x28] sm:$0xff] %vm8491_vm10, %v3820_v63  ;;  %5349 = vmatpush3.bf16.msra.mxu1 %v4131_v24  ;;  %vm8505_vm10 = vmmov %vm8489_vm3 }
 0x443   : > { %5549 = vmatprep.subr.msk.bf16.mxu1 %vm8493_vm8, %v7528_v53  ;;  %vm8507_vm8 = vmmov %vm8489_vm3 }
 0x444   : > { %v3526_v12 = vpop.permute.xlu0 %3525 }
 0x445   : > { %3574 = vst.msk [vmem:[#allocation2 + $0x30] sm:$0xff] %vm1528_vm14, %v3526_v12 }
 0x446   : > { %v3528_v35 = vpop.permute.xlu1 %3527 }
 0x447   : > { %3575 = vst.msk [vmem:[#allocation2 + $0x38] sm:$0xff] %vm1528_vm14, %v3528_v35 }
 0x448   : > { %v7540_v6 = vld [vmem:[#allocation2 + $0x20] sm:$0xff] }
 0x449   : > { %v3822_v25 = vpop.permute.xlu0 %3821  ;;  %5320 = vmatprep.mubr.msk.bf16.mxu1 %vm8495_vm9, %v7540_v6  ;;  %v7545_v16 = vld [vmem:[#allocation2 + $0x28] sm:$0xff]  ;;  %vm8509_vm9 = vmmov %vm8489_vm3 }
 0x44a   : > { %3870 = vst.msk [vmem:[#allocation2 + $0x30] sm:$0xff] %vm8494_vm12, %v3822_v25  ;;  %5321 = vmatmul.mubr.msk.bf16.gmra.mrb[4].mxu1 %vm8496_vm2, %v7545_v16  ;;  %vm8508_vm12 = vmmov %vm8503_vm0 }
 0x44b   : > { %vm8510_vm2 = vmmov %vm8503_vm0 }
 0x44c   : > { %v3824_v0 = vpop.permute.xlu1 %3823 }
 0x44d   : > { %3871 = vst.msk [vmem:[#allocation2 + $0x38] sm:$0xff] %vm8497_vm4, %v3824_v0  ;;  %v3530_v56 = vpop.permute.xlu0 %3529  ;;  %vm8511_vm4 = vmmov %vm8489_vm3 }
 0x44e   : > { %3576 = vst.msk [vmem:[#allocation2 + $0x40] sm:$0xff] %vm1528_vm14, %v3530_v56 }
 0x450   : > { %v3532_v23 = vpop.permute.xlu1 %3531 }
 0x451   : > { %3577 = vst.msk [vmem:[#allocation2 + $0x48] sm:$0xff] %vm1528_vm14, %v3532_v23  ;;  %v7552_v62 = vld [vmem:[#allocation2 + $0x30] sm:$0xff] }
 0x452   : > { %5324 = vmatprep.mubr.msk.bf16.mxu1 %vm8498_vm13, %v7552_v62  ;;  %vm8512_vm13 = vmmov %vm8503_vm0 }
 0x453   : > { %v3826_v1 = vpop.permute.xlu0 %3825 }
 0x454   : > { %3872 = vst.msk [vmem:[#allocation2 + $0x40] sm:$0xff] %vm8499_vm15, %v3826_v1  ;;  %v3828_v11 = vpop.permute.xlu1 %3827  ;;  %v7557_v44 = vld [vmem:[#allocation2 + $0x38] sm:$0xff]  ;;  %vm8513_vm15 = vmmov %vm8489_vm3 }
 0x455   : > { %3873 = vst.msk [vmem:[#allocation2 + $0x48] sm:$0xff] %vm8500_vm7, %v3828_v11  ;;  %5325 = vmatmul.mubr.msk.bf16.gmra.mrb[8].mxu1 %vm8501_vm1, %v7557_v44  ;;  %vm8514_vm7 = vmmov %vm8503_vm0 }
 0x456   : > { %vm8515_vm1 = vmmov %vm8489_vm3 }
 0x457   : > { %v3534_v27 = vpop.permute.xlu0 %3533 }
 0x458   : > { %3578 = vst.msk [vmem:[#allocation2 + $0x50] sm:$0xff] %vm1528_vm14, %v3534_v27  ;;  %v3536_v59 = vpop.permute.xlu1 %3535 }
 0x459   : > { %3579 = vst.msk [vmem:[#allocation2 + $0x58] sm:$0xff] %vm1528_vm14, %v3536_v59 }
 0x45b   : > { %v7564_v61 = vld [vmem:[#allocation2 + $0x40] sm:$0xff] }
 0x45c   : > { %5328 = vmatprep.mubr.msk.bf16.mxu1 %vm8503_vm0, %v7564_v61  ;;  %v7569_v21 = vld [vmem:[#allocation2 + $0x48] sm:$0xff] }
 0x45d   : > { %v3830_v36 = vpop.permute.xlu0 %3829  ;;  %v3832_v30 = vpop.permute.xlu1 %3831  ;;  %5329 = vmatmul.mubr.msk.bf16.gmra.mrb[12].mxu1 %vm8504_vm5, %v7569_v21 }
 0x45e   : > { %3874 = vst.msk [vmem:[#allocation2 + $0x50] sm:$0xff] %vm8502_vm6, %v3830_v36  ;;  %vm8516_vm6 = vmmov %vm8503_vm0 }
 0x45f   : > { %3875 = vst.msk [vmem:[#allocation2 + $0x58] sm:$0xff] %vm8489_vm3, %v3832_v30  ;;  %vm8517_vm0 = vmmov %vm8515_vm1 }
 0x460   : > { %vm8518_vm3 = vmmov %vm8510_vm2 }
 0x461   : > { %v3538_v9 = vpop.permute.xlu0 %3537  ;;  %v3540_v14 = vpop.permute.xlu1 %3539  ;;  %vm8519_vm5 = vmmov %vm8517_vm0 }
 0x462   : > { %3580 = vst.msk [vmem:[#allocation2 + $0x60] sm:$0xff] %vm1528_vm14, %v3538_v9  ;;  %3581 = vst.msk [vmem:[#allocation2 + $0x68] sm:$0xff] %vm1528_vm14, %v3540_v14 }
 0x465   : > { %v7576_v15 = vld [vmem:[#allocation2 + $0x50] sm:$0xff] }
 0x466   : > { %v3834_v29 = vpop.permute.xlu0 %3833  ;;  %5332 = vmatprep.mubr.msk.bf16.mxu1 %vm8506_vm11, %v7576_v15  ;;  %v3836_v33 = vpop.permute.xlu1 %3835  ;;  %v7581_v39 = vld [vmem:[#allocation2 + $0x58] sm:$0xff]  ;;  %vm8521_vm11 = vmmov %vm8510_vm2 }
 0x467   : > { %3876 = vst.msk [vmem:[#allocation2 + $0x60] sm:$0xff] %vm8505_vm10, %v3834_v29  ;;  %5333 = vmatmul.mubr.msk.bf16.gmra.mrb[16].mxu1 %vm8508_vm12, %v7581_v39  ;;  %vm8520_vm10 = vmmov %vm8510_vm2 }
 0x468   : > { %3877 = vst.msk [vmem:[#allocation2 + $0x68] sm:$0xff] %vm8507_vm8, %v3836_v33  ;;  %vm8522_vm8 = vcmask 1045504   ;;  %vm8523_vm12 = vmmov %vm8510_vm2 }
 0x469   : > { %v4367_v18 = vsel %vm8522_vm8, %v7528_v53, 0 }
 0x46a   : > { %v3542_v38 = vpop.permute.xlu0 %3541  ;;  %v3544_v20 = vpop.permute.xlu1 %3543 }
 0x46b   : > { %3582 = vst.msk [vmem:[#allocation2 + $0x70] sm:$0xff] %vm1528_vm14, %v3542_v38  ;;  %3583 = vst.msk [vmem:[#allocation2 + $0x78] sm:$0xff] %vm1528_vm14, %v3544_v20 }
 0x46e   : > { %v3894_v2 = vld [vmem:[#allocation2 + $0x60] sm:$0xff] }
 0x46f   : > { %v3838_v60 = vpop.permute.xlu0 %3837  ;;  %5336 = vmatprep.mubr.msk.bf16.mxu1 %vm8510_vm2, %v3894_v2  ;;  %v3895_v28 = vld [vmem:[#allocation2 + $0x68] sm:$0xff] }
 0x470   : > { %3878 = vst.msk [vmem:[#allocation2 + $0x70] sm:$0xff] %vm8509_vm9, %v3838_v60  ;;  %v3840_v40 = vpop.permute.xlu1 %3839  ;;  %5337 = vmatmul.mubr.msk.bf16.gmra.mrb[20].mxu1 %vm8512_vm13, %v3895_v28  ;;  %vm8524_vm9 = vmmov %vm8510_vm2 }
 0x471   : > { %3879 = vst.msk [vmem:[#allocation2 + $0x78] sm:$0xff] %vm8511_vm4, %v3840_v40  ;;  %vm8525_vm4 = vmmov %vm8510_vm2 }
 0x472   : > { %vm8526_vm13 = vmmov %vm8510_vm2 }
 0x473   : > { %v3546_v51 = vpop.permute.xlu0 %3545 }
 0x474   : > { %3584 = vst.msk [vmem:[#allocation2 + $0x80] sm:$0xff] %vm1528_vm14, %v3546_v51  ;;  %v3548_v49 = vpop.permute.xlu1 %3547 }
 0x475   : > { %3585 = vst.msk [vmem:[#allocation2 + $0x88] sm:$0xff] %vm1528_vm14, %v3548_v49 }
 0x477   : > { %v3842_v47 = vpop.permute.xlu0 %3841  ;;  %v3896_v22 = vld [vmem:[#allocation2 + $0x70] sm:$0xff] }
 0x478   : > { %3880 = vst.msk [vmem:[#allocation2 + $0x80] sm:$0xff] %vm8513_vm15, %v3842_v47  ;;  %5340 = vmatprep.mubr.msk.bf16.mxu1 %vm8514_vm7, %v3896_v22  ;;  %v3844_v45 = vpop.permute.xlu1 %3843  ;;  %v3897_v19 = vld [vmem:[#allocation2 + $0x78] sm:$0xff]  ;;  %vm8527_vm15 = vmmov %vm8510_vm2 }
 0x479   : > { %3881 = vst.msk [vmem:[#allocation2 + $0x88] sm:$0xff] %vm8515_vm1, %v3844_v45  ;;  %5341 = vmatmul.mubr.msk.bf16.gmra.mrb[24].mxu1 %vm8516_vm6, %v3897_v19  ;;  %vm8528_vm7 = vmmov %vm8510_vm2 }
 0x47a   : > { %vm8529_vm1 = vmmov %vm8510_vm2 }
 0x47b   : > { %v3516_v34 = vpop.permute.xlu0 %3515  ;;  %vm8530_vm6 = vmmov %vm8529_vm1 }
 0x47c   : > { %3569 = vst.msk [vmem:[#allocation2 + $0x8] sm:$0xff] %vm1528_vm14, %v3516_v34  ;;  %v3812_v10 = vpop.permute.xlu1 %3811 }
 0x47d   : > { %3865 = vst.msk [vmem:[#allocation2 + $0x8] sm:$0xff] %vm8517_vm0, %v3812_v10  ;;  %vm8531_vm0 = vmmov %vm8529_vm1 }
 0x47e   : > { %vm8536_vm8 = vmmov %vm8531_vm0 }
 0x47f   : > { %v3550_v55 = vpop.permute.xlu0 %3549  ;;  %v3898_v31 = vld [vmem:[#allocation2 + $0x80] sm:$0xff] }
 0x480   : > { %3586 = vst.msk [vmem:[#allocation2 + $0x90] sm:$0xff] %vm1528_vm14, %v3550_v55  ;;  %5344 = vmatprep.mubr.msk.bf16.mxu1 %vm8518_vm3, %v3898_v31  ;;  %v3846_v42 = vpop.permute.xlu1 %3845  ;;  %v3901_v46 = vld [vmem:[#allocation2 + $0x88] sm:$0xff]  ;;  %vm8532_vm3 = vmmov %vm8531_vm0 }
 0x481   : > { %3882 = vst.msk [vmem:[#allocation2 + $0x90] sm:$0xff] %vm8519_vm5, %v3846_v42  ;;  %5345 = vmatmul.mubr.msk.bf16.gmra.mrb[28].mxu1 %vm8520_vm10, %v3901_v46  ;;  %vm8533_vm5 = vmmov %vm8531_vm0 }
 0x482   : > { %vm8534_vm10 = vmmov %vm8531_vm0 }
 0x484   : > { %v3883_v17 = vld [vmem:[#allocation2 + $0x8] sm:$0xff] }
 0x485   : > { %5350 = vmatprep.mubr.msk.bf16.mxu1 %vm8521_vm11, %v3883_v17  ;;  %vm8535_vm11 = vmmov %vm8531_vm0 }
 0x488   : > { %v4309_v7 = vld [vmem:[#allocation2 + $0x90] sm:$0xff] }
 0x489   : > { %5351 = vmatmul.mubr.msk.bf16.vlgmr.msra.gmra.mrb[0].mxu1 %vm8523_vm12, %v7520_v43  ;;  %vm8537_vm12 = vmmov %vm8531_vm0 }
 0x48a   : > { %5383 = vmatpush3.bf16.msra.mxu1 %v4367_v18  ;;  %5354 = vmatprep.mubr.msk.bf16.mxu1 %vm8524_vm9, %v7522_v57  ;;  %vm8538_vm9 = vmmov %vm8531_vm0 }
 0x491   : > { %5355 = vmatmul.mubr.msk.bf16.gmra.mrb[4].mxu1 %vm8510_vm2, %v7540_v6  ;;  %vm8539_vm2 = vmmov %vm8531_vm0 }
 0x492   : > { %5358 = vmatprep.mubr.msk.bf16.mxu1 %vm8525_vm4, %v7545_v16  ;;  %vm8540_vm4 = vmmov %vm8531_vm0 }
 0x499   : > { %5359 = vmatmul.mubr.msk.bf16.gmra.mrb[8].mxu1 %vm8526_vm13, %v7552_v62  ;;  %vm8541_vm13 = vmmov %vm8531_vm0 }
 0x49a   : > { %5362 = vmatprep.mubr.msk.bf16.mxu1 %vm8527_vm15, %v7557_v44  ;;  %vm8542_vm15 = vmmov %vm8531_vm0 }
 0x4a1   : > { %5363 = vmatmul.mubr.msk.bf16.gmra.mrb[12].mxu1 %vm8528_vm7, %v7564_v61  ;;  %vm8543_vm7 = vmmov %vm8531_vm0 }
 0x4a2   : > { %5366 = vmatprep.mubr.msk.bf16.mxu1 %vm8529_vm1, %v7569_v21  ;;  %vm8544_vm1 = vmmov %vm8531_vm0 }
 0x4a9   : > { %5367 = vmatmul.mubr.msk.bf16.gmra.mrb[16].mxu1 %vm8530_vm6, %v7576_v15  ;;  %vm8545_vm6 = vmmov %vm8531_vm0 }
 0x4aa   : > { %5370 = vmatprep.mubr.msk.bf16.mxu1 %vm8531_vm0, %v7581_v39 }
 0x4b1   : > { %5371 = vmatmul.mubr.msk.bf16.gmra.mrb[20].mxu1 %vm8532_vm3, %v3894_v2  ;;  %vm8546_vm3 = vmmov %vm8531_vm0 }
 0x4b2   : > { %5374 = vmatprep.mubr.msk.bf16.mxu1 %vm8533_vm5, %v3895_v28  ;;  %vm8547_vm5 = vmmov %vm8531_vm0 }
 0x4b9   : > { %5375 = vmatmul.mubr.msk.bf16.gmra.mrb[24].mxu1 %vm8534_vm10, %v3896_v22  ;;  %vm8548_vm10 = vmmov %vm8531_vm0 }
 0x4ba   : > { %5378 = vmatprep.mubr.msk.bf16.mxu1 %vm8535_vm11, %v3897_v19  ;;  %vm8549_vm11 = vmmov %vm8531_vm0 }
 0x4c1   : > { %5379 = vmatmul.mubr.msk.bf16.gmra.mrb[28].mxu1 %vm8536_vm8, %v3898_v31  ;;  %vm8550_vm8 = vmmov %vm8531_vm0 }
 0x4c2   : > { %5384 = vmatprep.mubr.msk.bf16.mxu1 %vm8537_vm12, %v7522_v57  ;;  %vm8551_vm12 = vmmov %vm8531_vm0 }
 0x4c9   : > { %5385 = vmatmul.mubr.msk.bf16.vlgmr.msra.gmra.mrb[0].mxu1 %vm8538_vm9, %v7540_v6 }
 0x4ca   : > { %5388 = vmatprep.mubr.msk.bf16.mxu1 %vm8539_vm2, %v7545_v16 }
 0x4d1   : > { %5389 = vmatmul.mubr.msk.bf16.gmra.mrb[4].mxu1 %vm8540_vm4, %v7552_v62 }
 0x4d2   : > { %5392 = vmatprep.mubr.msk.bf16.mxu1 %vm8541_vm13, %v7557_v44 }
 0x4d9   : > { %5393 = vmatmul.mubr.msk.bf16.gmra.mrb[8].mxu1 %vm8542_vm15, %v7564_v61 }
 0x4da   : > { %5396 = vmatprep.mubr.msk.bf16.mxu1 %vm8543_vm7, %v7569_v21 }
 0x4e1   : > { %5397 = vmatmul.mubr.msk.bf16.gmra.mrb[12].mxu1 %vm8544_vm1, %v7576_v15 }
 0x4e2   : > { %5400 = vmatprep.mubr.msk.bf16.mxu1 %vm8545_vm6, %v7581_v39 }
 0x4e9   : > { %5401 = vmatmul.mubr.msk.bf16.gmra.mrb[16].mxu1 %vm8531_vm0, %v3894_v2 }
 0x4ea   : > { %5404 = vmatprep.mubr.msk.bf16.mxu1 %vm8546_vm3, %v3895_v28 }
 0x4f1   : > { %5405 = vmatmul.mubr.msk.bf16.gmra.mrb[20].mxu1 %vm8547_vm5, %v3896_v22 }
 0x4f2   : > { %5408 = vmatprep.mubr.msk.bf16.mxu1 %vm8548_vm10, %v3897_v19 }
 0x4f9   : > { %5409 = vmatmul.mubr.msk.bf16.gmra.mrb[24].mxu1 %vm8549_vm11, %v3898_v31 }
 0x4fa   : > { %5412 = vmatprep.mubr.msk.bf16.mxu1 %vm8550_vm8, %v3901_v46 }
 0x501   : > { %5413 = vmatmul.mubr.msk.bf16.gmra.mrb[28].mxu1 %vm8551_vm12, %v4309_v7 }
 0x59c   : > { %v7657_v48 = vpop.f32.mrb[0].mxu1 }
 0x59d   : > { %v7659_v32 = vpop.f32.mrb[1].mxu1  ;;  %v4565_v5 = vsel %vm1528_vm14, %v7657_v48, 0.0 }
 0x59e   : > { %v7661_v54 = vpop.f32.mrb[2].mxu1  ;;  %v4562_v58 = vsel %vm1528_vm14, %v7659_v32, 0.0 }
 0x59f   : > { %v7663_v50 = vpop.f32.mrb[3].mxu1  ;;  %v4567_v13 = vsel %vm1528_vm14, %v7661_v54, 0.0 }
 0x5a0   : > { %v4563_v4 = vsel %vm1528_vm14, %v7663_v50, 0.0 }
 0x5a1   : > { %v4564_v8 = vadd.f32 %v4563_v4, %v4562_v58 }
 0x5a3   : > { %v4566_v52 = vadd.f32 %v4565_v5, %v4564_v8 }
 0x5a4   : > { %v7673_v41 = vpop.f32.mrb[4].mxu1 }
 0x5a5   : > { %v7675_v37 = vpop.f32.mrb[5].mxu1  ;;  %v4568_v26 = vadd.f32 %v4567_v13, %v4566_v52  ;;  %v4573_v12 = vsel %vm1528_vm14, %v7673_v41, 0.0 }
 0x5a6   : > { %v4569_v3 = vsel %vm1528_vm14, %v7675_v37, 0.0  ;;  %v7679_v43 = vpop.f32.mrb[6].mxu1 }
 0x5a7   : > { %v4570_v57 = vadd.f32 %v4569_v3, %v4568_v26  ;;  %v7681_v24 = vpop.f32.mrb[7].mxu1  ;;  %v4575_v25 = vsel %vm1528_vm14, %v7679_v43, 0.0 }
 0x5a8   : > { %v4571_v53 = vsel %vm1528_vm14, %v7681_v24, 0.0 }
 0x5a9   : > { %v4572_v63 = vadd.f32 %v4571_v53, %v4570_v57 }
 0x5ab   : > { %v4574_v35 = vadd.f32 %v4573_v12, %v4572_v63 }
 0x5ac   : > { %v7689_v6 = vpop.f32.mrb[8].mxu1 }
 0x5ad   : > { %v7691_v16 = vpop.f32.mrb[9].mxu1  ;;  %v4576_v0 = vadd.f32 %v4575_v25, %v4574_v35  ;;  %v4581_v27 = vsel %vm1528_vm14, %v7689_v6, 0.0 }
 0x5ae   : > { %v4577_v56 = vsel %vm1528_vm14, %v7691_v16, 0.0  ;;  %v7695_v23 = vpop.f32.mrb[10].mxu1 }
 0x5af   : > { %v4578_v62 = vadd.f32 %v4577_v56, %v4576_v0  ;;  %v7697_v1 = vpop.f32.mrb[11].mxu1  ;;  %v4583_v36 = vsel %vm1528_vm14, %v7695_v23, 0.0 }
 0x5b0   : > { %v4579_v11 = vsel %vm1528_vm14, %v7697_v1, 0.0 }
 0x5b1   : > { %v4580_v44 = vadd.f32 %v4579_v11, %v4578_v62 }
 0x5b3   : > { %v4582_v59 = vadd.f32 %v4581_v27, %v4580_v44 }
 0x5b4   : > { %v7705_v61 = vpop.f32.mrb[12].mxu1 }
 0x5b5   : > { %v7707_v30 = vpop.f32.mrb[13].mxu1  ;;  %v4584_v21 = vadd.f32 %v4583_v36, %v4582_v59  ;;  %v4589_v38 = vsel %vm1528_vm14, %v7705_v61, 0.0 }
 0x5b6   : > { %v4585_v9 = vsel %vm1528_vm14, %v7707_v30, 0.0  ;;  %v7711_v14 = vpop.f32.mrb[14].mxu1 }
 0x5b7   : > { %v4586_v29 = vadd.f32 %v4585_v9, %v4584_v21  ;;  %v7713_v15 = vpop.f32.mrb[15].mxu1  ;;  %v4591_v60 = vsel %vm1528_vm14, %v7711_v14, 0.0 }
 0x5b8   : > { %v4587_v33 = vsel %vm1528_vm14, %v7713_v15, 0.0 }
 0x5b9   : > { %v4588_v39 = vadd.f32 %v4587_v33, %v4586_v29 }
 0x5bb   : > { %v4590_v20 = vadd.f32 %v4589_v38, %v4588_v39 }
 0x5bc   : > { %v7721_v2 = vpop.f32.mrb[16].mxu1 }
 0x5bd   : > { %v7723_v40 = vpop.f32.mrb[17].mxu1  ;;  %v4592_v28 = vadd.f32 %v4591_v60, %v4590_v20  ;;  %v4597_v34 = vsel %vm1528_vm14, %v7721_v2, 0.0 }
 0x5be   : > { %v4593_v51 = vsel %vm1528_vm14, %v7723_v40, 0.0  ;;  %v7727_v49 = vpop.f32.mrb[18].mxu1 }
 0x5bf   : > { %v4594_v47 = vadd.f32 %v4593_v51, %v4592_v28  ;;  %v7729_v22 = vpop.f32.mrb[19].mxu1  ;;  %v4599_v55 = vsel %vm1528_vm14, %v7727_v49, 0.0 }
 0x5c0   : > { %v4595_v45 = vsel %vm1528_vm14, %v7729_v22, 0.0 }
 0x5c1   : > { %v4596_v19 = vadd.f32 %v4595_v45, %v4594_v47 }
 0x5c3   : > { %v4598_v10 = vadd.f32 %v4597_v34, %v4596_v19 }
 0x5c4   : > { %v7737_v31 = vpop.f32.mrb[20].mxu1 }
 0x5c5   : > { %v7739_v42 = vpop.f32.mrb[21].mxu1  ;;  %v4600_v46 = vadd.f32 %v4599_v55, %v4598_v10  ;;  %v4605_v5 = vsel %vm1528_vm14, %v7737_v31, 0.0 }
 0x5c6   : > { %v4601_v17 = vsel %vm1528_vm14, %v7739_v42, 0.0  ;;  %v7743_v18 = vpop.f32.mrb[22].mxu1 }
 0x5c7   : > { %v4602_v7 = vadd.f32 %v4601_v17, %v4600_v46  ;;  %v4486_v58 = vpop.f32.mrb[23].mxu1  ;;  %v4607_v13 = vsel %vm1528_vm14, %v7743_v18, 0.0 }
 0x5c8   : > { %v4603_v4 = vsel %vm1528_vm14, %v4486_v58, 0.0 }
 0x5c9   : > { %v4604_v8 = vadd.f32 %v4603_v4, %v4602_v7 }
 0x5cb   : > { %v4606_v52 = vadd.f32 %v4605_v5, %v4604_v8 }
 0x5cc   : > { %v5410_v26 = vpop.f32.mrb[24].mxu1 }
 0x5cd   : > { %v4499_v3 = vpop.f32.mrb[25].mxu1  ;;  %v4608_v57 = vadd.f32 %v4607_v13, %v4606_v52  ;;  %v4613_v56 = vsel %vm1528_vm14, %v5410_v26, 0.0 }
 0x5ce   : > { %v4609_v53 = vsel %vm1528_vm14, %v4499_v3, 0.0  ;;  %v5411_v63 = vpop.f32.mrb[26].mxu1 }
 0x5cf   : > { %v4610_v12 = vadd.f32 %v4609_v53, %v4608_v57  ;;  %v4502_v35 = vpop.f32.mrb[27].mxu1  ;;  %v4615_v11 = vsel %vm1528_vm14, %v5411_v63, 0.0 }
 0x5d0   : > { %v4611_v25 = vsel %vm1528_vm14, %v4502_v35, 0.0 }
 0x5d1   : > { %v4612_v0 = vadd.f32 %v4611_v25, %v4610_v12 }
 0x5d3   : > { %v4614_v62 = vadd.f32 %v4613_v56, %v4612_v0 }
 0x5d4   : > { %v5414_v44 = vpop.f32.mrb[28].mxu1 }
 0x5d5   : > { %v4515_v27 = vpop.f32.mrb[29].mxu1  ;;  %v4616_v59 = vadd.f32 %v4615_v11, %v4614_v62  ;;  %v4621_v38 = vsel %vm1528_vm14, %v5414_v44, 0.0 }
 0x5d6   : > { %v4617_v36 = vsel %vm1528_vm14, %v4515_v27, 0.0  ;;  %v5415_v21 = vpop.f32.mrb[30].mxu1 }
 0x5d7   : > { %v4618_v9 = vadd.f32 %v4617_v36, %v4616_v59  ;;  %v4518_v29 = vpop.f32.mrb[31].mxu1  ;;  %v4623_v60 = vsel %vm1528_vm14, %v5415_v21, 0.0 }
 0x5d8   : > { %v4619_v33 = vsel %vm1528_vm14, %v4518_v29, 0.0 }
 0x5d9   : > { %v4620_v39 = vadd.f32 %v4619_v33, %v4618_v9 }
 0x5db   : > { %v4622_v20 = vadd.f32 %v4621_v38, %v4620_v39 }
 0x5dd   : > { %v4624_v28 = vadd.f32 %v4623_v60, %v4622_v20 }
 0x5df   : > { %v4625_v51 = vrot.slane %v4624_v28, 4 }
 0x5e1   : > { %v4626_v47 = vadd.f32 %v4625_v51, %v4624_v28 }
 0x5e3   : > { %v4627_v45 = vrot.slane %v4626_v47, 2 }
 0x5e5   : > { %v4628_v19 = vadd.f32 %v4627_v45, %v4626_v47 }
 0x5e7   : > { %v4629_v34 = vrot.slane %v4628_v19, 1 }
 0x5e9   : > { %v4630_v10 = vadd.f32 %v4629_v34, %v4628_v19 }
 0x5eb   : > { %v4631_v55 = vmul.f32 0.00390625, %v4630_v10 }
 0x5ed   : > { %v7759_v46 = vsub.f32 %v7659_v32, %v4631_v55  ;;  %v7762_v17 = vsub.f32 %v7663_v50, %v4631_v55  ;;  %v7765_v7 = vsub.f32 %v7657_v48, %v4631_v55  ;;  %v7768_v4 = vsub.f32 %v7661_v54, %v4631_v55 }
 0x5ee   : > { %v7771_v8 = vsub.f32 %v7675_v37, %v4631_v55  ;;  %v7774_v5 = vsub.f32 %v7681_v24, %v4631_v55  ;;  %v7777_v52 = vsub.f32 %v7673_v41, %v4631_v55  ;;  %v7780_v32 = vsub.f32 %v7679_v43, %v4631_v55 }
 0x5ef   : > { %v7783_v50 = vsub.f32 %v7691_v16, %v4631_v55  ;;  %v7786_v48 = vsub.f32 %v7697_v1, %v4631_v55  ;;  %v7789_v54 = vsub.f32 %v7689_v6, %v4631_v55  ;;  %v7792_v37 = vsub.f32 %v7695_v23, %v4631_v55 }
 0x5f0   : > { %v7795_v24 = vsub.f32 %v7707_v30, %v4631_v55  ;;  %v7798_v41 = vsub.f32 %v7713_v15, %v4631_v55  ;;  %v7801_v43 = vsub.f32 %v7705_v61, %v4631_v55  ;;  %v7804_v16 = vsub.f32 %v7711_v14, %v4631_v55 }
 0x5f1   : > { %v7807_v1 = vsub.f32 %v7723_v40, %v4631_v55  ;;  %v7810_v6 = vsub.f32 %v7729_v22, %v4631_v55  ;;  %v7813_v23 = vsub.f32 %v7721_v2, %v4631_v55  ;;  %v7816_v30 = vsub.f32 %v7727_v49, %v4631_v55 }
 0x5f2   : > { %v7819_v15 = vsub.f32 %v7739_v42, %v4631_v55  ;;  %v7821_v61 = vsub.f32 %v4486_v58, %v4631_v55  ;;  %v7824_v14 = vsub.f32 %v7737_v31, %v4631_v55  ;;  %v7827_v40 = vsub.f32 %v7743_v18, %v4631_v55 }
 0x5f3   : > { %v7829_v13 = vsub.f32 %v4499_v3, %v4631_v55  ;;  %v7831_v22 = vsub.f32 %v4502_v35, %v4631_v55  ;;  %v7833_v2 = vsub.f32 %v5410_v26, %v4631_v55  ;;  %v7835_v57 = vsub.f32 %v5411_v63, %v4631_v55 }
 0x5f4   : > { %v7837_v49 = vsub.f32 %v4515_v27, %v4631_v55  ;;  %v7839_v42 = vsub.f32 %v4518_v29, %v4631_v55  ;;  %v7841_v58 = vsub.f32 %v5414_v44, %v4631_v55  ;;  %v7843_v53 = vsub.f32 %v5415_v21, %v4631_v55 }
 0x5f5   : > { %v4664_v31 = vmul.f32 %v7759_v46, %v7759_v46  ;;  %v4665_v18 = vmul.f32 %v7762_v17, %v7762_v17  ;;  %v4666_v26 = vmul.f32 %v7765_v7, %v7765_v7  ;;  %v4667_v3 = vmul.f32 %v7768_v4, %v7768_v4 }
 0x5f6   : > { %v4668_v25 = vmul.f32 %v7771_v8, %v7771_v8  ;;  %v4669_v62 = vmul.f32 %v7774_v5, %v7774_v5  ;;  %v4670_v27 = vmul.f32 %v7777_v52, %v7777_v52  ;;  %v4671_v21 = vmul.f32 %v7780_v32, %v7780_v32 }
 0x5f7   : > { %v4696_v63 = vsel %vm1528_vm14, %v4664_v31, 0.0  ;;  %v4697_v12 = vsel %vm1528_vm14, %v4665_v18, 0.0  ;;  %v4699_v0 = vsel %vm1528_vm14, %v4666_v26, 0.0  ;;  %v4701_v11 = vsel %vm1528_vm14, %v4667_v3, 0.0 }
 0x5f8   : > { %v4698_v35 = vadd.f32 %v4697_v12, %v4696_v63  ;;  %v4703_v59 = vsel %vm1528_vm14, %v4668_v25, 0.0  ;;  %v4705_v9 = vsel %vm1528_vm14, %v4669_v62, 0.0  ;;  %v4672_v33 = vmul.f32 %v7783_v50, %v7783_v50 }
 0x5f9   : > { %v4707_v39 = vsel %vm1528_vm14, %v4670_v27, 0.0  ;;  %v4673_v20 = vmul.f32 %v7786_v48, %v7786_v48  ;;  %v4709_v60 = vsel %vm1528_vm14, %v4671_v21, 0.0  ;;  %v4674_v51 = vmul.f32 %v7789_v54, %v7789_v54 }
 0x5fa   : > { %v4700_v56 = vadd.f32 %v4699_v0, %v4698_v35  ;;  %v4711_v47 = vsel %vm1528_vm14, %v4672_v33, 0.0  ;;  %v4675_v19 = vmul.f32 %v7792_v37, %v7792_v37  ;;  %v4676_v55 = vmul.f32 %v7795_v24, %v7795_v24 }
 0x5fb   : > { %v4713_v34 = vsel %vm1528_vm14, %v4673_v20, 0.0  ;;  %v4715_v31 = vsel %vm1528_vm14, %v4674_v51, 0.0  ;;  %v4677_v26 = vmul.f32 %v7798_v41, %v7798_v41  ;;  %v4678_v12 = vmul.f32 %v7801_v43, %v7801_v43 }
 0x5fc   : > { %v4702_v44 = vadd.f32 %v4701_v11, %v4700_v56  ;;  %v4717_v3 = vsel %vm1528_vm14, %v4675_v19, 0.0  ;;  %v4719_v35 = vsel %vm1528_vm14, %v4676_v55, 0.0  ;;  %v4679_v0 = vmul.f32 %v7804_v16, %v7804_v16 }
 0x5fd   : > { %v4721_v56 = vsel %vm1528_vm14, %v4677_v26, 0.0  ;;  %v4680_v11 = vmul.f32 %v7807_v1, %v7807_v1 }
 0x5fe   : > { %v4704_v36 = vadd.f32 %v4703_v59, %v4702_v44  ;;  %v4723_v44 = vsel %vm1528_vm14, %v4678_v12, 0.0  ;;  %v4681_v59 = vmul.f32 %v7810_v6, %v7810_v6 }
 0x600   : > { %v4706_v29 = vadd.f32 %v4705_v9, %v4704_v36  ;;  %v4725_v36 = vsel %vm1528_vm14, %v4679_v0, 0.0  ;;  %v4682_v9 = vmul.f32 %v7813_v23, %v7813_v23 }
 0x602   : > { %v4708_v38 = vadd.f32 %v4707_v39, %v4706_v29  ;;  %v4727_v29 = vsel %vm1528_vm14, %v4680_v11, 0.0  ;;  %v4683_v39 = vmul.f32 %v7816_v30, %v7816_v30 }
 0x604   : > { %v4710_v28 = vadd.f32 %v4709_v60, %v4708_v38  ;;  %v4729_v38 = vsel %vm1528_vm14, %v4681_v59, 0.0  ;;  %v4684_v60 = vmul.f32 %v7819_v15, %v7819_v15 }
 0x606   : > { %v4712_v45 = vadd.f32 %v4711_v47, %v4710_v28  ;;  %v4731_v28 = vsel %vm1528_vm14, %v4682_v9, 0.0  ;;  %v4685_v47 = vmul.f32 %v7821_v61, %v7821_v61 }
 0x608   : > { %v4714_v10 = vadd.f32 %v4713_v34, %v4712_v45  ;;  %v4733_v45 = vsel %vm1528_vm14, %v4683_v39, 0.0  ;;  %v4686_v34 = vmul.f32 %v7824_v14, %v7824_v14 }
 0x60a   : > { %v4716_v18 = vadd.f32 %v4715_v31, %v4714_v10  ;;  %v4735_v10 = vsel %vm1528_vm14, %v4684_v60, 0.0  ;;  %v4687_v31 = vmul.f32 %v7827_v40, %v7827_v40 }
 0x60c   : > { %v4718_v63 = vadd.f32 %v4717_v3, %v4716_v18  ;;  %v4737_v18 = vsel %vm1528_vm14, %v4685_v47, 0.0  ;;  %v4688_v3 = vmul.f32 %v7829_v13, %v7829_v13 }
 0x60e   : > { %v4720_v25 = vadd.f32 %v4719_v35, %v4718_v63  ;;  %v4739_v63 = vsel %vm1528_vm14, %v4686_v34, 0.0  ;;  %v4689_v35 = vmul.f32 %v7831_v22, %v7831_v22 }
 0x610   : > { %v4722_v62 = vadd.f32 %v4721_v56, %v4720_v25  ;;  %v4741_v25 = vsel %vm1528_vm14, %v4687_v31, 0.0  ;;  %v4690_v56 = vmul.f32 %v7833_v2, %v7833_v2 }
 0x612   : > { %v4724_v27 = vadd.f32 %v4723_v44, %v4722_v62  ;;  %v4743_v62 = vsel %vm1528_vm14, %v4688_v3, 0.0  ;;  %v4691_v44 = vmul.f32 %v7835_v57, %v7835_v57 }
 0x614   : > { %v4726_v21 = vadd.f32 %v4725_v36, %v4724_v27  ;;  %v4745_v27 = vsel %vm1528_vm14, %v4689_v35, 0.0  ;;  %v4692_v36 = vmul.f32 %v7837_v49, %v7837_v49 }
 0x616   : > { %v4728_v33 = vadd.f32 %v4727_v29, %v4726_v21  ;;  %v4747_v21 = vsel %vm1528_vm14, %v4690_v56, 0.0  ;;  %v4693_v29 = vmul.f32 %v7839_v42, %v7839_v42 }
 0x618   : > { %v4730_v20 = vadd.f32 %v4729_v38, %v4728_v33  ;;  %v4749_v33 = vsel %vm1528_vm14, %v4691_v44, 0.0  ;;  %v4694_v38 = vmul.f32 %v7841_v58, %v7841_v58 }
 0x61a   : > { %v4732_v51 = vadd.f32 %v4731_v28, %v4730_v20  ;;  %v4751_v20 = vsel %vm1528_vm14, %v4692_v36, 0.0  ;;  %v4695_v28 = vmul.f32 %v7843_v53, %v7843_v53 }
 0x61c   : > { %v4734_v19 = vadd.f32 %v4733_v45, %v4732_v51  ;;  %v4753_v51 = vsel %vm1528_vm14, %v4693_v29, 0.0  ;;  %v4755_v45 = vsel %vm1528_vm14, %v4694_v38, 0.0  ;;  %v4757_v34 = vsel %vm1528_vm14, %v4695_v28, 0.0  ;;  %v4806_v29 = vld [vmem:[%s5620_s17 + $0x30] sm:$0xff]  ;;  %v4809_v38 = vld [vmem:[%s5620_s17 + $0x48] sm:$0xff]  ;;  %v4812_v28 = vld [vmem:[%s5620_s17 + $0x60] sm:$0xff] }
 0x61e   : > { %v4736_v55 = vadd.f32 %v4735_v10, %v4734_v19 }
 0x620   : > { %v4738_v26 = vadd.f32 %v4737_v18, %v4736_v55 }
 0x622   : > { %v4740_v12 = vadd.f32 %v4739_v63, %v4738_v26 }
 0x624   : > { %v4742_v0 = vadd.f32 %v4741_v25, %v4740_v12 }
 0x626   : > { %v4744_v11 = vadd.f32 %v4743_v62, %v4742_v0 }
 0x628   : > { %v4746_v59 = vadd.f32 %v4745_v27, %v4744_v11 }
 0x62a   : > { %v4748_v9 = vadd.f32 %v4747_v21, %v4746_v59 }
 0x62c   : > { %v4750_v39 = vadd.f32 %v4749_v33, %v4748_v9  ;;  %v4805_v9 = vld [vmem:[%s5620_s17 + $0x28] sm:$0xff]  ;;  %v4807_v33 = vld [vmem:[%s5620_s17 + $0x38] sm:$0xff] }
 0x62e   : > { %v4752_v60 = vadd.f32 %v4751_v20, %v4750_v39  ;;  %v4808_v39 = vld [vmem:[%s5620_s17 + $0x40] sm:$0xff]  ;;  %v4810_v20 = vld [vmem:[%s5620_s17 + $0x50] sm:$0xff] }
 0x630   : > { %v4754_v47 = vadd.f32 %v4753_v51, %v4752_v60  ;;  %v4813_v51 = vld [vmem:[%s5620_s17 + $0x68] sm:$0xff] }
 0x632   : > { %v4756_v19 = vadd.f32 %v4755_v45, %v4754_v47  ;;  %v4814_v47 = vld [vmem:[%s5620_s17 + $0x70] sm:$0xff]  ;;  %v4815_v45 = vld [vmem:[%s5620_s17 + $0x78] sm:$0xff] }
 0x634   : > { %v4758_v10 = vadd.f32 %v4757_v34, %v4756_v19  ;;  %v4816_v19 = vld [vmem:[%s5620_s17 + $0x80] sm:$0xff]  ;;  %v4817_v34 = vld [vmem:[%s5620_s17 + $0x88] sm:$0xff] }
 0x636   : > { %v4759_v55 = vrot.slane %v4758_v10, 4 }
 0x638   : > { %v4760_v31 = vadd.f32 %v4759_v55, %v4758_v10  ;;  %v4818_v10 = vld [vmem:[%s5620_s17 + $0x90] sm:$0xff] }
 0x63a   : > { %v4761_v18 = vrot.slane %v4760_v31, 2 }
 0x63c   : > { %v4762_v26 = vadd.f32 %v4761_v18, %v4760_v31 }
 0x63e   : > { %v4763_v3 = vrot.slane %v4762_v26, 1 }
 0x640   : > { %v4764_v63 = vadd.f32 %v4763_v3, %v4762_v26  ;;  %v4821_v26 = vld [vmem:[%s5620_s17 + $0xa8] sm:$0xff] }
 0x642   : > { %v4765_v12 = vmul.f32 0.00390625, %v4764_v63 }
 0x644   : > { %v4766_v35 = vadd.f32 1e-05, %v4765_v12 }
 0x646   : > { %5570 = vrsqrt.f32 %v4766_v35 }
 0x650   : > { %v5571_v25 = vpop.eup %5570 }
 0x651   : > { %v4768_v0 = vmul.f32 %v5571_v25, %v7759_v46  ;;  %v4769_v56 = vmul.f32 %v5571_v25, %v7762_v17  ;;  %v4770_v62 = vmul.f32 %v5571_v25, %v7765_v7  ;;  %v4771_v11 = vmul.f32 %v5571_v25, %v7768_v4 }
 0x652   : > { %v4772_v44 = vmul.f32 %v5571_v25, %v7771_v8  ;;  %v4773_v27 = vmul.f32 %v5571_v25, %v7774_v5  ;;  %v4774_v59 = vmul.f32 %v5571_v25, %v7777_v52  ;;  %v4775_v36 = vmul.f32 %v5571_v25, %v7780_v32 }
 0x653   : > { %v4776_v46 = vmul.f32 %v5571_v25, %v7783_v50  ;;  %v4777_v17 = vmul.f32 %v5571_v25, %v7786_v48  ;;  %v4778_v7 = vmul.f32 %v5571_v25, %v7789_v54  ;;  %v4779_v4 = vmul.f32 %v5571_v25, %v7792_v37  ;;  %v4800_v50 = vld [vmem:[%s5620_s17] sm:$0xff]  ;;  %v4801_v48 = vld [vmem:[%s5620_s17 + $0x8] sm:$0xff]  ;;  %v4802_v54 = vld [vmem:[%s5620_s17 + $0x10] sm:$0xff] }
 0x654   : > { %v7954_v8 = vmul.f32 %v5571_v25, %v7795_v24  ;;  %v7957_v5 = vmul.f32 %v5571_v25, %v7798_v41  ;;  %v7960_v52 = vmul.f32 %v5571_v25, %v7801_v43  ;;  %v7963_v32 = vmul.f32 %v5571_v25, %v7804_v16  ;;  %v4803_v37 = vld [vmem:[%s5620_s17 + $0x18] sm:$0xff]  ;;  %v4804_v16 = vld [vmem:[%s5620_s17 + $0x20] sm:$0xff] }
 0x655   : > { %v7970_v21 = vmul.f32 %v5571_v25, %v7807_v1  ;;  %v7973_v24 = vmul.f32 %v5571_v25, %v7810_v6  ;;  %v7976_v41 = vmul.f32 %v5571_v25, %v7813_v23  ;;  %v7979_v43 = vmul.f32 %v5571_v25, %v7816_v30 }
 0x656   : > { %v7986_v1 = vmul.f32 %v5571_v25, %v7819_v15  ;;  %v7989_v6 = vmul.f32 %v5571_v25, %v7821_v61  ;;  %v7992_v23 = vmul.f32 %v5571_v25, %v7824_v14  ;;  %v7995_v30 = vmul.f32 %v5571_v25, %v7827_v40  ;;  %v4811_v40 = vld [vmem:[%s5620_s17 + $0x58] sm:$0xff] }
 0x657   : > { %v8001_v60 = vmul.f32 %v5571_v25, %v7829_v13  ;;  %v8004_v15 = vmul.f32 %v5571_v25, %v7831_v22  ;;  %v8007_v61 = vmul.f32 %v5571_v25, %v7833_v2  ;;  %v8010_v14 = vmul.f32 %v5571_v25, %v7835_v57 }
 0x658   : > { %v8023_v13 = vmul.f32 %v5571_v25, %v7837_v49  ;;  %v8026_v22 = vmul.f32 %v5571_v25, %v7839_v42  ;;  %v8029_v2 = vmul.f32 %v5571_v25, %v7841_v58  ;;  %v8032_v57 = vmul.f32 %v5571_v25, %v7843_v53  ;;  %v4819_v49 = vld [vmem:[%s5620_s17 + $0x98] sm:$0xff]  ;;  %v4820_v58 = vld [vmem:[%s5620_s17 + $0xa0] sm:$0xff]  ;;  %v4822_v53 = vld [vmem:[%s5620_s17 + $0xb0] sm:$0xff] }
 0x659   : > { %v4832_v55 = vadd.f32 %v4800_v50, %v4768_v0  ;;  %v4833_v31 = vadd.f32 %v4801_v48, %v4769_v56  ;;  %v4834_v18 = vadd.f32 %v4802_v54, %v4770_v62  ;;  %v4835_v42 = vadd.f32 %v4803_v37, %v4771_v11  ;;  %v4823_v25 = vld [vmem:[%s5620_s17 + $0xb8] sm:$0xff]  ;;  %v4825_v0 = vld [vmem:[%s5620_s17 + $0xc8] sm:$0xff] }
 0x65a   : > { %8552 = vst [vmem:[#allocation24_spill] sm:$0xff] %v8032_v57  ;;  %v4836_v3 = vadd.f32 %v4804_v16, %v4772_v44  ;;  %v4837_v63 = vadd.f32 %v4805_v9, %v4773_v27  ;;  %v4838_v12 = vadd.f32 %v4806_v29, %v4774_v59  ;;  %v4839_v35 = vadd.f32 %v4807_v33, %v4775_v36  ;;  %v4824_v57 = vld [vmem:[%s5620_s17 + $0xc0] sm:$0xff]  ;;  %v4826_v44 = vld [vmem:[%s5620_s17 + $0xd0] sm:$0xff]  ;;  %v4827_v27 = vld [vmem:[%s5620_s17 + $0xd8] sm:$0xff] }
 0x65b   : > { %v4840_v56 = vadd.f32 %v4808_v39, %v4776_v46  ;;  %v4841_v62 = vadd.f32 %v4809_v38, %v4777_v17  ;;  %v4842_v11 = vadd.f32 %v4810_v20, %v4778_v7  ;;  %v4843_v50 = vadd.f32 %v4811_v40, %v4779_v4  ;;  %4864 = vst.msk [vmem:[%s8020_s7] sm:$0xff] %vm1528_vm14, %v4832_v55  ;;  %v4828_v59 = vld [vmem:[%s5620_s17 + $0xe0] sm:$0xff]  ;;  %v4829_v4 = vld [vmem:[%s5620_s17 + $0xe8] sm:$0xff] }
 0x65c   : > { %4865 = vst.msk [vmem:[%s8020_s7 + $0x8] sm:$0xff] %vm1528_vm14, %v4833_v31  ;;  %4866 = vst.msk [vmem:[%s8020_s7 + $0x10] sm:$0xff] %vm1528_vm14, %v4834_v18  ;;  %v4844_v36 = vadd.f32 %v4812_v28, %v7954_v8  ;;  %v4845_v46 = vadd.f32 %v4813_v51, %v7957_v5  ;;  %v4846_v17 = vadd.f32 %v4814_v47, %v7960_v52  ;;  %v4830_v8 = vld [vmem:[%s5620_s17 + $0xf0] sm:$0xff]  ;;  %v4831_v5 = vld [vmem:[%s5620_s17 + $0xf8] sm:$0xff] }
 0x65d   : > { %4867 = vst.msk [vmem:[%s8020_s7 + $0x18] sm:$0xff] %vm1528_vm14, %v4835_v42  ;;  %v4847_v7 = vadd.f32 %v4815_v45, %v7963_v32  ;;  %4868 = vst.msk [vmem:[%s8020_s7 + $0x20] sm:$0xff] %vm1528_vm14, %v4836_v3  ;;  %v4848_v52 = vadd.f32 %v4816_v19, %v7970_v21  ;;  %v4849_v48 = vadd.f32 %v4817_v34, %v7973_v24 }
 0x65e   : > { %4869 = vst.msk [vmem:[%s8020_s7 + $0x28] sm:$0xff] %vm1528_vm14, %v4837_v63  ;;  %4870 = vst.msk [vmem:[%s8020_s7 + $0x30] sm:$0xff] %vm1528_vm14, %v4838_v12  ;;  %v4850_v32 = vadd.f32 %v4818_v10, %v7976_v41  ;;  %v4851_v54 = vadd.f32 %v4819_v49, %v7979_v43  ;;  %v4852_v37 = vadd.f32 %v4820_v58, %v7986_v1 }
 0x65f   : > { %4871 = vst.msk [vmem:[%s8020_s7 + $0x38] sm:$0xff] %vm1528_vm14, %v4839_v35  ;;  %4872 = vst.msk [vmem:[%s8020_s7 + $0x40] sm:$0xff] %vm1528_vm14, %v4840_v56  ;;  %v4853_v21 = vadd.f32 %v4821_v26, %v7989_v6  ;;  %v4854_v24 = vadd.f32 %v4822_v53, %v7992_v23  ;;  %v4855_v41 = vadd.f32 %v4823_v25, %v7995_v30 }
 0x660   : > { %4873 = vst.msk [vmem:[%s8020_s7 + $0x48] sm:$0xff] %vm1528_vm14, %v4841_v62  ;;  %4874 = vst.msk [vmem:[%s8020_s7 + $0x50] sm:$0xff] %vm1528_vm14, %v4842_v11  ;;  %v4856_v43 = vadd.f32 %v4824_v57, %v8001_v60  ;;  %v4857_v16 = vadd.f32 %v4825_v0, %v8004_v15  ;;  %v4858_v9 = vadd.f32 %v4826_v44, %v8007_v61 }
 0x661   : > { %4875 = vst.msk [vmem:[%s8020_s7 + $0x58] sm:$0xff] %vm1528_vm14, %v4843_v50  ;;  %4876 = vst.msk [vmem:[%s8020_s7 + $0x60] sm:$0xff] %vm1528_vm14, %v4844_v36  ;;  %v4859_v29 = vadd.f32 %v4827_v27, %v8010_v14  ;;  %v4860_v33 = vadd.f32 %v4828_v59, %v8023_v13  ;;  %v4861_v1 = vadd.f32 %v4829_v4, %v8026_v22  ;;  %v8553_v23 = vld [vmem:[#allocation24_spill] sm:$0xff] }
 0x662   : > { %4877 = vst.msk [vmem:[%s8020_s7 + $0x68] sm:$0xff] %vm1528_vm14, %v4845_v46  ;;  %4878 = vst.msk [vmem:[%s8020_s7 + $0x70] sm:$0xff] %vm1528_vm14, %v4846_v17  ;;  %v4862_v6 = vadd.f32 %v4830_v8, %v8029_v2  ;;  %v4863_v30 = vadd.f32 %v4831_v5, %v8553_v23 }
 0x663   : > { %4879 = vst.msk [vmem:[%s8020_s7 + $0x78] sm:$0xff] %vm1528_vm14, %v4847_v7  ;;  %4880 = vst.msk [vmem:[%s8020_s7 + $0x80] sm:$0xff] %vm1528_vm14, %v4848_v52 }
 0x664   : > { %4881 = vst.msk [vmem:[%s8020_s7 + $0x88] sm:$0xff] %vm1528_vm14, %v4849_v48  ;;  %4882 = vst.msk [vmem:[%s8020_s7 + $0x90] sm:$0xff] %vm1528_vm14, %v4850_v32 }
 0x665   : > { %4883 = vst.msk [vmem:[%s8020_s7 + $0x98] sm:$0xff] %vm1528_vm14, %v4851_v54  ;;  %4884 = vst.msk [vmem:[%s8020_s7 + $0xa0] sm:$0xff] %vm1528_vm14, %v4852_v37 }
 0x666   : > { %4885 = vst.msk [vmem:[%s8020_s7 + $0xa8] sm:$0xff] %vm1528_vm14, %v4853_v21  ;;  %4886 = vst.msk [vmem:[%s8020_s7 + $0xb0] sm:$0xff] %vm1528_vm14, %v4854_v24 }
 0x667   : > { %4887 = vst.msk [vmem:[%s8020_s7 + $0xb8] sm:$0xff] %vm1528_vm14, %v4855_v41  ;;  %4888 = vst.msk [vmem:[%s8020_s7 + $0xc0] sm:$0xff] %vm1528_vm14, %v4856_v43 }
 0x668   : > { %4889 = vst.msk [vmem:[%s8020_s7 + $0xc8] sm:$0xff] %vm1528_vm14, %v4857_v16  ;;  %4890 = vst.msk [vmem:[%s8020_s7 + $0xd0] sm:$0xff] %vm1528_vm14, %v4858_v9 }
 0x669   : > { %4891 = vst.msk [vmem:[%s8020_s7 + $0xd8] sm:$0xff] %vm1528_vm14, %v4859_v29  ;;  %4892 = vst.msk [vmem:[%s8020_s7 + $0xe0] sm:$0xff] %vm1528_vm14, %v4860_v33 }
 0x66a   : > { %4893 = vst.msk [vmem:[%s8020_s7 + $0xe8] sm:$0xff] %vm1528_vm14, %v4861_v1  ;;  %4894 = vst.msk [vmem:[%s8020_s7 + $0xf0] sm:$0xff] %vm1528_vm14, %v4862_v6 }
 0x66b   : > { %4895 = vst.msk [vmem:[%s8020_s7 + $0xf8] sm:$0xff] %vm1528_vm14, %v4863_v30 }
 0x66c PF: > { %s13_s12 = sadd.s32 1, %s5578_s12  }
 0x66d   : > { %p10_p4 = scmp.ge.s32.totalorder %s13_s12, 4  }
 0x66f   :  { %12 = sbr.rel (!%p10_p4) target bundleno = 1 (0x1), region = 66 }

</bundles_post_ra>
